<compile_context>
chip_gen: v5e
topology: v5e:2x2
jax: 0.10.0
libtpu: 0.0.40
codegen_flags: <defaults>
</compile_context>

<pallas_src>
import functools

import jax
import jax.numpy as jnp
from jax.experimental import pallas as pl
from jax.experimental.pallas import tpu as pltpu


def _round_up(x, m):
    return ((x + m - 1) // m) * m


def vae_kernel(
    # streamed activations
    x_ref, eps_ref,
    # encoder MLP  (input_dim -> 512 -> 256 -> 128), weights bf16, biases f32
    ew0_ref, eb0_ref, ew1_ref, eb1_ref, ew2_ref, eb2_ref,
    # fused heads: columns = [classifier | mu | log_var | 0-pad], padded to 128 lanes
    hw_ref, hb_ref,
    # decoder MLP ((latent+num_classes) -> 128 -> 256 -> 512 -> num_param*window)
    dw0_ref, db0_ref, dw1_ref, db1_ref, dw2_ref, db2_ref, ow_ref, ob_ref,
    # packed output: [x_rec | z | logits | kl | 0-pad]  (lane-dense)
    packed_ref,
    *, num_classes,
):
    f32 = jnp.float32
    cdt = ew0_ref.dtype                      # MXU operand dtype (bf16)
    latent = eps_ref.shape[1]
    output_dim = ow_ref.shape[1]
    tb = x_ref.shape[0]
    pw = packed_ref.shape[1]

    def dense(h, w_ref, b_ref):
        return jnp.dot(h.astype(cdt), w_ref[...], preferred_element_type=f32) + b_ref[...]

    # ---- Encoder MLP (ReLU) ----
    h = x_ref[...]
    h = jnp.maximum(dense(h, ew0_ref, eb0_ref), 0.0)
    h = jnp.maximum(dense(h, ew1_ref, eb1_ref), 0.0)
    h = jnp.maximum(dense(h, ew2_ref, eb2_ref), 0.0)

    # ---- fused heads: one MXU pass -> [logits | mu | log_var] ----
    heads = dense(h, hw_ref, hb_ref)
    logits = heads[:, :num_classes]
    mu = heads[:, num_classes:num_classes + latent]
    log_var = heads[:, num_classes + latent:num_classes + 2 * latent]

    # ---- reparameterization + KL (share exp(0.5*log_var); var = std*std) ----
    std = jnp.exp(0.5 * log_var)
    z = mu + std * eps_ref[...]
    kl = 0.5 * jnp.sum(-1.0 - log_var + mu * mu + std * std, axis=-1, keepdims=True)

    # ---- y_onehot = softmax(class_logits, dim=1) ----
    m = jnp.max(logits, axis=-1, keepdims=True)
    e = jnp.exp(logits - m)
    y = e * pl.reciprocal(jnp.sum(e, axis=-1, keepdims=True), approx=True)

    # ---- Decoder MLP (single cat([z, y]) matmul, then ReLU stack) ----
    zy = jnp.concatenate([z, y], axis=-1)
    d = jnp.maximum(dense(zy, dw0_ref, db0_ref), 0.0)
    d = jnp.maximum(dense(d, dw1_ref, db1_ref), 0.0)
    d = jnp.maximum(dense(d, dw2_ref, db2_ref), 0.0)
    out = dense(d, ow_ref, ob_ref)
    xrec = pl.reciprocal(1.0 + jnp.exp(-out), approx=True)   # Sigmoid (scale_flag == 0)

    # ---- single lane-dense packed output block ----
    o0 = 0
    o1 = o0 + output_dim
    o2 = o1 + latent
    o3 = o2 + num_classes
    o4 = o3 + 1
    packed_ref[:, o0:o1] = xrec
    packed_ref[:, o1:o2] = z
    packed_ref[:, o2:o3] = logits
    packed_ref[:, o3:o4] = kl
    if pw > o4:                                              # zero the lane padding
        packed_ref[:, o4:pw] = jnp.zeros((tb, pw - o4), f32)


# ----------------------------------------------------------------------------
# Parameter construction
# ----------------------------------------------------------------------------
def init_raw_params(key, latent_dim, num_param, window_size, num_classes):
    """Xavier-normal weights stored as (in, out) float32, zero biases
    (matches the PyTorch module's xavier_normal_ init + zeroed biases)."""
    input_dim = num_param * window_size
    output_dim = num_param * window_size

    def xavier(k, fan_in, fan_out):
        std = (2.0 / (fan_in + fan_out)) ** 0.5
        return std * jax.random.normal(k, (fan_in, fan_out), jnp.float32)

    ks = iter(jax.random.split(key, 16))
    p = {}
    p["ew0"], p["eb0"] = xavier(next(ks), input_dim, 512), jnp.zeros((512,), jnp.float32)
    p["ew1"], p["eb1"] = xavier(next(ks), 512, 256), jnp.zeros((256,), jnp.float32)
    p["ew2"], p["eb2"] = xavier(next(ks), 256, 128), jnp.zeros((128,), jnp.float32)
    p["cw"],  p["cb"]  = xavier(next(ks), 128, num_classes), jnp.zeros((num_classes,), jnp.float32)
    p["muw"], p["mub"] = xavier(next(ks), 128, latent_dim), jnp.zeros((latent_dim,), jnp.float32)
    p["lvw"], p["lvb"] = xavier(next(ks), 128, latent_dim), jnp.zeros((latent_dim,), jnp.float32)
    p["dw0"], p["db0"] = xavier(next(ks), latent_dim + num_classes, 128), jnp.zeros((128,), jnp.float32)
    p["dw1"], p["db1"] = xavier(next(ks), 128, 256), jnp.zeros((256,), jnp.float32)
    p["dw2"], p["db2"] = xavier(next(ks), 256, 512), jnp.zeros((512,), jnp.float32)
    p["ow"],  p["ob"]  = xavier(next(ks), 512, output_dim), jnp.zeros((output_dim,), jnp.float32)
    return p


def pack_params(raw, latent_dim, num_classes, compute_dtype=jnp.bfloat16):
    """Kernel-ready params: weights cast to `compute_dtype` (bf16 = native MXU rate on
    v6e/v7x), biases as (1, N) f32 rows, and the three tiny heads fused into one
    lane-padded weight + one fused bias row."""
    f32 = jnp.float32

    def w(a):
        return a.astype(compute_dtype)

    def b(a):
        return a.reshape(1, -1).astype(f32)

    head_w = _round_up(num_classes + 2 * latent_dim, 128)
    hw = jnp.zeros((128, head_w), f32)
    hw = hw.at[:, :num_classes].set(raw["cw"])
    hw = hw.at[:, num_classes:num_classes + latent_dim].set(raw["muw"])
    hw = hw.at[:, num_classes + latent_dim:num_classes + 2 * latent_dim].set(raw["lvw"])
    hb = jnp.zeros((1, head_w), f32)
    hb = hb.at[0, :num_classes].set(raw["cb"])
    hb = hb.at[0, num_classes:num_classes + latent_dim].set(raw["mub"])
    hb = hb.at[0, num_classes + latent_dim:num_classes + 2 * latent_dim].set(raw["lvb"])

    return (
        w(raw["ew0"]), b(raw["eb0"]), w(raw["ew1"]), b(raw["eb1"]),
        w(raw["ew2"]), b(raw["eb2"]),
        w(hw), hb,
        w(raw["dw0"]), b(raw["db0"]), w(raw["dw1"]), b(raw["db1"]),
        w(raw["dw2"]), b(raw["db2"]),
        w(raw["ow"]), b(raw["ob"]),
    )


# ----------------------------------------------------------------------------
# Wrapper
# ----------------------------------------------------------------------------
@functools.partial(
    jax.jit,
    static_argnames=("num_param", "window_size", "latent_dim", "num_classes", "tile_b"),
)
def vae_forward(x, eps, params, *, num_param, window_size, latent_dim, num_classes,
                tile_b=128):
    B = x.shape[0]
    input_dim = num_param * window_size
    output_dim = num_param * window_size

    x2d = x.reshape(B, input_dim).astype(jnp.float32)
    eps = eps.astype(jnp.float32)

    # batch tiling (tile_b multiple of 8; 128 suits v5e's 128-wide MXU, also fine on
    # v6e/v7x — bump to 256-512 for very large batches on v6e/v7x)
    tb = min(tile_b, _round_up(B, 8))
    assert tb % 8 == 0
    B_pad = _round_up(B, tb)
    if B_pad != B:
        x2d = jnp.pad(x2d, ((0, B_pad - B), (0, 0)))
        eps = jnp.pad(eps, ((0, B_pad - B), (0, 0)))

    used = output_dim + latent_dim + num_classes + 1
    pw = _round_up(used, 128)

    kernel = functools.partial(vae_kernel, num_classes=num_classes)

    def act_spec(ncols):
        return pl.BlockSpec((tb, ncols), lambda i: (i, 0))

    # weights/biases: full-array blocks, constant block index -> DMA'd once, resident.
    w_specs = [pl.BlockSpec(p.shape, lambda i: (0, 0)) for p in params]

    packed = pl.pallas_call(
        kernel,
        out_shape=jax.ShapeDtypeStruct((B_pad, pw), jnp.float32),
        grid=(B_pad // tb,),
        in_specs=[act_spec(input_dim), act_spec(latent_dim)] + w_specs,
        out_specs=pl.BlockSpec((tb, pw), lambda i: (i, 0)),
        compiler_params=pltpu.CompilerParams(
            dimension_semantics=("parallel",),   # shard batch tiles across v7x's 2 TCs
        ),
    )(x2d, eps, *params)

    o1 = output_dim
    o2 = o1 + latent_dim
    o3 = o2 + num_classes
    x_rec = packed[:B, :o1].reshape(B, num_param, window_size)
    z = packed[:B, o1:o2]
    logits = packed[:B, o2:o3]
    kl = packed[:B, o3]
    return z, x_rec, logits, kl


# ----------------------------------------------------------------------------
# Pure-JAX f32 reference (mirrors the PyTorch forward)
# ----------------------------------------------------------------------------
def vae_forward_ref(x, eps, raw, num_param, window_size):
    B = x.shape[0]
    h = x.reshape(B, -1).astype(jnp.float32)
    h = jax.nn.relu(h @ raw["ew0"] + raw["eb0"])
    h = jax.nn.relu(h @ raw["ew1"] + raw["eb1"])
    h = jax.nn.relu(h @ raw["ew2"] + raw["eb2"])
    logits = h @ raw["cw"] + raw["cb"]
    mu = h @ raw["muw"] + raw["mub"]
    log_var = h @ raw["lvw"] + raw["lvb"]
    z = mu + jnp.exp(0.5 * log_var) * eps
    kl = 0.5 * jnp.sum(-1.0 - log_var + mu ** 2 + jnp.exp(log_var), axis=-1)
    y = jax.nn.softmax(logits, axis=1)
    d = jax.nn.relu(jnp.concatenate([z, y], axis=1) @ raw["dw0"] + raw["db0"])
    d = jax.nn.relu(d @ raw["dw1"] + raw["db1"])
    d = jax.nn.relu(d @ raw["dw2"] + raw["db2"])
    x_rec = jax.nn.sigmoid(d @ raw["ow"] + raw["ob"]).reshape(B, num_param, window_size)
    return z, x_rec, logits, kl


if __name__ == "__main__":
    latent_dim, num_param, window_size, num_classes = 16, 4, 16, 2
    B = 200          # not a multiple of the tile -> exercises batch padding
    tile_b = 128     # two grid steps

    root = jax.random.PRNGKey(0)
    k_params, k_x, k_eps = jax.random.split(root, 3)

    raw = init_raw_params(k_params, latent_dim, num_param, window_size, num_classes)
    params = pack_params(raw, latent_dim, num_classes, compute_dtype=jnp.bfloat16)

    x = jax.random.normal(k_x, (B, num_param, window_size), jnp.float32)
    # reparameterization noise (torch.randn_like(mu)) generated deterministically outside
    eps = jax.random.normal(k_eps, (B, latent_dim), jnp.float32)

    z, x_rec, logits, kl = vae_forward(
        x, eps, params,
        num_param=num_param, window_size=window_size,
        latent_dim=latent_dim, num_classes=num_classes, tile_b=tile_b,
    )
    jax.block_until_ready((z, x_rec, logits, kl))

    # correctness vs. pure-f32 reference. Tolerances account for bf16 MXU operands and
    # approx-reciprocal softmax/sigmoid (semantics otherwise identical).
    z_r, xr_r, lg_r, kl_r = vae_forward_ref(x, eps, raw, num_param, window_size)
    assert z.shape == (B, latent_dim)
    assert x_rec.shape == (B, num_param, window_size)
    assert logits.shape == (B, num_classes)
    assert kl.shape == (B,)
    assert bool(jnp.all(jnp.isfinite(x_rec)))
    assert jnp.allclose(z, z_r, atol=5e-2, rtol=5e-2)
    assert jnp.allclose(x_rec, xr_r, atol=5e-2, rtol=5e-2)
    assert jnp.allclose(logits, lg_r, atol=5e-2, rtol=5e-2)
    assert jnp.allclose(kl, kl_r, atol=1e-1, rtol=1e-1)

    print("KERNEL_OK")
</pallas_src>

<mosaic_0001>
module attributes {stable_mosaic.version = 11 : i64} {
  func.func @vae_kernel(%arg0: i32, %arg1: memref<128x64xf32, #tpu.memory_space<vmem>>, %arg2: memref<128x16xf32, #tpu.memory_space<vmem>>, %arg3: memref<64x512xbf16, #tpu.memory_space<vmem>>, %arg4: memref<1x512xf32, #tpu.memory_space<vmem>>, %arg5: memref<512x256xbf16, #tpu.memory_space<vmem>>, %arg6: memref<1x256xf32, #tpu.memory_space<vmem>>, %arg7: memref<256x128xbf16, #tpu.memory_space<vmem>>, %arg8: memref<1x128xf32, #tpu.memory_space<vmem>>, %arg9: memref<128x128xbf16, #tpu.memory_space<vmem>>, %arg10: memref<1x128xf32, #tpu.memory_space<vmem>>, %arg11: memref<18x128xbf16, #tpu.memory_space<vmem>>, %arg12: memref<1x128xf32, #tpu.memory_space<vmem>>, %arg13: memref<128x256xbf16, #tpu.memory_space<vmem>>, %arg14: memref<1x256xf32, #tpu.memory_space<vmem>>, %arg15: memref<256x512xbf16, #tpu.memory_space<vmem>>, %arg16: memref<1x512xf32, #tpu.memory_space<vmem>>, %arg17: memref<512x64xbf16, #tpu.memory_space<vmem>>, %arg18: memref<1x64xf32, #tpu.memory_space<vmem>>, %arg19: memref<128x128xf32, #tpu.memory_space<vmem>>) attributes {dimension_semantics = [#tpu.dimension_semantics<parallel>], iteration_bounds = array<i64: 2>, scalar_prefetch = 0 : i64, scratch_operands = 0 : i64, tpu.core_type = #tpu.core_type<tc>, window_params = [{transform_indices = @transform_0, window_bounds = array<i64: 128, 64>}, {transform_indices = @transform_1, window_bounds = array<i64: 128, 16>}, {pipeline_mode = #tpu.pipeline_mode<synchronous>, transform_indices = @transform_2, window_bounds = array<i64: 64, 512>}, {pipeline_mode = #tpu.pipeline_mode<synchronous>, transform_indices = @transform_3, window_bounds = array<i64: 1, 512>}, {pipeline_mode = #tpu.pipeline_mode<synchronous>, transform_indices = @transform_4, window_bounds = array<i64: 512, 256>}, {pipeline_mode = #tpu.pipeline_mode<synchronous>, transform_indices = @transform_5, window_bounds = array<i64: 1, 256>}, {pipeline_mode = #tpu.pipeline_mode<synchronous>, transform_indices = @transform_6, window_bounds = array<i64: 256, 128>}, {pipeline_mode = #tpu.pipeline_mode<synchronous>, transform_indices = @transform_7, window_bounds = array<i64: 1, 128>}, {pipeline_mode = #tpu.pipeline_mode<synchronous>, transform_indices = @transform_8, window_bounds = array<i64: 128, 128>}, {pipeline_mode = #tpu.pipeline_mode<synchronous>, transform_indices = @transform_9, window_bounds = array<i64: 1, 128>}, {pipeline_mode = #tpu.pipeline_mode<synchronous>, transform_indices = @transform_10, window_bounds = array<i64: 18, 128>}, {pipeline_mode = #tpu.pipeline_mode<synchronous>, transform_indices = @transform_11, window_bounds = array<i64: 1, 128>}, {pipeline_mode = #tpu.pipeline_mode<synchronous>, transform_indices = @transform_12, window_bounds = array<i64: 128, 256>}, {pipeline_mode = #tpu.pipeline_mode<synchronous>, transform_indices = @transform_13, window_bounds = array<i64: 1, 256>}, {pipeline_mode = #tpu.pipeline_mode<synchronous>, transform_indices = @transform_14, window_bounds = array<i64: 256, 512>}, {pipeline_mode = #tpu.pipeline_mode<synchronous>, transform_indices = @transform_15, window_bounds = array<i64: 1, 512>}, {pipeline_mode = #tpu.pipeline_mode<synchronous>, transform_indices = @transform_16, window_bounds = array<i64: 512, 64>}, {pipeline_mode = #tpu.pipeline_mode<synchronous>, transform_indices = @transform_17, window_bounds = array<i64: 1, 64>}, {transform_indices = @transform_18, window_bounds = array<i64: 128, 128>}]} {
    %c0 = arith.constant 0 : index
    %c0_0 = arith.constant 0 : index
    %0 = vector.load %arg1[%c0, %c0_0] : memref<128x64xf32, #tpu.memory_space<vmem>>, vector<128x64xf32>
    %1 = arith.truncf %0 : vector<128x64xf32> to vector<128x64xbf16>
    %c0_1 = arith.constant 0 : index
    %c0_2 = arith.constant 0 : index
    %2 = vector.load %arg3[%c0_1, %c0_2] : memref<64x512xbf16, #tpu.memory_space<vmem>>, vector<64x512xbf16>
    %cst = arith.constant dense<0.000000e+00> : vector<128x512xf32>
    %3 = tpu.matmul %1, %2, %cst {dimension_numbers = #tpu.dot_dimension_numbers<[1], [0], [0], [1], [0, 0, 1, 1], [], []>} : vector<128x64xbf16>, vector<64x512xbf16>, vector<128x512xf32> -> vector<128x512xf32>
    %c0_3 = arith.constant 0 : index
    %c0_4 = arith.constant 0 : index
    %4 = vector.load %arg4[%c0_3, %c0_4] : memref<1x512xf32, #tpu.memory_space<vmem>>, vector<1x512xf32>
    %5 = vector.broadcast %4 : vector<1x512xf32> to vector<128x512xf32>
    %6 = arith.addf %3, %5 : vector<128x512xf32>
    %cst_5 = arith.constant 0.000000e+00 : f32
    %7 = vector.broadcast %cst_5 : f32 to vector<128x512xf32>
    %8 = arith.maximumf %6, %7 : vector<128x512xf32>
    %9 = arith.truncf %8 : vector<128x512xf32> to vector<128x512xbf16>
    %c0_6 = arith.constant 0 : index
    %c0_7 = arith.constant 0 : index
    %10 = vector.load %arg5[%c0_6, %c0_7] : memref<512x256xbf16, #tpu.memory_space<vmem>>, vector<512x256xbf16>
    %cst_8 = arith.constant dense<0.000000e+00> : vector<128x256xf32>
    %11 = tpu.matmul %9, %10, %cst_8 {dimension_numbers = #tpu.dot_dimension_numbers<[1], [0], [0], [1], [0, 0, 1, 1], [], []>} : vector<128x512xbf16>, vector<512x256xbf16>, vector<128x256xf32> -> vector<128x256xf32>
    %c0_9 = arith.constant 0 : index
    %c0_10 = arith.constant 0 : index
    %12 = vector.load %arg6[%c0_9, %c0_10] : memref<1x256xf32, #tpu.memory_space<vmem>>, vector<1x256xf32>
    %13 = vector.broadcast %12 : vector<1x256xf32> to vector<128x256xf32>
    %14 = arith.addf %11, %13 : vector<128x256xf32>
    %cst_11 = arith.constant 0.000000e+00 : f32
    %15 = vector.broadcast %cst_11 : f32 to vector<128x256xf32>
    %16 = arith.maximumf %14, %15 : vector<128x256xf32>
    %17 = arith.truncf %16 : vector<128x256xf32> to vector<128x256xbf16>
    %c0_12 = arith.constant 0 : index
    %c0_13 = arith.constant 0 : index
    %18 = vector.load %arg7[%c0_12, %c0_13] : memref<256x128xbf16, #tpu.memory_space<vmem>>, vector<256x128xbf16>
    %cst_14 = arith.constant dense<0.000000e+00> : vector<128x128xf32>
    %19 = tpu.matmul %17, %18, %cst_14 {dimension_numbers = #tpu.dot_dimension_numbers<[1], [0], [0], [1], [0, 0, 1, 1], [], []>} : vector<128x256xbf16>, vector<256x128xbf16>, vector<128x128xf32> -> vector<128x128xf32>
    %c0_15 = arith.constant 0 : index
    %c0_16 = arith.constant 0 : index
    %20 = vector.load %arg8[%c0_15, %c0_16] : memref<1x128xf32, #tpu.memory_space<vmem>>, vector<1x128xf32>
    %21 = vector.broadcast %20 : vector<1x128xf32> to vector<128x128xf32>
    %22 = arith.addf %19, %21 : vector<128x128xf32>
    %cst_17 = arith.constant 0.000000e+00 : f32
    %23 = vector.broadcast %cst_17 : f32 to vector<128x128xf32>
    %24 = arith.maximumf %22, %23 : vector<128x128xf32>
    %25 = arith.truncf %24 : vector<128x128xf32> to vector<128x128xbf16>
    %c0_18 = arith.constant 0 : index
    %c0_19 = arith.constant 0 : index
    %26 = vector.load %arg9[%c0_18, %c0_19] : memref<128x128xbf16, #tpu.memory_space<vmem>>, vector<128x128xbf16>
    %cst_20 = arith.constant dense<0.000000e+00> : vector<128x128xf32>
    %27 = tpu.matmul %25, %26, %cst_20 {dimension_numbers = #tpu.dot_dimension_numbers<[1], [0], [0], [1], [0, 0, 1, 1], [], []>} : vector<128x128xbf16>, vector<128x128xbf16>, vector<128x128xf32> -> vector<128x128xf32>
    %c0_21 = arith.constant 0 : index
    %c0_22 = arith.constant 0 : index
    %28 = vector.load %arg10[%c0_21, %c0_22] : memref<1x128xf32, #tpu.memory_space<vmem>>, vector<1x128xf32>
    %29 = vector.broadcast %28 : vector<1x128xf32> to vector<128x128xf32>
    %30 = arith.addf %27, %29 : vector<128x128xf32>
    %31 = vector.extract_strided_slice %30 {offsets = [0, 0], sizes = [128, 2], strides = [1, 1]} : vector<128x128xf32> to vector<128x2xf32>
    %32 = vector.extract_strided_slice %30 {offsets = [0, 2], sizes = [128, 16], strides = [1, 1]} : vector<128x128xf32> to vector<128x16xf32>
    %33 = vector.extract_strided_slice %30 {offsets = [0, 18], sizes = [128, 16], strides = [1, 1]} : vector<128x128xf32> to vector<128x16xf32>
    %cst_23 = arith.constant 5.000000e-01 : f32
    %34 = vector.broadcast %cst_23 : f32 to vector<128x16xf32>
    %35 = arith.mulf %34, %33 : vector<128x16xf32>
    %36 = math.exp %35 : vector<128x16xf32>
    %c0_24 = arith.constant 0 : index
    %c0_25 = arith.constant 0 : index
    %37 = vector.load %arg2[%c0_24, %c0_25] : memref<128x16xf32, #tpu.memory_space<vmem>>, vector<128x16xf32>
    %38 = arith.mulf %36, %37 : vector<128x16xf32>
    %39 = arith.addf %32, %38 : vector<128x16xf32>
    %cst_26 = arith.constant -1.000000e+00 : f32
    %40 = vector.broadcast %cst_26 : f32 to vector<128x16xf32>
    %41 = arith.subf %40, %33 : vector<128x16xf32>
    %42 = arith.mulf %32, %32 : vector<128x16xf32>
    %43 = arith.addf %41, %42 : vector<128x16xf32>
    %44 = arith.mulf %36, %36 : vector<128x16xf32>
    %45 = arith.addf %43, %44 : vector<128x16xf32>
    %cst_27 = arith.constant dense<0.000000e+00> : vector<128xf32>
    %46 = vector.multi_reduction <add>, %45, %cst_27 [1] : vector<128x16xf32> to vector<128xf32>
    %47 = vector.shape_cast %46 : vector<128xf32> to vector<128x1xf32>
    %cst_28 = arith.constant 5.000000e-01 : f32
    %48 = vector.broadcast %cst_28 : f32 to vector<128x1xf32>
    %49 = arith.mulf %48, %47 : vector<128x1xf32>
    %cst_29 = arith.constant dense<0xFF800000> : vector<128xf32>
    %50 = vector.multi_reduction <maximumf>, %31, %cst_29 [1] : vector<128x2xf32> to vector<128xf32>
    %51 = vector.shape_cast %50 : vector<128xf32> to vector<128x1xf32>
    %52 = vector.broadcast %51 : vector<128x1xf32> to vector<128x2xf32>
    %53 = arith.subf %31, %52 : vector<128x2xf32>
    %54 = math.exp %53 : vector<128x2xf32>
    %cst_30 = arith.constant dense<0.000000e+00> : vector<128xf32>
    %55 = vector.multi_reduction <add>, %54, %cst_30 [1] : vector<128x2xf32> to vector<128xf32>
    %56 = vector.shape_cast %55 : vector<128xf32> to vector<128x1xf32>
    %57 = tpu.reciprocal %56 {approx = true} : vector<128x1xf32> -> vector<128x1xf32>
    %58 = vector.broadcast %57 : vector<128x1xf32> to vector<128x2xf32>
    %59 = arith.mulf %54, %58 : vector<128x2xf32>
    %60 = tpu.concatenate %39, %59 in 1 : vector<128x16xf32>, vector<128x2xf32> -> vector<128x18xf32>
    %61 = arith.truncf %60 : vector<128x18xf32> to vector<128x18xbf16>
    %c0_31 = arith.constant 0 : index
    %c0_32 = arith.constant 0 : index
    %62 = vector.load %arg11[%c0_31, %c0_32] : memref<18x128xbf16, #tpu.memory_space<vmem>>, vector<18x128xbf16>
    %cst_33 = arith.constant dense<0.000000e+00> : vector<128x128xf32>
    %63 = tpu.matmul %61, %62, %cst_33 {dimension_numbers = #tpu.dot_dimension_numbers<[1], [0], [0], [1], [0, 0, 1, 1], [], []>} : vector<128x18xbf16>, vector<18x128xbf16>, vector<128x128xf32> -> vector<128x128xf32>
    %c0_34 = arith.constant 0 : index
    %c0_35 = arith.constant 0 : index
    %64 = vector.load %arg12[%c0_34, %c0_35] : memref<1x128xf32, #tpu.memory_space<vmem>>, vector<1x128xf32>
    %65 = vector.broadcast %64 : vector<1x128xf32> to vector<128x128xf32>
    %66 = arith.addf %63, %65 : vector<128x128xf32>
    %cst_36 = arith.constant 0.000000e+00 : f32
    %67 = vector.broadcast %cst_36 : f32 to vector<128x128xf32>
    %68 = arith.maximumf %66, %67 : vector<128x128xf32>
    %69 = arith.truncf %68 : vector<128x128xf32> to vector<128x128xbf16>
    %c0_37 = arith.constant 0 : index
    %c0_38 = arith.constant 0 : index
    %70 = vector.load %arg13[%c0_37, %c0_38] : memref<128x256xbf16, #tpu.memory_space<vmem>>, vector<128x256xbf16>
    %cst_39 = arith.constant dense<0.000000e+00> : vector<128x256xf32>
    %71 = tpu.matmul %69, %70, %cst_39 {dimension_numbers = #tpu.dot_dimension_numbers<[1], [0], [0], [1], [0, 0, 1, 1], [], []>} : vector<128x128xbf16>, vector<128x256xbf16>, vector<128x256xf32> -> vector<128x256xf32>
    %c0_40 = arith.constant 0 : index
    %c0_41 = arith.constant 0 : index
    %72 = vector.load %arg14[%c0_40, %c0_41] : memref<1x256xf32, #tpu.memory_space<vmem>>, vector<1x256xf32>
    %73 = vector.broadcast %72 : vector<1x256xf32> to vector<128x256xf32>
    %74 = arith.addf %71, %73 : vector<128x256xf32>
    %cst_42 = arith.constant 0.000000e+00 : f32
    %75 = vector.broadcast %cst_42 : f32 to vector<128x256xf32>
    %76 = arith.maximumf %74, %75 : vector<128x256xf32>
    %77 = arith.truncf %76 : vector<128x256xf32> to vector<128x256xbf16>
    %c0_43 = arith.constant 0 : index
    %c0_44 = arith.constant 0 : index
    %78 = vector.load %arg15[%c0_43, %c0_44] : memref<256x512xbf16, #tpu.memory_space<vmem>>, vector<256x512xbf16>
    %cst_45 = arith.constant dense<0.000000e+00> : vector<128x512xf32>
    %79 = tpu.matmul %77, %78, %cst_45 {dimension_numbers = #tpu.dot_dimension_numbers<[1], [0], [0], [1], [0, 0, 1, 1], [], []>} : vector<128x256xbf16>, vector<256x512xbf16>, vector<128x512xf32> -> vector<128x512xf32>
    %c0_46 = arith.constant 0 : index
    %c0_47 = arith.constant 0 : index
    %80 = vector.load %arg16[%c0_46, %c0_47] : memref<1x512xf32, #tpu.memory_space<vmem>>, vector<1x512xf32>
    %81 = vector.broadcast %80 : vector<1x512xf32> to vector<128x512xf32>
    %82 = arith.addf %79, %81 : vector<128x512xf32>
    %cst_48 = arith.constant 0.000000e+00 : f32
    %83 = vector.broadcast %cst_48 : f32 to vector<128x512xf32>
    %84 = arith.maximumf %82, %83 : vector<128x512xf32>
    %85 = arith.truncf %84 : vector<128x512xf32> to vector<128x512xbf16>
    %c0_49 = arith.constant 0 : index
    %c0_50 = arith.constant 0 : index
    %86 = vector.load %arg17[%c0_49, %c0_50] : memref<512x64xbf16, #tpu.memory_space<vmem>>, vector<512x64xbf16>
    %cst_51 = arith.constant dense<0.000000e+00> : vector<128x64xf32>
    %87 = tpu.matmul %85, %86, %cst_51 {dimension_numbers = #tpu.dot_dimension_numbers<[1], [0], [0], [1], [0, 0, 1, 1], [], []>} : vector<128x512xbf16>, vector<512x64xbf16>, vector<128x64xf32> -> vector<128x64xf32>
    %c0_52 = arith.constant 0 : index
    %c0_53 = arith.constant 0 : index
    %88 = vector.load %arg18[%c0_52, %c0_53] : memref<1x64xf32, #tpu.memory_space<vmem>>, vector<1x64xf32>
    %89 = vector.broadcast %88 : vector<1x64xf32> to vector<128x64xf32>
    %90 = arith.addf %87, %89 : vector<128x64xf32>
    %cst_54 = arith.constant 0.000000e+00 : f32
    %91 = vector.broadcast %cst_54 : f32 to vector<128x64xf32>
    %92 = arith.subf %91, %90 : vector<128x64xf32>
    %93 = math.exp %92 : vector<128x64xf32>
    %cst_55 = arith.constant 1.000000e+00 : f32
    %94 = vector.broadcast %cst_55 : f32 to vector<128x64xf32>
    %95 = arith.addf %94, %93 : vector<128x64xf32>
    %96 = tpu.reciprocal %95 {approx = true} : vector<128x64xf32> -> vector<128x64xf32>
    %c0_56 = arith.constant 0 : index
    %c0_57 = arith.constant 0 : index
    %97 = vector.load %arg19[%c0_56, %c0_57] : memref<128x128xf32, #tpu.memory_space<vmem>>, vector<128x64xf32>
    tpu.vector_store %arg19[%c0_56, %c0_57], %96 {strides = array<i32>} : memref<128x128xf32, #tpu.memory_space<vmem>>, vector<128x64xf32>,
    %c0_58 = arith.constant 0 : index
    %c64 = arith.constant 64 : index
    %98 = vector.load %arg19[%c0_58, %c64] : memref<128x128xf32, #tpu.memory_space<vmem>>, vector<128x16xf32>
    tpu.vector_store %arg19[%c0_58, %c64], %39 {strides = array<i32>} : memref<128x128xf32, #tpu.memory_space<vmem>>, vector<128x16xf32>,
    %c0_59 = arith.constant 0 : index
    %c80 = arith.constant 80 : index
    %99 = vector.load %arg19[%c0_59, %c80] : memref<128x128xf32, #tpu.memory_space<vmem>>, vector<128x2xf32>
    tpu.vector_store %arg19[%c0_59, %c80], %31 {strides = array<i32>} : memref<128x128xf32, #tpu.memory_space<vmem>>, vector<128x2xf32>,
    %c0_60 = arith.constant 0 : index
    %c82 = arith.constant 82 : index
    %100 = vector.load %arg19[%c0_60, %c82] : memref<128x128xf32, #tpu.memory_space<vmem>>, vector<128x1xf32>
    tpu.vector_store %arg19[%c0_60, %c82], %49 {strides = array<i32>} : memref<128x128xf32, #tpu.memory_space<vmem>>, vector<128x1xf32>,
    %cst_61 = arith.constant 0.000000e+00 : f32
    %101 = vector.broadcast %cst_61 : f32 to vector<128x45xf32>
    %c0_62 = arith.constant 0 : index
    %c83 = arith.constant 83 : index
    %102 = vector.load %arg19[%c0_62, %c83] : memref<128x128xf32, #tpu.memory_space<vmem>>, vector<128x45xf32>
    tpu.vector_store %arg19[%c0_62, %c83], %101 {strides = array<i32>} : memref<128x128xf32, #tpu.memory_space<vmem>>, vector<128x45xf32>,
    return
  }
  func.func @transform_0(%arg0: i32) -> (i32, i32) {
    %c0_i32 = arith.constant 0 : i32
    %c0_i32_0 = arith.constant 0 : i32
    return %arg0, %c0_i32 : i32, i32
  }
  func.func @transform_1(%arg0: i32) -> (i32, i32) {
    %c0_i32 = arith.constant 0 : i32
    %c0_i32_0 = arith.constant 0 : i32
    return %arg0, %c0_i32 : i32, i32
  }
  func.func @transform_2(%arg0: i32) -> (i32, i32) {
    %c0_i32 = arith.constant 0 : i32
    %c0_i32_0 = arith.constant 0 : i32
    %c0_i32_1 = arith.constant 0 : i32
    return %c0_i32, %c0_i32_0 : i32, i32
  }
  func.func @transform_3(%arg0: i32) -> (i32, i32) {
    %c0_i32 = arith.constant 0 : i32
    %c0_i32_0 = arith.constant 0 : i32
    %c0_i32_1 = arith.constant 0 : i32
    return %c0_i32, %c0_i32_0 : i32, i32
  }
  func.func @transform_4(%arg0: i32) -> (i32, i32) {
    %c0_i32 = arith.constant 0 : i32
    %c0_i32_0 = arith.constant 0 : i32
    %c0_i32_1 = arith.constant 0 : i32
    return %c0_i32, %c0_i32_0 : i32, i32
  }
  func.func @transform_5(%arg0: i32) -> (i32, i32) {
    %c0_i32 = arith.constant 0 : i32
    %c0_i32_0 = arith.constant 0 : i32
    %c0_i32_1 = arith.constant 0 : i32
    return %c0_i32, %c0_i32_0 : i32, i32
  }
  func.func @transform_6(%arg0: i32) -> (i32, i32) {
    %c0_i32 = arith.constant 0 : i32
    %c0_i32_0 = arith.constant 0 : i32
    %c0_i32_1 = arith.constant 0 : i32
    return %c0_i32, %c0_i32_0 : i32, i32
  }
  func.func @transform_7(%arg0: i32) -> (i32, i32) {
    %c0_i32 = arith.constant 0 : i32
    %c0_i32_0 = arith.constant 0 : i32
    %c0_i32_1 = arith.constant 0 : i32
    return %c0_i32, %c0_i32_0 : i32, i32
  }
  func.func @transform_8(%arg0: i32) -> (i32, i32) {
    %c0_i32 = arith.constant 0 : i32
    %c0_i32_0 = arith.constant 0 : i32
    %c0_i32_1 = arith.constant 0 : i32
    return %c0_i32, %c0_i32_0 : i32, i32
  }
  func.func @transform_9(%arg0: i32) -> (i32, i32) {
    %c0_i32 = arith.constant 0 : i32
    %c0_i32_0 = arith.constant 0 : i32
    %c0_i32_1 = arith.constant 0 : i32
    return %c0_i32, %c0_i32_0 : i32, i32
  }
  func.func @transform_10(%arg0: i32) -> (i32, i32) {
    %c0_i32 = arith.constant 0 : i32
    %c0_i32_0 = arith.constant 0 : i32
    %c0_i32_1 = arith.constant 0 : i32
    return %c0_i32, %c0_i32_0 : i32, i32
  }
  func.func @transform_11(%arg0: i32) -> (i32, i32) {
    %c0_i32 = arith.constant 0 : i32
    %c0_i32_0 = arith.constant 0 : i32
    %c0_i32_1 = arith.constant 0 : i32
    return %c0_i32, %c0_i32_0 : i32, i32
  }
  func.func @transform_12(%arg0: i32) -> (i32, i32) {
    %c0_i32 = arith.constant 0 : i32
    %c0_i32_0 = arith.constant 0 : i32
    %c0_i32_1 = arith.constant 0 : i32
    return %c0_i32, %c0_i32_0 : i32, i32
  }
  func.func @transform_13(%arg0: i32) -> (i32, i32) {
    %c0_i32 = arith.constant 0 : i32
    %c0_i32_0 = arith.constant 0 : i32
    %c0_i32_1 = arith.constant 0 : i32
    return %c0_i32, %c0_i32_0 : i32, i32
  }
  func.func @transform_14(%arg0: i32) -> (i32, i32) {
    %c0_i32 = arith.constant 0 : i32
    %c0_i32_0 = arith.constant 0 : i32
    %c0_i32_1 = arith.constant 0 : i32
    return %c0_i32, %c0_i32_0 : i32, i32
  }
  func.func @transform_15(%arg0: i32) -> (i32, i32) {
    %c0_i32 = arith.constant 0 : i32
    %c0_i32_0 = arith.constant 0 : i32
    %c0_i32_1 = arith.constant 0 : i32
    return %c0_i32, %c0_i32_0 : i32, i32
  }
  func.func @transform_16(%arg0: i32) -> (i32, i32) {
    %c0_i32 = arith.constant 0 : i32
    %c0_i32_0 = arith.constant 0 : i32
    %c0_i32_1 = arith.constant 0 : i32
    return %c0_i32, %c0_i32_0 : i32, i32
  }
  func.func @transform_17(%arg0: i32) -> (i32, i32) {
    %c0_i32 = arith.constant 0 : i32
    %c0_i32_0 = arith.constant 0 : i32
    %c0_i32_1 = arith.constant 0 : i32
    return %c0_i32, %c0_i32_0 : i32, i32
  }
  func.func @transform_18(%arg0: i32) -> (i32, i32) {
    %c0_i32 = arith.constant 0 : i32
    %c0_i32_0 = arith.constant 0 : i32
    return %arg0, %c0_i32 : i32, i32
  }
}

</mosaic_0001>

<bundles_post_ra>
// kernel: vae_forward.1
= control target key start
LH: loop header
LB: loop body
LE: loop exit
PB: predicated region body
PF: predicated region fallthrough
CT: control target
= control target key end

     0   :  { %s6641_s27 = smov 0   ;;  %s9658_s0 = inlined_call_operand.vmem [shape: f32[256,64], index: 0, kind: input, shape index: {}]   ;;  %s9659_s1 = inlined_call_operand.vmem [shape: f32[256,16], index: 1, kind: input, shape index: {}]   ;;  %s9660_s2 = inlined_call_operand.vmem [shape: bf16[64,512], index: 2, kind: input, shape index: {}]   ;;  %s9661_s3 = inlined_call_operand.vmem [shape: f32[1,512], index: 3, kind: input, shape index: {}]   ;;  %s9662_s4 = inlined_call_operand.vmem [shape: bf16[512,256], index: 4, kind: input, shape index: {}]   ;;  %s9663_s5 = inlined_call_operand.vmem [shape: f32[1,256], index: 5, kind: input, shape index: {}]   ;;  %s9664_s6 = inlined_call_operand.vmem [shape: bf16[256,128], index: 6, kind: input, shape index: {}]   ;;  %s9665_s7 = inlined_call_operand.vmem [shape: f32[1,128], index: 7, kind: input, shape index: {}]   ;;  %s9666_s8 = inlined_call_operand.vmem [shape: bf16[128,128], index: 8, kind: input, shape index: {}]   ;;  %s9667_s9 = inlined_call_operand.vmem [shape: f32[1,128], index: 9, kind: input, shape index: {}]   ;;  %s9668_s10 = inlined_call_operand.vmem [shape: bf16[18,128], index: 10, kind: input, shape index: {}]   ;;  %s9669_s11 = inlined_call_operand.vmem [shape: f32[1,128], index: 11, kind: input, shape index: {}]   ;;  %s9670_s12 = inlined_call_operand.vmem [shape: bf16[128,256], index: 12, kind: input, shape index: {}]   ;;  %s9671_s13 = inlined_call_operand.vmem [shape: f32[1,256], index: 13, kind: input, shape index: {}]   ;;  %s9672_s14 = inlined_call_operand.vmem [shape: bf16[256,512], index: 14, kind: input, shape index: {}]   ;;  %s9673_s15 = inlined_call_operand.vmem [shape: f32[1,512], index: 15, kind: input, shape index: {}]   ;;  %s9674_s16 = inlined_call_operand.vmem [shape: bf16[512,64], index: 16, kind: input, shape index: {}]   ;;  %s9675_s17 = inlined_call_operand.vmem [shape: f32[1,64], index: 17, kind: input, shape index: {}]   ;;  %s9676_s18 = inlined_call_operand.vmem [shape: f32[256,128], index: 18, kind: output, shape index: {}]  }
   0x1   :  { %9688 = sst [smem:[#allocation12_spill]] %s9658_s0 }
   0x2   :  { %9689 = sst [smem:[#allocation13_spill]] %s9659_s1 }
   0x3   :  { %9690 = sst [smem:[#allocation14_spill]] %s9660_s2 }
   0x4 LB: > { %s5124_s28 = sadd.s32 4294967295, %s6536_s27   ;;  %p5128_p0 = scmp.ge.s32.totalorder %s6536_s27, 1  ;;  %s6536_s27 = sphi %s6641_s27, %s28_s27  }
   0x5   : > { %p524_p1 = scmp.lt.s32.totalorder %s6536_s27, 3 }
   0x7   : > { %p525_p2 = pnand %p5128_p0, %p524_p1 }
   0x9   : > { %528 = sbr.rel (%p525_p2) target bundleno = 2257 (0x8d1), region = 92 }
   0xe   : > { %s9691_s0 = sld [smem:[#allocation14_spill]]  ;;  %s5129_s29 = sshll.u32 %s5124_s28, 4  ;;  %vm732_vm0 = vcmask 523264   ;;  %vm2747_vm1 = vcmask 15360   ;;  %vm3117_vm2 = vcmask 1040384   ;;  %vm2682_vm3 = vcmask 130048  }
   0xf   : > { %p584_p3 = scmp.lt.s32.totalorder %s5129_s29, 31  ;;  %s9692_s23 = sld [smem:[#allocation12_spill]]  ;;  %vm3092_vm4 = vcmask 146432   ;;  %vm4924_vm5 = vcmask 654848   ;;  %vm5005_vm6 = vcmask 671360   ;;  %vm5022_vm7 = vcmask 679568  }
  0x10   : > { %s9693_s25 = sld [smem:[#allocation13_spill]]  ;;  %s6539_s20 = smov 112   ;;  %vm5039_vm8 = vcmask 1048216  }
  0x11   : > { %s9715_s29 = smov (!%p584_p3, %s5129_s29), 31  ;;  %s6540_s21 = smov 126  }
  0x12   : > { %s6706_s1 = sshll.u32 %s9715_s29, 3  ;;  %s6541_s22 = smov 16  }
  0x13   : > { %s6543_s2 = smov 62  }
  0x14   : > { %v5185_v0 = vld [vmem:[%s9691_s0 + $0x60] sm:$0xf]  ;;  %v6059_v1 = vld [vmem:[%s9691_s0 + $0x6c] sm:$0xf0]  ;;  %v6057_v2 = vld [vmem:[%s9691_s0 + $0x64] sm:$0xf] }
  0x15   : > { %v5186_v3 = vor.u32 %v6059_v1, %v5185_v0  ;;  %v5187_v4 = vld [vmem:[%s9691_s0 + $0x70] sm:$0xf0]  ;;  %v5169_v5 = vld [vmem:[%s9691_s0 + $0x40] sm:$0xf]  ;;  %v6055_v6 = vld [vmem:[%s9691_s0 + $0x4c] sm:$0xf0]  ;;  %s6715_s28 = scalar_lea.vmem %s9692_s23, %s6706_s1 }
  0x16   : > { %v5190_v7 = vor.u32 %v6057_v2, %v5187_v4  ;;  %v6053_v8 = vld [vmem:[%s9691_s0 + $0x44] sm:$0xf]  ;;  %v5171_v9 = vld [vmem:[%s9691_s0 + $0x50] sm:$0xf0]  ;;  %v5170_v10 = vor.u32 %v6055_v6, %v5169_v5  ;;  %v5153_v12 = vld [vmem:[%s9691_s0 + $0x20] sm:$0xf]  ;;  %s7720_s26 = scalar_lea.vmem %s9693_s25, %s6706_s1 }
  0x17   : > { %761 = vmatpush.bf16.msra.mxu0 %v5186_v3  ;;  %6262 = vmatpush.bf16.msra.mxu2 %v5186_v3  ;;  %v5174_v11 = vor.u32 %v6053_v8, %v5171_v9  ;;  %v6051_v13 = vld [vmem:[%s9691_s0 + $0x2c] sm:$0xf0]  ;;  %v6049_v14 = vld [vmem:[%s9691_s0 + $0x24] sm:$0xf]  ;;  %v5155_v15 = vld [vmem:[%s9691_s0 + $0x30] sm:$0xf0] }
  0x18   : > { %810 = vmatpush.bf16.msra.mxu1 %v5190_v7  ;;  %6266 = vmatpush.bf16.msra.mxu3 %v5190_v7  ;;  %v5137_v16 = vld [vmem:[%s9691_s0] sm:$0xf]  ;;  %v5154_v17 = vor.u32 %v6051_v13, %v5153_v12  ;;  %v6047_v18 = vld [vmem:[%s9691_s0 + $0xc] sm:$0xf0]  ;;  %v6045_v19 = vld [vmem:[%s9691_s0 + $0x4] sm:$0xf]  ;;  %v5158_v21 = vor.u32 %v6049_v14, %v5155_v15 }
  0x19   : > { %v5139_v20 = vld [vmem:[%s9691_s0 + $0x10] sm:$0xf0]  ;;  %v5193_v22 = vld [vmem:[%s9691_s0 + $0x68] sm:$0xf]  ;;  %v6060_v23 = vld [vmem:[%s9691_s0 + $0x74] sm:$0xf0]  ;;  %v5138_v26 = vor.u32 %v6047_v18, %v5137_v16 }
  0x1a   : > { %v6058_v24 = vld [vmem:[%s9691_s0 + $0x6c] sm:$0xf]  ;;  %v5195_v25 = vld [vmem:[%s9691_s0 + $0x78] sm:$0xf0]  ;;  %v5142_v27 = vor.u32 %v6045_v19, %v5139_v20  ;;  %v602_v28 = vld [vmem:[%s6715_s28] sm:$0xff]  ;;  %v5194_v32 = vor.u32 %v6060_v23, %v5193_v22 }
  0x1b   : > { %762 = vmatpush.bf16.msra.mxu0 %v5170_v10  ;;  %6263 = vmatpush.bf16.msra.mxu2 %v5170_v10  ;;  %v603_v29 = vld [vmem:[%s6715_s28 + $0x8] sm:$0xff]  ;;  %v610_v30 = vld [vmem:[%s6715_s28 + $0x40] sm:$0xff]  ;;  %v5198_v33 = vor.u32 %v6058_v24, %v5195_v25  ;;  %v6056_v37 = vld [vmem:[%s9691_s0 + $0x54] sm:$0xf0] }
  0x1c   : > { %811 = vmatpush.bf16.msra.mxu1 %v5174_v11  ;;  %6267 = vmatpush.bf16.msra.mxu3 %v5174_v11  ;;  %v611_v31 = vld [vmem:[%s6715_s28 + $0x48] sm:$0xff]  ;;  %v6724_v35 = vpack.c.bf16 %v603_v29, %v602_v28  ;;  %v5179_v39 = vld [vmem:[%s9691_s0 + $0x58] sm:$0xf0]  ;;  %v6052_v43 = vld [vmem:[%s9691_s0 + $0x34] sm:$0xf0] }
  0x1d   : > { %v5177_v34 = vld [vmem:[%s9691_s0 + $0x48] sm:$0xf]  ;;  %v6726_v36 = vpack.c.bf16 %v611_v31, %v610_v30  ;;  %v6054_v38 = vld [vmem:[%s9691_s0 + $0x4c] sm:$0xf]  ;;  %v5163_v45 = vld [vmem:[%s9691_s0 + $0x38] sm:$0xf0] }
  0x1e   : > { %v5178_v40 = vor.u32 %v6056_v37, %v5177_v34  ;;  %v5182_v41 = vor.u32 %v6054_v38, %v5179_v39  ;;  %v5161_v42 = vld [vmem:[%s9691_s0 + $0x28] sm:$0xf]  ;;  %v6050_v44 = vld [vmem:[%s9691_s0 + $0x2c] sm:$0xf]  ;;  %v604_v48 = vld [vmem:[%s6715_s28 + $0x10] sm:$0xff] }
  0x1f   : > { %763 = vmatpush.bf16.msra.mxu0 %v5154_v17  ;;  %6264 = vmatpush.bf16.msra.mxu2 %v5154_v17  ;;  %v5162_v46 = vor.u32 %v6052_v43, %v5161_v42  ;;  %v5166_v47 = vor.u32 %v6050_v44, %v5163_v45  ;;  %v605_v49 = vld [vmem:[%s6715_s28 + $0x18] sm:$0xff]  ;;  %v612_v50 = vld [vmem:[%s6715_s28 + $0x50] sm:$0xff]  ;;  %v5145_v54 = vld [vmem:[%s9691_s0 + $0x8] sm:$0xf] }
  0x20   : > { %812 = vmatpush.bf16.msra.mxu1 %v5158_v21  ;;  %6268 = vmatpush.bf16.msra.mxu3 %v5158_v21  ;;  %v613_v51 = vld [vmem:[%s6715_s28 + $0x58] sm:$0xff]  ;;  %v6761_v52 = vpack.c.bf16 %v605_v49, %v604_v48  ;;  %v6046_v56 = vld [vmem:[%s9691_s0 + $0xc] sm:$0xf]  ;;  %v606_v60 = vld [vmem:[%s6715_s28 + $0x20] sm:$0xff] }
  0x21   : > { %v6763_v53 = vpack.c.bf16 %v613_v51, %v612_v50  ;;  %v6048_v55 = vld [vmem:[%s9691_s0 + $0x14] sm:$0xf0]  ;;  %v5147_v58 = vld [vmem:[%s9691_s0 + $0x18] sm:$0xf0]  ;;  %v607_v61 = vld [vmem:[%s6715_s28 + $0x28] sm:$0xff] }
  0x22   : > { %v5146_v57 = vor.u32 %v6048_v55, %v5145_v54  ;;  %v5150_v59 = vor.u32 %v6046_v56, %v5147_v58  ;;  %v614_v62 = vld [vmem:[%s6715_s28 + $0x60] sm:$0xff]  ;;  %v615_v63 = vld [vmem:[%s6715_s28 + $0x68] sm:$0xff]  ;;  %v6789_v0 = vpack.c.bf16 %v607_v61, %v606_v60  ;;  %v608_v2 = vld [vmem:[%s6715_s28 + $0x30] sm:$0xff] }
  0x23   : > { %764 = vmatpush.bf16.msra.mxu0 %v5138_v26  ;;  %6265 = vmatpush.bf16.msra.mxu2 %v5138_v26  ;;  %v6791_v1 = vpack.c.bf16 %v615_v63, %v614_v62  ;;  %v609_v3 = vld [vmem:[%s6715_s28 + $0x38] sm:$0xff]  ;;  %v616_v4 = vld [vmem:[%s6715_s28 + $0x70] sm:$0xff]  ;;  %v5409_v14 = vld [vmem:[%s9662_s4 + $0x160] sm:$0xf] }
  0x24   : > { %813 = vmatpush.bf16.msra.mxu1 %v5142_v27  ;;  %6269 = vmatpush.bf16.msra.mxu3 %v5142_v27  ;;  %v617_v5 = vld [vmem:[%s6715_s28 + $0x78] sm:$0xff]  ;;  %v6805_v6 = vpack.c.bf16 %v609_v3, %v608_v2  ;;  %v5417_v8 = vld [vmem:[%s9662_s4 + $0x170] sm:$0xf]  ;;  %v6106_v15 = vld [vmem:[%s9662_s4 + $0x164] sm:$0xf0]  ;;  %s6538_s28 = smov 18  }
  0x25   : > { %v6807_v7 = vpack.c.bf16 %v617_v5, %v616_v4  ;;  %v6108_v9 = vld [vmem:[%s9662_s4 + $0x174] sm:$0xf0]  ;;  %v5481_v10 = vld [vmem:[%s9662_s4 + $0x1f0] sm:$0xf]  ;;  %v5473_v16 = vld [vmem:[%s9662_s4 + $0x1e0] sm:$0xf]  ;;  %v5410_v17 = vor.u32 %v6106_v15, %v5409_v14 }
  0x26   : > { %5199 = vmatmul.msk.bf16.vlgmr.msra.gmra.mxu0 %vm732_vm0, %v6724_v35  ;;  %5203 = vmatmul.msk.bf16.vlgmr.msra.gmra.mxu2 %vm732_vm0, %v6726_v36  ;;  %v5418_v11 = vor.u32 %v6108_v9, %v5417_v8  ;;  %v6124_v12 = vld [vmem:[%s9662_s4 + $0x1f4] sm:$0xf0]  ;;  %v6122_v18 = vld [vmem:[%s9662_s4 + $0x1e4] sm:$0xf0]  ;;  %v5289_v19 = vld [vmem:[%s9662_s4 + $0x70] sm:$0xf] }
  0x27   : > { %859 = vmatpush.bf16.msrb.mxu2 %v5194_v32  ;;  %5207 = vmatmul.msk.bf16.vlgmr.msra.gmra.mxu1 %vm732_vm0, %v6724_v35  ;;  %v5482_v13 = vor.u32 %v6124_v12, %v5481_v10  ;;  %v6076_v20 = vld [vmem:[%s9662_s4 + $0x74] sm:$0xf0]  ;;  %v5474_v21 = vor.u32 %v6122_v18, %v5473_v16  ;;  %v5353_v23 = vld [vmem:[%s9662_s4 + $0xf0] sm:$0xf]  ;;  %v5281_v26 = vld [vmem:[%s9662_s4 + $0x60] sm:$0xf] }
  0x28   : > { %908 = vmatpush.bf16.msrb.mxu3 %v5198_v33  ;;  %v5290_v22 = vor.u32 %v6076_v20, %v5289_v19  ;;  %v6092_v24 = vld [vmem:[%s9662_s4 + $0xf4] sm:$0xf0]  ;;  %v6074_v27 = vld [vmem:[%s9662_s4 + $0x64] sm:$0xf0]  ;;  %v5345_v28 = vld [vmem:[%s9662_s4 + $0xe0] sm:$0xf] }
  0x29   : > { %5211 = vmatmul.msk.bf16.vlgmr.msra.gmra.mxu3 %vm732_vm0, %v6726_v36  ;;  %v5354_v25 = vor.u32 %v6092_v24, %v5353_v23  ;;  %v5282_v29 = vor.u32 %v6074_v27, %v5281_v26  ;;  %v6090_v30 = vld [vmem:[%s9662_s4 + $0xe4] sm:$0xf0]  ;;  %v5401_v32 = vld [vmem:[%s9662_s4 + $0x150] sm:$0xf]  ;;  %v6104_v33 = vld [vmem:[%s9662_s4 + $0x154] sm:$0xf0] }
  0x2a   : > { %1439 = vmatpush.bf16.msrb.mxu0 %v5290_v22  ;;  %v5346_v31 = vor.u32 %v6090_v30, %v5345_v28  ;;  %v5465_v34 = vld [vmem:[%s9662_s4 + $0x1d0] sm:$0xf]  ;;  %v6120_v37 = vld [vmem:[%s9662_s4 + $0x1d4] sm:$0xf0]  ;;  %v5265_v44 = vld [vmem:[%s9662_s4 + $0x40] sm:$0xf] }
  0x2b   : > { %860 = vmatpush.bf16.msrb.mxu2 %v5178_v40  ;;  %1488 = vmatpush.bf16.msrb.mxu1 %v5354_v25  ;;  %v5273_v38 = vld [vmem:[%s9662_s4 + $0x50] sm:$0xf]  ;;  %v6072_v39 = vld [vmem:[%s9662_s4 + $0x54] sm:$0xf0]  ;;  %v5466_v40 = vor.u32 %v6120_v37, %v5465_v34  ;;  %v6086_v48 = vld [vmem:[%s9662_s4 + $0xc4] sm:$0xf0] }
  0x2c   : > { %909 = vmatpush.bf16.msrb.mxu3 %v5182_v41  ;;  %v5274_v41 = vor.u32 %v6072_v39, %v5273_v38  ;;  %v5337_v42 = vld [vmem:[%s9662_s4 + $0xd0] sm:$0xf]  ;;  %v6088_v43 = vld [vmem:[%s9662_s4 + $0xd4] sm:$0xf0]  ;;  %v5249_v58 = vld [vmem:[%s9662_s4 + $0x20] sm:$0xf] }
  0x2d   : > { %v5338_v45 = vor.u32 %v6088_v43, %v5337_v42  ;;  %v5257_v51 = vld [vmem:[%s9662_s4 + $0x30] sm:$0xf]  ;;  %v6084_v56 = vld [vmem:[%s9662_s4 + $0xb4] sm:$0xf0]  ;;  %v5313_v60 = vld [vmem:[%s9662_s4 + $0xa0] sm:$0xf] }
  0x2e   : > { %1440 = vmatpush.bf16.msrb.mxu0 %v5282_v29  ;;  %v5321_v54 = vld [vmem:[%s9662_s4 + $0xb0] sm:$0xf]  ;;  %v6082_v62 = vld [vmem:[%s9662_s4 + $0xa4] sm:$0xf0]  ;;  %v5393_v2 = vld [vmem:[%s9662_s4 + $0x140] sm:$0xf] }
  0x2f   : > { %861 = vmatpush.bf16.msrb.mxu2 %v5162_v46  ;;  %1489 = vmatpush.bf16.msrb.mxu1 %v5346_v31  ;;  %v6070_v46 = vld [vmem:[%s9662_s4 + $0x44] sm:$0xf0]  ;;  %v5314_v63 = vor.u32 %v6082_v62, %v5313_v60  ;;  %v5241_v5 = vld [vmem:[%s9662_s4 + $0x10] sm:$0xf]  ;;  %v6080_v10 = vld [vmem:[%s9662_s4 + $0x94] sm:$0xf0] }
  0x30   : > { %910 = vmatpush.bf16.msrb.mxu3 %v5166_v47  ;;  %v5329_v47 = vld [vmem:[%s9662_s4 + $0xc0] sm:$0xf]  ;;  %v5266_v49 = vor.u32 %v6070_v46, %v5265_v44  ;;  %v6102_v3 = vld [vmem:[%s9662_s4 + $0x144] sm:$0xf0]  ;;  %v5305_v8 = vld [vmem:[%s9662_s4 + $0x90] sm:$0xf] }
  0x31   : > { %v5330_v50 = vor.u32 %v6086_v48, %v5329_v47  ;;  %v5394_v4 = vor.u32 %v6102_v3, %v5393_v2  ;;  %v5457_v12 = vld [vmem:[%s9662_s4 + $0x1c0] sm:$0xf]  ;;  %v6062_v16 = vld [vmem:[%s9662_s4 + $0x4] sm:$0xf0]  ;;  %v6100_v22 = vld [vmem:[%s9662_s4 + $0x134] sm:$0xf0] }
  0x32   : > { %1441 = vmatpush.bf16.msrb.mxu0 %v5274_v41  ;;  %v5233_v14 = vld [vmem:[%s9662_s4] sm:$0xf]  ;;  %v6078_v18 = vld [vmem:[%s9662_s4 + $0x84] sm:$0xf0]  ;;  %v5449_v24 = vld [vmem:[%s9662_s4 + $0x1b0] sm:$0xf] }
  0x33   : > { %862 = vmatpush.bf16.msrb.mxu2 %v5146_v57  ;;  %1490 = vmatpush.bf16.msrb.mxu1 %v5338_v45  ;;  %v5322_v57 = vor.u32 %v6084_v56, %v5321_v54  ;;  %v5234_v19 = vor.u32 %v6062_v16, %v5233_v14  ;;  %v6116_v25 = vld [vmem:[%s9662_s4 + $0x1b4] sm:$0xf0]  ;;  %v5377_v31 = vld [vmem:[%s9662_s4 + $0x120] sm:$0xf]  ;;  %v6114_v47 = vld [vmem:[%s9662_s4 + $0x1a4] sm:$0xf0] }
  0x34   : > { %911 = vmatpush.bf16.msrb.mxu3 %v5150_v59  ;;  %v6066_v59 = vld [vmem:[%s9662_s4 + $0x24] sm:$0xf0]  ;;  %v5450_v26 = vor.u32 %v6116_v25, %v5449_v24  ;;  %v5441_v46 = vld [vmem:[%s9662_s4 + $0x1a0] sm:$0xf]  ;;  %v5369_v3 = vld [vmem:[%s9662_s4 + $0x110] sm:$0xf] }
  0x35   : > { %v5250_v61 = vor.u32 %v6066_v59, %v5249_v58 }
  0x36   : > { %5200 = vmatmul.msk.bf16.gmra.mxu0 %vm732_vm0, %v6761_v52  ;;  %5204 = vmatmul.msk.bf16.gmra.mxu2 %vm732_vm0, %v6763_v53 }
  0x37   : > { %5208 = vmatmul.msk.bf16.gmra.mxu1 %vm732_vm0, %v6761_v52  ;;  %1537 = vmatpush.bf16.msra.mxu2 %v5418_v11  ;;  %v5306_v11 = vor.u32 %v6080_v10, %v5305_v8 }
  0x38   : > { %1586 = vmatpush.bf16.msra.mxu3 %v5482_v13  ;;  %1442 = vmatpush.bf16.msrb.mxu0 %v5266_v49  ;;  %v6118_v13 = vld [vmem:[%s9662_s4 + $0x1c4] sm:$0xf0]  ;;  %v5442_v49 = vor.u32 %v6114_v47, %v5441_v46 }
  0x39   : > { %5212 = vmatmul.msk.bf16.gmra.mxu3 %vm732_vm0, %v6763_v53  ;;  %1491 = vmatpush.bf16.msrb.mxu1 %v5330_v50  ;;  %v5458_v15 = vor.u32 %v6118_v13, %v5457_v12 }
  0x3b   : > { %1538 = vmatpush.bf16.msra.mxu2 %v5410_v17  ;;  %v5297_v17 = vld [vmem:[%s9662_s4 + $0x80] sm:$0xf] }
  0x3c   : > { %1587 = vmatpush.bf16.msra.mxu3 %v5474_v21  ;;  %v5298_v20 = vor.u32 %v6078_v18, %v5297_v17  ;;  %v5385_v21 = vld [vmem:[%s9662_s4 + $0x130] sm:$0xf] }
  0x3d   : > { %1492 = vmatpush.bf16.msrb.mxu1 %v5322_v57  ;;  %v5386_v23 = vor.u32 %v6100_v22, %v5385_v21 }
  0x40   : > { %1588 = vmatpush.bf16.msra.mxu3 %v5466_v40 }
  0x41   : > { %1493 = vmatpush.bf16.msrb.mxu1 %v5314_v63 }
  0x44   : > { %1589 = vmatpush.bf16.msra.mxu3 %v5458_v15 }
  0x45   : > { %1494 = vmatpush.bf16.msrb.mxu1 %v5306_v11 }
  0x46   : > { %5201 = vmatmul.msk.bf16.gmra.mxu0 %vm732_vm0, %v6789_v0  ;;  %5205 = vmatmul.msk.bf16.gmra.mxu2 %vm732_vm0, %v6791_v1 }
  0x47   : > { %5209 = vmatmul.msk.bf16.gmra.mxu1 %vm732_vm0, %v6789_v0 }
  0x48   : > { %1590 = vmatpush.bf16.msra.mxu3 %v5450_v26 }
  0x49   : > { %5213 = vmatmul.msk.bf16.gmra.mxu3 %vm732_vm0, %v6791_v1  ;;  %1495 = vmatpush.bf16.msrb.mxu1 %v5298_v20  ;;  %v6112_v20 = vld [vmem:[%s9662_s4 + $0x194] sm:$0xf0] }
  0x4c   : > { %1591 = vmatpush.bf16.msra.mxu3 %v5442_v49 }
  0x56   : > { %5202 = vmatmul.msk.bf16.gmra.mxu0 %vm732_vm0, %v6805_v6  ;;  %5206 = vmatmul.msk.bf16.gmra.mxu2 %vm732_vm0, %v6807_v7 }
  0x57   : > { %5210 = vmatmul.msk.bf16.gmra.mxu1 %vm732_vm0, %v6805_v6 }
  0x59   : > { %5214 = vmatmul.msk.bf16.gmra.mxu3 %vm732_vm0, %v6807_v7 }
  0x66   : > { %5215 = vmatmul.msk.bf16.vlgmr.msrb.gmra.mxu2 %vm732_vm0, %v6724_v35 }
  0x69   : > { %5223 = vmatmul.msk.bf16.vlgmr.msrb.gmra.mxu3 %vm732_vm0, %v6724_v35  ;;  %v5402_v35 = vor.u32 %v6104_v33, %v5401_v32  ;;  %v6098_v32 = vld [vmem:[%s9662_s4 + $0x124] sm:$0xf0] }
  0x6a   : > { %v5378_v34 = vor.u32 %v6098_v32, %v5377_v31 }
  0x6b   : > { %1539 = vmatpush.bf16.msra.mxu2 %v5402_v35 }
  0x6f   : > { %1540 = vmatpush.bf16.msra.mxu2 %v5394_v4  ;;  %v6096_v4 = vld [vmem:[%s9662_s4 + $0x114] sm:$0xf0] }
  0x70   : > { %v5370_v8 = vor.u32 %v6096_v4, %v5369_v3 }
  0x73   : > { %1541 = vmatpush.bf16.msra.mxu2 %v5386_v23 }
  0x76   : > { %5216 = vmatmul.msk.bf16.gmra.mxu2 %vm732_vm0, %v6761_v52 }
  0x77   : > { %1542 = vmatpush.bf16.msra.mxu2 %v5378_v34 }
  0x79   : > { %5224 = vmatmul.msk.bf16.gmra.mxu3 %vm732_vm0, %v6761_v52  ;;  %v6068_v52 = vld [vmem:[%s9662_s4 + $0x34] sm:$0xf0] }
  0x7a   : > { %v5258_v55 = vor.u32 %v6068_v52, %v5257_v51 }
  0x7b   : > { %1543 = vmatpush.bf16.msra.mxu2 %v5370_v8 }
  0x7c   : > { %1443 = vmatpush.bf16.msrb.mxu0 %v5258_v55 }
  0x80   : > { %1444 = vmatpush.bf16.msrb.mxu0 %v5250_v61 }
  0x86   : > { %5217 = vmatmul.msk.bf16.gmra.mxu2 %vm732_vm0, %v6789_v0 }
  0x89   : > { %5225 = vmatmul.msk.bf16.gmra.mxu3 %vm732_vm0, %v6789_v0  ;;  %v6064_v0 = vld [vmem:[%s9662_s4 + $0x14] sm:$0xf0] }
  0x8a   : > { %v5242_v9 = vor.u32 %v6064_v0, %v5241_v5 }
  0x8c   : > { %1445 = vmatpush.bf16.msrb.mxu0 %v5242_v9 }
  0x90   : > { %1446 = vmatpush.bf16.msrb.mxu0 %v5234_v19  ;;  %v5433_v19 = vld [vmem:[%s9662_s4 + $0x190] sm:$0xf] }
  0x91   : > { %v5434_v22 = vor.u32 %v6112_v20, %v5433_v19  ;;  %v6107_v19 = vld [vmem:[%s9662_s4 + $0x174] sm:$0xf]  ;;  %v5419_v20 = vld [vmem:[%s9662_s4 + $0x178] sm:$0xf0] }
  0x93   : > { %1592 = vmatpush.bf16.msra.mxu3 %v5434_v22 }
  0x96   : > { %5218 = vmatmul.msk.bf16.gmra.mxu2 %vm732_vm0, %v6805_v6 }
  0x99   : > { %5226 = vmatmul.msk.bf16.gmra.mxu3 %vm732_vm0, %v6805_v6  ;;  %v6992_v6 = vld [vmem:[%s9661_s3] sm:$0xf] }
  0x9a   : > { %v6995_v29 = vperm.slane %v6992_v6, 1  ;;  %v6998_v30 = vperm.slane %v6992_v6, 0 }
  0xa3   : > { %v766_v27 = vpop.f32.mrf.mxu0 }
  0xa4   : > { %v815_v28 = vpop.f32.mrf.mxu1  ;;  %v767_v33 = vadd.f32 %v766_v27, %v6998_v30 }
  0xa5   : > { %v816_v35 = vadd.f32 %v815_v28, %v6995_v29 }
  0xa6   : > { %5219 = vmatmul.msk.bf16.gmra.mxu2 %vm732_vm0, %v6726_v36  ;;  %v953_v41 = vmax.f32 %v767_v33, 0.0 }
  0xa7   : > { %v954_v44 = vmax.f32 %v816_v35, 0.0 }
  0xa9   : > { %5227 = vmatmul.msk.bf16.gmra.mxu3 %vm732_vm0, %v6726_v36  ;;  %v786_v37 = vpop.f32.mrf.mxu2 }
  0xaa   : > { %v787_v38 = vadd.f32 %v786_v37, %v6998_v30 }
  0xab   : > { %v768_v40 = vpop.f32.mrf.mxu0 }
  0xac   : > { %v835_v39 = vpop.f32.mrf.mxu3  ;;  %v769_v42 = vadd.f32 %v768_v40, %v6998_v30  ;;  %v817_v43 = vpop.f32.mrf.mxu1  ;;  %v985_v59 = vmax.f32 %v787_v38, 0.0 }
  0xad   : > { %v836_v36 = vadd.f32 %v835_v39, %v6995_v29  ;;  %v818_v45 = vadd.f32 %v817_v43, %v6995_v29  ;;  %v5361_v39 = vld [vmem:[%s9662_s4 + $0x100] sm:$0xf] }
  0xae   : > { %v957_v48 = vmax.f32 %v769_v42, 0.0 }
  0xaf   : > { %v958_v50 = vmax.f32 %v818_v45, 0.0  ;;  %v986_v62 = vmax.f32 %v836_v36, 0.0  ;;  %v6094_v36 = vld [vmem:[%s9662_s4 + $0x104] sm:$0xf0] }
  0xb0   : > { %v7022_v51 = vpack.c.bf16 %v957_v48, %v953_v41  ;;  %v5362_v40 = vor.u32 %v6094_v36, %v5361_v39  ;;  %v6123_v39 = vld [vmem:[%s9662_s4 + $0x1f4] sm:$0xf]  ;;  %v5483_v36 = vld [vmem:[%s9662_s4 + $0x1f8] sm:$0xf0] }
  0xb1   : > { %v788_v52 = vpop.f32.mrf.mxu2  ;;  %v7024_v54 = vpack.c.bf16 %v958_v50, %v954_v44 }
  0xb2   : > { %v789_v55 = vadd.f32 %v788_v52, %v6998_v30  ;;  %1447 = vmatmul.bf16.vlgmr.msrb.gmra.mxu0 %v7022_v51  ;;  %1544 = vmatpush.bf16.msra.mxu2 %v5362_v40 }
  0xb3   : > { %1496 = vmatmul.bf16.vlgmr.msrb.gmra.mxu1 %v7024_v54  ;;  %v771_v58 = vpop.f32.mrf.mxu0 }
  0xb4   : > { %v837_v56 = vpop.f32.mrf.mxu3  ;;  %v989_v60 = vmax.f32 %v789_v55, 0.0  ;;  %v820_v61 = vpop.f32.mrf.mxu1  ;;  %v772_v0 = vadd.f32 %v771_v58, %v6998_v30  ;;  %v6110_v58 = vld [vmem:[%s9662_s4 + $0x184] sm:$0xf0] }
  0xb5   : > { %v838_v57 = vadd.f32 %v837_v56, %v6995_v29  ;;  %v821_v9 = vadd.f32 %v820_v61, %v6995_v29 }
  0xb6   : > { %5220 = vmatmul.msk.bf16.gmra.mxu2 %vm732_vm0, %v6763_v53  ;;  %v7032_v2 = vpack.c.bf16 %v989_v60, %v985_v59  ;;  %v961_v14 = vmax.f32 %v772_v0, 0.0 }
  0xb7   : > { %v990_v63 = vmax.f32 %v838_v57, 0.0  ;;  %v962_v17 = vmax.f32 %v821_v9, 0.0  ;;  %v5425_v57 = vld [vmem:[%s9662_s4 + $0x180] sm:$0xf] }
  0xb8   : > { %v5426_v60 = vor.u32 %v6110_v58, %v5425_v57 }
  0xb9   : > { %5228 = vmatmul.msk.bf16.gmra.mxu3 %vm732_vm0, %v6763_v53  ;;  %v7042_v5 = vpack.c.bf16 %v990_v63, %v986_v62  ;;  %v791_v10 = vpop.f32.mrf.mxu2 }
  0xba   : > { %v792_v11 = vadd.f32 %v791_v10, %v6998_v30  ;;  %1593 = vmatpush.bf16.msra.mxu3 %v5426_v60 }
  0xbb   : > { %v773_v13 = vpop.f32.mrf.mxu0 }
  0xbc   : > { %v840_v12 = vpop.f32.mrf.mxu3  ;;  %v774_v15 = vadd.f32 %v773_v13, %v6998_v30  ;;  %v822_v16 = vpop.f32.mrf.mxu1  ;;  %v993_v33 = vmax.f32 %v792_v11, 0.0 }
  0xbd   : > { %v841_v53 = vadd.f32 %v840_v12, %v6995_v29  ;;  %v823_v18 = vadd.f32 %v822_v16, %v6995_v29 }
  0xbe   : > { %v965_v21 = vmax.f32 %v774_v15, 0.0 }
  0xbf   : > { %v966_v23 = vmax.f32 %v823_v18, 0.0  ;;  %v994_v37 = vmax.f32 %v841_v53, 0.0 }
  0xc0   : > { %v7056_v24 = vpack.c.bf16 %v965_v21, %v961_v14 }
  0xc1   : > { %v793_v25 = vpop.f32.mrf.mxu2  ;;  %v7058_v26 = vpack.c.bf16 %v966_v23, %v962_v17  ;;  %v5422_v23 = vor.u32 %v6107_v19, %v5419_v20 }
  0xc2   : > { %v794_v27 = vadd.f32 %v793_v25, %v6998_v30  ;;  %1452 = vmatmul.bf16.gmra.mxu0 %v7056_v24 }
  0xc3   : > { %1501 = vmatmul.bf16.gmra.mxu1 %v7058_v26  ;;  %v776_v32 = vpop.f32.mrf.mxu0  ;;  %1733 = vmatpush.bf16.msrb.mxu2 %v5422_v23 }
  0xc4   : > { %v842_v28 = vpop.f32.mrf.mxu3  ;;  %v997_v34 = vmax.f32 %v794_v27, 0.0  ;;  %v825_v35 = vpop.f32.mrf.mxu1  ;;  %v777_v43 = vadd.f32 %v776_v32, %v6998_v30 }
  0xc5   : > { %v843_v31 = vadd.f32 %v842_v28, %v6995_v29  ;;  %v826_v44 = vadd.f32 %v825_v35, %v6995_v29  ;;  %v5291_v35 = vld [vmem:[%s9662_s4 + $0x78] sm:$0xf0] }
  0xc6   : > { %5221 = vmatmul.msk.bf16.gmra.mxu2 %vm732_vm0, %v6791_v1  ;;  %v7072_v41 = vpack.c.bf16 %v997_v34, %v993_v33  ;;  %v969_v50 = vmax.f32 %v777_v43, 0.0  ;;  %v6075_v34 = vld [vmem:[%s9662_s4 + $0x74] sm:$0xf]  ;;  %v5486_v43 = vor.u32 %v6123_v39, %v5483_v36  ;;  %v5275_v36 = vld [vmem:[%s9662_s4 + $0x58] sm:$0xf0] }
  0xc7   : > { %v998_v38 = vmax.f32 %v843_v31, 0.0  ;;  %v970_v56 = vmax.f32 %v826_v44, 0.0  ;;  %v6091_v44 = vld [vmem:[%s9662_s4 + $0xf4] sm:$0xf] }
  0xc8   : > { %1782 = vmatpush.bf16.msrb.mxu3 %v5486_v43  ;;  %v5339_v43 = vld [vmem:[%s9662_s4 + $0xd8] sm:$0xf0] }
  0xc9   : > { %5229 = vmatmul.msk.bf16.gmra.mxu3 %vm732_vm0, %v6791_v1  ;;  %v7076_v42 = vpack.c.bf16 %v998_v38, %v994_v37  ;;  %v796_v45 = vpop.f32.mrf.mxu2  ;;  %v5294_v38 = vor.u32 %v6075_v34, %v5291_v35  ;;  %v6103_v34 = vld [vmem:[%s9662_s4 + $0x154] sm:$0xf]  ;;  %v5403_v35 = vld [vmem:[%s9662_s4 + $0x158] sm:$0xf0] }
  0xca   : > { %v797_v46 = vadd.f32 %v796_v45, %v6998_v30  ;;  %v5355_v45 = vld [vmem:[%s9662_s4 + $0xf8] sm:$0xf0]  ;;  %v5406_v39 = vor.u32 %v6103_v34, %v5403_v35  ;;  %v6101_v34 = vld [vmem:[%s9662_s4 + $0x144] sm:$0xf]  ;;  %v5395_v35 = vld [vmem:[%s9662_s4 + $0x148] sm:$0xf0] }
  0xcb   : > { %v778_v49 = vpop.f32.mrf.mxu0  ;;  %1635 = vmatpush.bf16.msra.mxu0 %v5294_v38 }
  0xcc   : > { %v845_v47 = vpop.f32.mrf.mxu3  ;;  %v779_v52 = vadd.f32 %v778_v49, %v6998_v30  ;;  %v827_v55 = vpop.f32.mrf.mxu1  ;;  %v1001_v10 = vmax.f32 %v797_v46, 0.0 }
  0xcd   : > { %v846_v48 = vadd.f32 %v845_v47, %v6995_v29  ;;  %v828_v1 = vadd.f32 %v827_v55, %v6995_v29  ;;  %v5358_v47 = vor.u32 %v6091_v44, %v5355_v45 }
  0xce   : > { %v973_v59 = vmax.f32 %v779_v52, 0.0 }
  0xcf   : > { %v974_v61 = vmax.f32 %v828_v1, 0.0  ;;  %v1002_v53 = vmax.f32 %v846_v48, 0.0  ;;  %1684 = vmatpush.bf16.msra.mxu1 %v5358_v47  ;;  %v6119_v47 = vld [vmem:[%s9662_s4 + $0x1d4] sm:$0xf] }
  0xd0   : > { %v7090_v62 = vpack.c.bf16 %v973_v59, %v969_v50 }
  0xd1   : > { %v798_v63 = vpop.f32.mrf.mxu2  ;;  %v7092_v3 = vpack.c.bf16 %v974_v61, %v970_v56 }
  0xd2   : > { %v799_v4 = vadd.f32 %v798_v63, %v6998_v30  ;;  %1457 = vmatmul.bf16.gmra.mxu0 %v7090_v62  ;;  %v5411_v63 = vld [vmem:[%s9662_s4 + $0x168] sm:$0xf0] }
  0xd3   : > { %1506 = vmatmul.bf16.gmra.mxu1 %v7092_v3  ;;  %v781_v9 = vpop.f32.mrf.mxu0 }
  0xd4   : > { %v847_v0 = vpop.f32.mrf.mxu3  ;;  %v1005_v11 = vmax.f32 %v799_v4, 0.0  ;;  %v830_v12 = vpop.f32.mrf.mxu1  ;;  %v782_v16 = vadd.f32 %v781_v9, %v6998_v30  ;;  %v6073_v9 = vld [vmem:[%s9662_s4 + $0x64] sm:$0xf] }
  0xd5   : > { %v848_v8 = vadd.f32 %v847_v0, %v6995_v29  ;;  %v831_v17 = vadd.f32 %v830_v12, %v6995_v29  ;;  %v7155_v0 = vperm.slane %v6992_v6, 2  ;;  %v6121_v12 = vld [vmem:[%s9662_s4 + $0x1e4] sm:$0xf] }
  0xd6   : > { %5222 = vmatmul.msk.bf16.gmra.mxu2 %vm732_vm0, %v6807_v7  ;;  %v7100_v14 = vpack.c.bf16 %v1005_v11, %v1001_v10  ;;  %v977_v27 = vmax.f32 %v782_v16, 0.0  ;;  %v5283_v10 = vld [vmem:[%s9662_s4 + $0x68] sm:$0xf0] }
  0xd7   : > { %v1006_v13 = vmax.f32 %v848_v8, 0.0  ;;  %v978_v32 = vmax.f32 %v831_v17, 0.0  ;;  %v7158_v8 = vperm.slane %v6992_v6, 3  ;;  %v5286_v11 = vor.u32 %v6073_v9, %v5283_v10  ;;  %v6089_v6 = vld [vmem:[%s9662_s4 + $0xe4] sm:$0xf] }
  0xd8   : > { %v5347_v16 = vld [vmem:[%s9662_s4 + $0xe8] sm:$0xf0]  ;;  %v6083_v9 = vld [vmem:[%s9662_s4 + $0xb4] sm:$0xf] }
  0xd9   : > { %5230 = vmatmul.msk.bf16.gmra.mxu3 %vm732_vm0, %v6807_v7  ;;  %v7104_v15 = vpack.c.bf16 %v1006_v13, %v1002_v53  ;;  %v801_v18 = vpop.f32.mrf.mxu2  ;;  %v5475_v53 = vld [vmem:[%s9662_s4 + $0x1e8] sm:$0xf0]  ;;  %1636 = vmatpush.bf16.msra.mxu0 %v5286_v11 }
  0xda   : > { %v802_v21 = vadd.f32 %v801_v18, %v6998_v30  ;;  %v5478_v13 = vor.u32 %v6121_v12, %v5475_v53  ;;  %v5350_v18 = vor.u32 %v6089_v6, %v5347_v16  ;;  %v5323_v53 = vld [vmem:[%s9662_s4 + $0xb8] sm:$0xf0] }
  0xdb   : > { %v783_v25 = vpop.f32.mrf.mxu0 }
  0xdc   : > { %v850_v22 = vpop.f32.mrf.mxu3  ;;  %v784_v28 = vadd.f32 %v783_v25, %v6998_v30  ;;  %v832_v31 = vpop.f32.mrf.mxu1  ;;  %v1009_v56 = vmax.f32 %v802_v21, 0.0  ;;  %1783 = vmatpush.bf16.msrb.mxu3 %v5478_v13  ;;  %1685 = vmatpush.bf16.msra.mxu1 %v5350_v18  ;;  %v5326_v13 = vor.u32 %v6083_v9, %v5323_v53 }
  0xdd   : > { %v851_v7 = vadd.f32 %v850_v22, %v6995_v29  ;;  %v833_v33 = vadd.f32 %v832_v31, %v6995_v29 }
  0xde   : > { %v981_v37 = vmax.f32 %v784_v28, 0.0 }
  0xdf   : > { %v982_v40 = vmax.f32 %v833_v33, 0.0  ;;  %v1010_v57 = vmax.f32 %v851_v7, 0.0 }
  0xe0   : > { %v7136_v46 = vpack.c.bf16 %v981_v37, %v977_v27  ;;  %v6071_v37 = vld [vmem:[%s9662_s4 + $0x54] sm:$0xf] }
  0xe1   : > { %v803_v48 = vpop.f32.mrf.mxu2  ;;  %v7138_v49 = vpack.c.bf16 %v982_v40, %v978_v32  ;;  %v6087_v40 = vld [vmem:[%s9662_s4 + $0xd4] sm:$0xf]  ;;  %v5278_v44 = vor.u32 %v6071_v37, %v5275_v36  ;;  %v5243_v36 = vld [vmem:[%s9662_s4 + $0x18] sm:$0xf0] }
  0xe2   : > { %v804_v50 = vadd.f32 %v803_v48, %v6998_v30  ;;  %1462 = vmatmul.bf16.gmra.mxu0 %v7136_v46  ;;  %v6105_v30 = vld [vmem:[%s9662_s4 + $0x164] sm:$0xf]  ;;  %v5342_v45 = vor.u32 %v6087_v40, %v5339_v43  ;;  %v5467_v48 = vld [vmem:[%s9662_s4 + $0x1d8] sm:$0xf0]  ;;  %v6063_v37 = vld [vmem:[%s9662_s4 + $0x14] sm:$0xf] }
  0xe3   : > { %1511 = vmatmul.bf16.gmra.mxu1 %v7138_v49  ;;  %v5414_v4 = vor.u32 %v6105_v30, %v5411_v63  ;;  %1637 = vmatpush.bf16.msra.mxu0 %v5278_v44  ;;  %v6079_v40 = vld [vmem:[%s9662_s4 + $0x94] sm:$0xf]  ;;  %v5307_v43 = vld [vmem:[%s9662_s4 + $0x98] sm:$0xf0]  ;;  %v5246_v44 = vor.u32 %v6063_v37, %v5243_v36 }
  0xe4   : > { %v852_v52 = vpop.f32.mrf.mxu3  ;;  %v1013_v1 = vmax.f32 %v804_v50, 0.0  ;;  %1686 = vmatpush.bf16.msra.mxu1 %v5342_v45  ;;  %v5470_v50 = vor.u32 %v6119_v47, %v5467_v48  ;;  %v5310_v45 = vor.u32 %v6079_v40, %v5307_v43  ;;  %v6117_v47 = vld [vmem:[%s9662_s4 + $0x1c4] sm:$0xf]  ;;  %v5459_v48 = vld [vmem:[%s9662_s4 + $0x1c8] sm:$0xf0] }
  0xe5   : > { %v853_v55 = vadd.f32 %v852_v52, %v6995_v29  ;;  %1734 = vmatpush.bf16.msrb.mxu2 %v5414_v4  ;;  %v6069_v52 = vld [vmem:[%s9662_s4 + $0x44] sm:$0xf]  ;;  %v5259_v4 = vld [vmem:[%s9662_s4 + $0x38] sm:$0xf0] }
  0xe6   : > { %v7144_v59 = vpack.c.bf16 %v1013_v1, %v1009_v56  ;;  %v6085_v56 = vld [vmem:[%s9662_s4 + $0xc4] sm:$0xf]  ;;  %1784 = vmatpush.bf16.msrb.mxu3 %v5470_v50  ;;  %v5462_v50 = vor.u32 %v6117_v47, %v5459_v48 }
  0xe7   : > { %v1014_v58 = vmax.f32 %v853_v55, 0.0  ;;  %v5267_v55 = vld [vmem:[%s9662_s4 + $0x48] sm:$0xf0]  ;;  %v6097_v48 = vld [vmem:[%s9662_s4 + $0x124] sm:$0xf] }
  0xe8   : > { %v5270_v1 = vor.u32 %v6069_v52, %v5267_v55  ;;  %v6061_v52 = vld [vmem:[%s9662_s4 + $0x4] sm:$0xf]  ;;  %v5235_v55 = vld [vmem:[%s9662_s4 + $0x8] sm:$0xf0] }
  0xe9   : > { %v7146_v60 = vpack.c.bf16 %v1014_v58, %v1010_v57  ;;  %v864_v61 = vpop.f32.mrf.mxu2  ;;  %1735 = vmatpush.bf16.msrb.mxu2 %v5406_v39  ;;  %v5331_v57 = vld [vmem:[%s9662_s4 + $0xc8] sm:$0xf0]  ;;  %v5398_v39 = vor.u32 %v6101_v34, %v5395_v35 }
  0xea   : > { %v865_v17 = vadd.f32 %v864_v61, %v7155_v0  ;;  %v5334_v61 = vor.u32 %v6085_v56, %v5331_v57  ;;  %1638 = vmatpush.bf16.msra.mxu0 %v5270_v1  ;;  %v5238_v56 = vor.u32 %v6061_v52, %v5235_v55  ;;  %v6077_v1 = vld [vmem:[%s9662_s4 + $0x84] sm:$0xf]  ;;  %v5299_v57 = vld [vmem:[%s9662_s4 + $0x88] sm:$0xf0]  ;;  %1785 = vmatpush.bf16.msrb.mxu3 %v5462_v50 }
  0xeb   : > { %v5379_v50 = vld [vmem:[%s9662_s4 + $0x128] sm:$0xf0]  ;;  %v6113_v55 = vld [vmem:[%s9662_s4 + $0x1a4] sm:$0xf] }
  0xec   : > { %v913_v29 = vpop.f32.mrf.mxu3  ;;  %v955_v7 = vmax.f32 %v865_v17, 0.0  ;;  %1687 = vmatpush.bf16.msra.mxu1 %v5334_v61  ;;  %v5302_v61 = vor.u32 %v6077_v1, %v5299_v57  ;;  %v5382_v52 = vor.u32 %v6097_v48, %v5379_v50 }
  0xed   : > { %v914_v19 = vadd.f32 %v913_v29, %v7158_v8  ;;  %v6067_v29 = vld [vmem:[%s9662_s4 + $0x34] sm:$0xf]  ;;  %1736 = vmatpush.bf16.msrb.mxu2 %v5398_v39 }
  0xee   : > { %v5262_v12 = vor.u32 %v6067_v29, %v5259_v4 }
  0xef   : > { %v956_v27 = vmax.f32 %v914_v19, 0.0 }
  0xf0   : > { %1639 = vmatpush.bf16.msra.mxu0 %v5262_v12  ;;  %1688 = vmatpush.bf16.msra.mxu1 %v5326_v13 }
  0xf1   : > { %v866_v20 = vpop.f32.mrf.mxu2 }
  0xf2   : > { %v867_v21 = vadd.f32 %v866_v20, %v7155_v0  ;;  %1467 = vmatmul.bf16.gmra.mxu0 %v7032_v2  ;;  %v6065_v20 = vld [vmem:[%s9662_s4 + $0x24] sm:$0xf] }
  0xf3   : > { %1516 = vmatmul.bf16.gmra.mxu1 %v7042_v5 }
  0xf4   : > { %v915_v22 = vpop.f32.mrf.mxu3  ;;  %v959_v25 = vmax.f32 %v867_v21, 0.0  ;;  %v5251_v21 = vld [vmem:[%s9662_s4 + $0x28] sm:$0xf0] }
  0xf5   : > { %v916_v23 = vadd.f32 %v915_v22, %v7158_v8 }
  0xf6   : > { %v7184_v31 = vpack.c.bf16 %v959_v25, %v955_v7  ;;  %v6081_v7 = vld [vmem:[%s9662_s4 + $0xa4] sm:$0xf]  ;;  %v5315_v25 = vld [vmem:[%s9662_s4 + $0xa8] sm:$0xf0] }
  0xf7   : > { %v960_v28 = vmax.f32 %v916_v23, 0.0  ;;  %v5254_v23 = vor.u32 %v6065_v20, %v5251_v21  ;;  %v6115_v21 = vld [vmem:[%s9662_s4 + $0x1b4] sm:$0xf] }
  0xf8   : > { %1545 = vmatmul.bf16.vlgmr.msra.gmra.mxu2 %v7184_v31 }
  0xf9   : > { %v7186_v32 = vpack.c.bf16 %v960_v28, %v956_v27  ;;  %v869_v33 = vpop.f32.mrf.mxu2  ;;  %v5318_v28 = vor.u32 %v6081_v7, %v5315_v25  ;;  %1640 = vmatpush.bf16.msra.mxu0 %v5254_v23  ;;  %v5451_v23 = vld [vmem:[%s9662_s4 + $0x1b8] sm:$0xf0] }
  0xfa   : > { %v870_v58 = vadd.f32 %v869_v33, %v7155_v0  ;;  %v5454_v7 = vor.u32 %v6115_v21, %v5451_v23  ;;  %v6111_v23 = vld [vmem:[%s9662_s4 + $0x194] sm:$0xf] }
  0xfb   : > { %1594 = vmatmul.bf16.vlgmr.msra.gmra.mxu3 %v7186_v32  ;;  %1689 = vmatpush.bf16.msra.mxu1 %v5318_v28 }
  0xfc   : > { %v918_v38 = vpop.f32.mrf.mxu3  ;;  %v963_v16 = vmax.f32 %v870_v58, 0.0  ;;  %1786 = vmatpush.bf16.msrb.mxu3 %v5454_v7  ;;  %v5435_v7 = vld [vmem:[%s9662_s4 + $0x198] sm:$0xf0] }
  0xfd   : > { %v919_v30 = vadd.f32 %v918_v38, %v7158_v8  ;;  %1641 = vmatpush.bf16.msra.mxu0 %v5246_v44 }
  0xff   : > { %v964_v18 = vmax.f32 %v919_v30, 0.0  ;;  %1690 = vmatpush.bf16.msra.mxu1 %v5310_v45 }
 0x101   : > { %v871_v63 = vpop.f32.mrf.mxu2  ;;  %1642 = vmatpush.bf16.msra.mxu0 %v5238_v56  ;;  %v5443_v56 = vld [vmem:[%s9662_s4 + $0x1a8] sm:$0xf0] }
 0x102   : > { %v872_v10 = vadd.f32 %v871_v63, %v7155_v0  ;;  %1472 = vmatmul.bf16.gmra.mxu0 %v7072_v41  ;;  %v5446_v1 = vor.u32 %v6113_v55, %v5443_v56 }
 0x103   : > { %1521 = vmatmul.bf16.gmra.mxu1 %v7076_v42 }
 0x104   : > { %v920_v11 = vpop.f32.mrf.mxu3  ;;  %v967_v17 = vmax.f32 %v872_v10, 0.0  ;;  %1691 = vmatpush.bf16.msra.mxu1 %v5302_v61  ;;  %1787 = vmatpush.bf16.msrb.mxu3 %v5446_v1  ;;  %v5363_v1 = vld [vmem:[%s9662_s4 + $0x108] sm:$0xf0] }
 0x105   : > { %v921_v6 = vadd.f32 %v920_v11, %v7158_v8 }
 0x106   : > { %v7250_v22 = vpack.c.bf16 %v967_v17, %v963_v16 }
 0x107   : > { %v968_v19 = vmax.f32 %v921_v6, 0.0 }
 0x108   : > { %1550 = vmatmul.bf16.gmra.mxu2 %v7250_v22 }
 0x109   : > { %v7258_v27 = vpack.c.bf16 %v968_v19, %v964_v18  ;;  %v874_v33 = vpop.f32.mrf.mxu2  ;;  %v6099_v18 = vld [vmem:[%s9662_s4 + $0x134] sm:$0xf]  ;;  %v5387_v19 = vld [vmem:[%s9662_s4 + $0x138] sm:$0xf0] }
 0x10a   : > { %v875_v58 = vadd.f32 %v874_v33, %v7155_v0  ;;  %v5390_v20 = vor.u32 %v6099_v18, %v5387_v19 }
 0x10b   : > { %1599 = vmatmul.bf16.gmra.mxu3 %v7258_v27 }
 0x10c   : > { %v923_v38 = vpop.f32.mrf.mxu3  ;;  %v971_v10 = vmax.f32 %v875_v58, 0.0  ;;  %1737 = vmatpush.bf16.msrb.mxu2 %v5390_v20  ;;  %v5371_v20 = vld [vmem:[%s9662_s4 + $0x118] sm:$0xf0] }
 0x10d   : > { %v924_v30 = vadd.f32 %v923_v38, %v7158_v8 }
 0x10f   : > { %v972_v12 = vmax.f32 %v924_v30, 0.0 }
 0x110   : > { %1738 = vmatpush.bf16.msrb.mxu2 %v5382_v52 }
 0x111   : > { %v876_v63 = vpop.f32.mrf.mxu2 }
 0x112   : > { %v877_v29 = vadd.f32 %v876_v63, %v7155_v0  ;;  %1477 = vmatmul.bf16.gmra.mxu0 %v7100_v14 }
 0x113   : > { %1526 = vmatmul.bf16.gmra.mxu1 %v7104_v15 }
 0x114   : > { %v925_v4 = vpop.f32.mrf.mxu3  ;;  %v975_v11 = vmax.f32 %v877_v29, 0.0 }
 0x115   : > { %v926_v9 = vadd.f32 %v925_v4, %v7158_v8 }
 0x116   : > { %v7304_v6 = vpack.c.bf16 %v975_v11, %v971_v10 }
 0x117   : > { %v976_v53 = vmax.f32 %v926_v9, 0.0 }
 0x118   : > { %1555 = vmatmul.bf16.gmra.mxu2 %v7304_v6 }
 0x119   : > { %v7306_v13 = vpack.c.bf16 %v976_v53, %v972_v12  ;;  %v879_v16 = vpop.f32.mrf.mxu2 }
 0x11a   : > { %v880_v25 = vadd.f32 %v879_v16, %v7155_v0 }
 0x11b   : > { %1604 = vmatmul.bf16.gmra.mxu3 %v7306_v13 }
 0x11c   : > { %v928_v17 = vpop.f32.mrf.mxu3  ;;  %v979_v38 = vmax.f32 %v880_v25, 0.0  ;;  %v5438_v25 = vor.u32 %v6111_v23, %v5435_v7 }
 0x11d   : > { %v929_v28 = vadd.f32 %v928_v17, %v7158_v8 }
 0x11e   : > { %1788 = vmatpush.bf16.msrb.mxu3 %v5438_v25 }
 0x11f   : > { %v980_v36 = vmax.f32 %v929_v28, 0.0 }
 0x121   : > { %v881_v33 = vpop.f32.mrf.mxu2 }
 0x122   : > { %v882_v34 = vadd.f32 %v881_v33, %v7155_v0  ;;  %1482 = vmatmul.bf16.gmra.mxu0 %v7144_v59 }
 0x123   : > { %1531 = vmatmul.bf16.gmra.mxu1 %v7146_v60 }
 0x124   : > { %v930_v35 = vpop.f32.mrf.mxu3  ;;  %v983_v39 = vmax.f32 %v882_v34, 0.0 }
 0x125   : > { %v931_v37 = vadd.f32 %v930_v35, %v7158_v8 }
 0x126   : > { %v7328_v43 = vpack.c.bf16 %v983_v39, %v979_v38 }
 0x127   : > { %v984_v40 = vmax.f32 %v931_v37, 0.0 }
 0x128   : > { %1560 = vmatmul.bf16.gmra.mxu2 %v7328_v43 }
 0x129   : > { %v7330_v44 = vpack.c.bf16 %v984_v40, %v980_v36  ;;  %v884_v45 = vpop.f32.mrf.mxu2 }
 0x12a   : > { %v885_v58 = vadd.f32 %v884_v45, %v7155_v0 }
 0x12b   : > { %1609 = vmatmul.bf16.gmra.mxu3 %v7330_v44 }
 0x12c   : > { %v933_v47 = vpop.f32.mrf.mxu3  ;;  %v987_v9 = vmax.f32 %v885_v58, 0.0  ;;  %v6109_v58 = vld [vmem:[%s9662_s4 + $0x184] sm:$0xf] }
 0x12d   : > { %v934_v61 = vadd.f32 %v933_v47, %v7158_v8 }
 0x12f   : > { %v7346_v57 = vpop.f32.mrf.mxu0  ;;  %v988_v11 = vmax.f32 %v934_v61, 0.0 }
 0x131   : > { %v886_v30 = vpop.f32.mrf.mxu2 }
 0x132   : > { %v887_v63 = vadd.f32 %v886_v30, %v7155_v0  ;;  %1643 = vmatmul.bf16.vlgmr.msra.gmra.mxu0 %v7022_v51  ;;  %v7362_v51 = vpop.f32.mrf.mxu1  ;;  %v5427_v30 = vld [vmem:[%s9662_s4 + $0x188] sm:$0xf0] }
 0x133   : > { %1692 = vmatmul.bf16.vlgmr.msra.gmra.mxu1 %v7024_v54  ;;  %v6095_v54 = vld [vmem:[%s9662_s4 + $0x114] sm:$0xf] }
 0x134   : > { %v935_v29 = vpop.f32.mrf.mxu3  ;;  %v991_v10 = vmax.f32 %v887_v63, 0.0  ;;  %v5374_v21 = vor.u32 %v6095_v54, %v5371_v20  ;;  %v5430_v63 = vor.u32 %v6109_v58, %v5427_v30 }
 0x135   : > { %v936_v4 = vadd.f32 %v935_v29, %v7158_v8 }
 0x136   : > { %v7354_v53 = vpack.c.bf16 %v991_v10, %v987_v9  ;;  %1739 = vmatpush.bf16.msrb.mxu2 %v5374_v21  ;;  %1789 = vmatpush.bf16.msrb.mxu3 %v5430_v63  ;;  %v6131_v63 = vld [vmem:[%s9664_s6 + $0x30] sm:$0xff] }
 0x137   : > { %v992_v12 = vmax.f32 %v936_v4, 0.0  ;;  %v7356_v16 = vpop.f32.mrf.mxu0 }
 0x138   : > { %1565 = vmatmul.bf16.gmra.mxu2 %v7354_v53 }
 0x139   : > { %v7358_v17 = vpack.c.bf16 %v992_v12, %v988_v11  ;;  %v889_v18 = vpop.f32.mrf.mxu2 }
 0x13a   : > { %v890_v33 = vadd.f32 %v889_v18, %v7155_v0  ;;  %v7384_v36 = vpop.f32.mrf.mxu1 }
 0x13b   : > { %1614 = vmatmul.bf16.gmra.mxu3 %v7358_v17 }
 0x13c   : > { %v938_v19 = vpop.f32.mrf.mxu3  ;;  %v995_v40 = vmax.f32 %v890_v33, 0.0 }
 0x13d   : > { %v939_v34 = vadd.f32 %v938_v19, %v7158_v8 }
 0x13f   : > { %v7376_v28 = vpop.f32.mrf.mxu0  ;;  %v996_v47 = vmax.f32 %v939_v34, 0.0 }
 0x141   : > { %v891_v35 = vpop.f32.mrf.mxu2 }
 0x142   : > { %v892_v37 = vadd.f32 %v891_v35, %v7155_v0  ;;  %1648 = vmatmul.bf16.gmra.mxu0 %v7056_v24  ;;  %v7406_v29 = vpop.f32.mrf.mxu1 }
 0x143   : > { %1697 = vmatmul.bf16.gmra.mxu1 %v7058_v26  ;;  %v6093_v26 = vld [vmem:[%s9662_s4 + $0x104] sm:$0xf] }
 0x144   : > { %v940_v38 = vpop.f32.mrf.mxu3  ;;  %v999_v45 = vmax.f32 %v892_v37, 0.0  ;;  %v5366_v61 = vor.u32 %v6093_v26, %v5363_v1 }
 0x145   : > { %v941_v39 = vadd.f32 %v940_v38, %v7158_v8 }
 0x146   : > { %v7386_v50 = vpack.c.bf16 %v999_v45, %v995_v40  ;;  %1740 = vmatpush.bf16.msrb.mxu2 %v5366_v61 }
 0x147   : > { %v1000_v48 = vmax.f32 %v941_v39, 0.0  ;;  %v7388_v52 = vpop.f32.mrf.mxu0 }
 0x148   : > { %1570 = vmatmul.bf16.gmra.mxu2 %v7386_v50 }
 0x149   : > { %v7390_v55 = vpack.c.bf16 %v1000_v48, %v996_v47  ;;  %v894_v24 = vpop.f32.mrf.mxu2 }
 0x14a   : > { %v895_v9 = vadd.f32 %v894_v24, %v7155_v0  ;;  %v7420_v33 = vpop.f32.mrf.mxu1 }
 0x14b   : > { %1619 = vmatmul.bf16.gmra.mxu3 %v7390_v55 }
 0x14c   : > { %v943_v56 = vpop.f32.mrf.mxu3  ;;  %v1003_v54 = vmax.f32 %v895_v9, 0.0 }
 0x14d   : > { %v944_v10 = vadd.f32 %v943_v56, %v7158_v8 }
 0x14f   : > { %v7408_v4 = vpop.f32.mrf.mxu0  ;;  %v1004_v21 = vmax.f32 %v944_v10, 0.0 }
 0x151   : > { %v896_v11 = vpop.f32.mrf.mxu2 }
 0x152   : > { %v897_v12 = vadd.f32 %v896_v11, %v7155_v0  ;;  %1653 = vmatmul.bf16.gmra.mxu0 %v7090_v62  ;;  %v7428_v39 = vpop.f32.mrf.mxu1 }
 0x153   : > { %1702 = vmatmul.bf16.gmra.mxu1 %v7092_v3 }
 0x154   : > { %v945_v18 = vpop.f32.mrf.mxu3  ;;  %v1007_v20 = vmax.f32 %v897_v12, 0.0 }
 0x155   : > { %v946_v19 = vadd.f32 %v945_v18, %v7158_v8 }
 0x156   : > { %v7416_v7 = vpack.c.bf16 %v1007_v20, %v1003_v54  ;;  %v6127_v20 = vld [vmem:[%s9664_s6 + $0x10] sm:$0xff] }
 0x157   : > { %v1008_v23 = vmax.f32 %v946_v19, 0.0  ;;  %v7423_v34 = vpop.f32.mrf.mxu0 }
 0x158   : > { %1575 = vmatmul.bf16.gmra.mxu2 %v7416_v7 }
 0x159   : > { %v7418_v25 = vpack.c.bf16 %v1008_v23, %v1004_v21  ;;  %v899_v62 = vpop.f32.mrf.mxu2  ;;  %v6126_v21 = vld [vmem:[%s9664_s6 + $0x8] sm:$0xff] }
 0x15a   : > { %v900_v3 = vadd.f32 %v899_v62, %v7155_v0 }
 0x15b   : > { %1624 = vmatmul.bf16.gmra.mxu3 %v7418_v25 }
 0x15c   : > { %v948_v35 = vpop.f32.mrf.mxu3  ;;  %v1011_v24 = vmax.f32 %v900_v3, 0.0 }
 0x15d   : > { %v949_v37 = vadd.f32 %v948_v35, %v7158_v8  ;;  %v6125_v35 = vld [vmem:[%s9664_s6] sm:$0xff] }
 0x15f   : > { %v7432_v47 = vpop.f32.mrf.mxu0  ;;  %v1012_v26 = vmax.f32 %v949_v37, 0.0 }
 0x161   : > { %v901_v38 = vpop.f32.mrf.mxu2 }
 0x162   : > { %v902_v40 = vadd.f32 %v901_v38, %v7155_v0  ;;  %1658 = vmatmul.bf16.gmra.mxu0 %v7136_v46  ;;  %v6132_v46 = vld [vmem:[%s9664_s6 + $0x38] sm:$0xff]  ;;  %v7445_v0 = vpop.f32.mrf.mxu1 }
 0x163   : > { %1707 = vmatmul.bf16.gmra.mxu1 %v7138_v49  ;;  %2011 = vmatpush.bf16.msrb.mxu0 %v6132_v46 }
 0x164   : > { %v950_v45 = vpop.f32.mrf.mxu3  ;;  %v1015_v56 = vmax.f32 %v902_v40, 0.0  ;;  %v7508_v40 = vld [vmem:[%s9663_s5] sm:$0x3] }
 0x165   : > { %v951_v48 = vadd.f32 %v950_v45, %v7158_v8  ;;  %v6140_v8 = vld [vmem:[%s9664_s6 + $0x78] sm:$0xff] }
 0x166   : > { %v7436_v58 = vpack.c.bf16 %v1015_v56, %v1011_v24  ;;  %2060 = vmatpush.bf16.msrb.mxu1 %v6140_v8 }
 0x167   : > { %v1016_v1 = vmax.f32 %v951_v48, 0.0  ;;  %v7447_v49 = vpop.f32.mrf.mxu0  ;;  %2012 = vmatpush.bf16.msrb.mxu0 %v6131_v63 }
 0x168   : > { %1580 = vmatmul.bf16.gmra.mxu2 %v7436_v58 }
 0x169   : > { %v7438_v61 = vpack.c.bf16 %v1016_v1, %v1012_v26 }
 0x16a   : > { %v7454_v30 = vpop.f32.mrf.mxu1 }
 0x16b   : > { %1629 = vmatmul.bf16.gmra.mxu3 %v7438_v61 }
 0x16f   : > { %v7459_v9 = vpop.f32.mrf.mxu0 }
 0x172   : > { %1663 = vmatmul.bf16.gmra.mxu0 %v7032_v2  ;;  %v6130_v2 = vld [vmem:[%s9664_s6 + $0x28] sm:$0xff]  ;;  %v7469_v12 = vpop.f32.mrf.mxu1 }
 0x173   : > { %1712 = vmatmul.bf16.gmra.mxu1 %v7042_v5  ;;  %2013 = vmatpush.bf16.msrb.mxu0 %v6130_v2  ;;  %v6129_v5 = vld [vmem:[%s9664_s6 + $0x20] sm:$0xff] }
 0x177   : > { %2014 = vmatpush.bf16.msrb.mxu0 %v6129_v5  ;;  %v7474_v18 = vpop.f32.mrf.mxu0 }
 0x178   : > { %1741 = vmatmul.bf16.vlgmr.msrb.gmra.mxu2 %v7184_v31  ;;  %v6139_v31 = vld [vmem:[%s9664_s6 + $0x70] sm:$0xff] }
 0x179   : > { %2061 = vmatpush.bf16.msrb.mxu1 %v6139_v31 }
 0x17b   : > { %1790 = vmatmul.bf16.vlgmr.msrb.gmra.mxu3 %v7186_v32  ;;  %v1546_v10 = vpop.f32.mrf.mxu2  ;;  %v6128_v32 = vld [vmem:[%s9664_s6 + $0x18] sm:$0xff] }
 0x17c   : > { %2015 = vmatpush.bf16.msrb.mxu0 %v6128_v32 }
 0x17e   : > { %v1595_v11 = vpop.f32.mrf.mxu3 }
 0x17f   : > { %v7491_v23 = vpop.f32.mrf.mxu0 }
 0x180   : > { %2016 = vmatpush.bf16.msrb.mxu0 %v6127_v20 }
 0x182   : > { %1668 = vmatmul.bf16.gmra.mxu0 %v7072_v41  ;;  %v7486_v41 = vpop.f32.mrf.mxu1 }
 0x183   : > { %1717 = vmatmul.bf16.gmra.mxu1 %v7076_v42  ;;  %v1548_v19 = vpop.f32.mrf.mxu2 }
 0x184   : > { %2017 = vmatpush.bf16.msrb.mxu0 %v6126_v21 }
 0x186   : > { %v1597_v54 = vpop.f32.mrf.mxu3 }
 0x187   : > { %v7503_v38 = vpop.f32.mrf.mxu0 }
 0x188   : > { %1746 = vmatmul.bf16.gmra.mxu2 %v7250_v22  ;;  %v6138_v22 = vld [vmem:[%s9664_s6 + $0x68] sm:$0xff]  ;;  %2018 = vmatpush.bf16.msrb.mxu0 %v6125_v35 }
 0x189   : > { %2062 = vmatpush.bf16.msrb.mxu1 %v6138_v22 }
 0x18a   : > { %v7501_v3 = vpop.f32.mrf.mxu1 }
 0x18b   : > { %1795 = vmatmul.bf16.gmra.mxu3 %v7258_v27  ;;  %v1551_v42 = vpop.f32.mrf.mxu2 }
 0x18e   : > { %v1600_v62 = vpop.f32.mrf.mxu3 }
 0x18f   : > { %v7521_v56 = vpop.f32.mrf.mxu0 }
 0x192   : > { %1673 = vmatmul.bf16.gmra.mxu0 %v7100_v14  ;;  %v7513_v14 = vperm.slane %v7508_v40, 0  ;;  %v7519_v24 = vpop.f32.mrf.mxu1 }
 0x193   : > { %1722 = vmatmul.bf16.gmra.mxu1 %v7104_v15  ;;  %v1553_v27 = vpop.f32.mrf.mxu2 }
 0x194   : > { %v1451_v48 = vadd.f32 %v7356_v16, %v7513_v14  ;;  %v1449_v26 = vadd.f32 %v7346_v57, %v7513_v14 }
 0x196   : > { %v1602_v37 = vpop.f32.mrf.mxu3  ;;  %v1498_v16 = vadd.f32 %v7362_v51, %v1449_v26  ;;  %v1456_v51 = vadd.f32 %v7388_v52, %v7513_v14 }
 0x197   : > { %v7535_v57 = vpop.f32.mrf.mxu0 }
 0x198   : > { %1751 = vmatmul.bf16.gmra.mxu2 %v7304_v6  ;;  %v6137_v6 = vld [vmem:[%s9664_s6 + $0x60] sm:$0xff]  ;;  %v1547_v63 = vadd.f32 %v1546_v10, %v1498_v16  ;;  %v1454_v10 = vadd.f32 %v7376_v28, %v7513_v14 }
 0x199   : > { %2063 = vmatpush.bf16.msrb.mxu1 %v6137_v6 }
 0x19a   : > { %v7532_v5 = vpop.f32.mrf.mxu1  ;;  %v1503_v52 = vadd.f32 %v7406_v29, %v1454_v10  ;;  %v1461_v29 = vadd.f32 %v7423_v34, %v7513_v14 }
 0x19b   : > { %1800 = vmatmul.bf16.gmra.mxu3 %v7306_v13  ;;  %v1556_v45 = vpop.f32.mrf.mxu2  ;;  %v1500_v13 = vadd.f32 %v7384_v36, %v1451_v48  ;;  %v1596_v36 = vadd.f32 %v1595_v11, %v1547_v63 }
 0x19c   : > { %v1552_v22 = vadd.f32 %v1551_v42, %v1503_v52  ;;  %v1459_v42 = vadd.f32 %v7408_v4, %v7513_v14 }
 0x19d   : > { %v1549_v46 = vadd.f32 %v1548_v19, %v1500_v13  ;;  %v1831_v32 = vmax.f32 %v1596_v36, 0.0 }
 0x19e   : > { %v7515_v15 = vpop.f32.mrf.mxu3  ;;  %v1601_v48 = vadd.f32 %v1600_v62, %v1552_v22  ;;  %v1510_v62 = vadd.f32 %v7445_v0, %v1461_v29 }
 0x19f   : > { %v1598_v2 = vadd.f32 %v1597_v54, %v1549_v46  ;;  %v7552_v54 = vpop.f32.mrf.mxu0  ;;  %v1508_v46 = vadd.f32 %v7428_v39, %v1459_v42  ;;  %v1466_v39 = vadd.f32 %v7447_v49, %v7513_v14 }
 0x1a1   : > { %v1833_v31 = vmax.f32 %v1598_v2, 0.0  ;;  %v1557_v36 = vadd.f32 %v1556_v45, %v1508_v46  ;;  %v1464_v45 = vadd.f32 %v7432_v47, %v7513_v14 }
 0x1a2   : > { %1678 = vmatmul.bf16.gmra.mxu0 %v7144_v59  ;;  %v7550_v11 = vpop.f32.mrf.mxu1 }
 0x1a3   : > { %1727 = vmatmul.bf16.gmra.mxu1 %v7146_v60  ;;  %v1558_v1 = vpop.f32.mrf.mxu2  ;;  %v1863_v19 = vpack.c.bf16 %v1833_v31, %v1831_v32  ;;  %v1513_v49 = vadd.f32 %v7454_v30, %v1464_v45  ;;  %v1471_v30 = vadd.f32 %v7474_v18, %v7513_v14 }
 0x1a4   : > { %v1559_v63 = vadd.f32 %v1558_v1, %v1510_v62 }
 0x1a6   : > { %v1607_v8 = vpop.f32.mrf.mxu3 }
 0x1a7   : > { %v7563_v16 = vpop.f32.mrf.mxu0  ;;  %v1608_v4 = vadd.f32 %v1607_v8, %v1559_v63 }
 0x1a8   : > { %1756 = vmatmul.bf16.gmra.mxu2 %v7328_v43  ;;  %v6136_v43 = vld [vmem:[%s9664_s6 + $0x58] sm:$0xff] }
 0x1a9   : > { %2064 = vmatpush.bf16.msrb.mxu1 %v6136_v43  ;;  %v1841_v32 = vmax.f32 %v1608_v4, 0.0 }
 0x1aa   : > { %v7559_v6 = vpop.f32.mrf.mxu1 }
 0x1ab   : > { %1805 = vmatmul.bf16.gmra.mxu3 %v7330_v44  ;;  %v7538_v59 = vpop.f32.mrf.mxu2  ;;  %v1505_v44 = vadd.f32 %v7420_v33, %v1456_v51  ;;  %v1606_v51 = vadd.f32 %v7515_v15, %v1557_v36  ;;  %v1515_v15 = vadd.f32 %v7469_v12, %v1466_v39 }
 0x1ac   : > { %v1562_v47 = vadd.f32 %v7538_v59, %v1513_v49  ;;  %v1469_v59 = vadd.f32 %v7459_v9, %v7513_v14 }
 0x1ad   : > { %v1554_v21 = vadd.f32 %v1553_v27, %v1505_v44  ;;  %v1835_v27 = vmax.f32 %v1601_v48, 0.0  ;;  %v1839_v1 = vmax.f32 %v1606_v51, 0.0 }
 0x1ae   : > { %v7540_v60 = vpop.f32.mrf.mxu3 }
 0x1af   : > { %v1603_v28 = vadd.f32 %v1602_v37, %v1554_v21  ;;  %v7576_v31 = vpop.f32.mrf.mxu0  ;;  %v1867_v8 = vpack.c.bf16 %v1841_v32, %v1839_v1  ;;  %v1611_v22 = vadd.f32 %v7540_v60, %v1562_v47  ;;  %v1520_v60 = vadd.f32 %v7501_v3, %v1471_v30 }
 0x1b0   : > { %v7636_v1 = vperm.slane %v7508_v40, 1  ;;  %v1481_v40 = vadd.f32 %v7535_v57, %v7513_v14 }
 0x1b1   : > { %v1837_v33 = vmax.f32 %v1603_v28, 0.0 }
 0x1b2   : > { %2019 = vmatmul.bf16.vlgmr.msrb.gmra.mxu0 %v1863_v19  ;;  %v7574_v34 = vpop.f32.mrf.mxu1 }
 0x1b3   : > { %v1563_v20 = vpop.f32.mrf.mxu2 }
 0x1b4   : > { %v1564_v44 = vadd.f32 %v1563_v20, %v1515_v15  ;;  %v1843_v20 = vmax.f32 %v1611_v22, 0.0 }
 0x1b6   : > { %v1612_v35 = vpop.f32.mrf.mxu3 }
 0x1b7   : > { %v1613_v21 = vadd.f32 %v1612_v35, %v1564_v44 }
 0x1b8   : > { %1761 = vmatmul.bf16.gmra.mxu2 %v7354_v53  ;;  %v1865_v53 = vpack.c.bf16 %v1837_v33, %v1835_v27  ;;  %v1518_v27 = vadd.f32 %v7486_v41, %v1469_v59  ;;  %v1476_v41 = vadd.f32 %v7503_v38, %v7513_v14 }
 0x1b9   : > { %v1845_v33 = vmax.f32 %v1613_v21, 0.0  ;;  %v1530_v21 = vadd.f32 %v7559_v6, %v1481_v40 }
 0x1ba   : > { %v7587_v19 = vpop.f32.mrf.mxu1 }
 0x1bb   : > { %1810 = vmatmul.bf16.gmra.mxu3 %v7358_v17  ;;  %v7557_v26 = vpop.f32.mrf.mxu2  ;;  %v6135_v17 = vld [vmem:[%s9664_s6 + $0x50] sm:$0xff] }
 0x1bc   : > { %2065 = vmatpush.bf16.msrb.mxu1 %v6135_v17  ;;  %v1567_v62 = vadd.f32 %v7557_v26, %v1518_v27  ;;  %v1474_v26 = vadd.f32 %v7491_v23, %v7513_v14  ;;  %v1645_v23 = vadd.f32 %v7576_v31, %v7636_v1  ;;  %v1479_v31 = vadd.f32 %v7521_v56, %v7513_v14 }
 0x1be   : > { %v7561_v13 = vpop.f32.mrf.mxu3  ;;  %v1528_v57 = vadd.f32 %v7550_v11, %v1479_v31  ;;  %v6147_v11 = vld [vmem:[%s9666_s8 + $0x30] sm:$0xff] }
 0x1bf   : > { %v1616_v46 = vadd.f32 %v7561_v13, %v1567_v62 }
 0x1c2   : > { %2024 = vmatmul.bf16.gmra.mxu0 %v1865_v53  ;;  %v1693_v28 = vpop.f32.mrf.mxu1 }
 0x1c3   : > { %v1568_v37 = vpop.f32.mrf.mxu2 }
 0x1c4   : > { %v1569_v53 = vadd.f32 %v1568_v37, %v1520_v60  ;;  %v1847_v37 = vmax.f32 %v1616_v46, 0.0 }
 0x1c6   : > { %v1617_v2 = vpop.f32.mrf.mxu3 }
 0x1c7   : > { %v1618_v9 = vadd.f32 %v1617_v2, %v1569_v53  ;;  %v1523_v2 = vadd.f32 %v7519_v24, %v1474_v26  ;;  %v6148_v24 = vld [vmem:[%s9666_s8 + $0x38] sm:$0xff] }
 0x1c8   : > { %1766 = vmatmul.bf16.gmra.mxu2 %v7386_v50  ;;  %v6134_v50 = vld [vmem:[%s9664_s6 + $0x48] sm:$0xff] }
 0x1c9   : > { %2066 = vmatpush.bf16.msrb.mxu1 %v6134_v50  ;;  %v1849_v63 = vmax.f32 %v1618_v9, 0.0  ;;  %2201 = vmatpush.bf16.msra.mxu2 %v6148_v24 }
 0x1ca   : > { %v1695_v42 = vpop.f32.mrf.mxu1 }
 0x1cb   : > { %1815 = vmatmul.bf16.gmra.mxu3 %v7390_v55  ;;  %v1571_v0 = vpop.f32.mrf.mxu2  ;;  %v7592_v55 = vpop.f32.mrf.mxu0 }
 0x1cc   : > { %v1572_v38 = vadd.f32 %v1571_v0, %v1523_v2  ;;  %v1694_v0 = vadd.f32 %v1693_v28, %v1645_v23  ;;  %v1647_v44 = vadd.f32 %v7592_v55, %v7636_v1 }
 0x1cd   : > { %2202 = vmatpush.bf16.msra.mxu2 %v6147_v11 }
 0x1ce   : > { %v7581_v10 = vpop.f32.mrf.mxu3  ;;  %v1696_v22 = vadd.f32 %v1695_v42, %v1647_v44 }
 0x1d2   : > { %2029 = vmatmul.bf16.gmra.mxu0 %v1867_v8  ;;  %v1698_v4 = vpop.f32.mrf.mxu1 }
 0x1d3   : > { %v1573_v43 = vpop.f32.mrf.mxu2  ;;  %v7600_v48 = vpop.f32.mrf.mxu0 }
 0x1d4   : > { %v1650_v6 = vadd.f32 %v7600_v48, %v7636_v1 }
 0x1d6   : > { %v1622_v52 = vpop.f32.mrf.mxu3 }
 0x1d8   : > { %1771 = vmatmul.bf16.gmra.mxu2 %v7416_v7  ;;  %v1869_v7 = vpack.c.bf16 %v1845_v33, %v1843_v20 }
 0x1da   : > { %v1700_v45 = vpop.f32.mrf.mxu1 }
 0x1db   : > { %1820 = vmatmul.bf16.gmra.mxu3 %v7418_v25  ;;  %v7602_v12 = vpop.f32.mrf.mxu2  ;;  %v6133_v25 = vld [vmem:[%s9664_s6 + $0x40] sm:$0xff]  ;;  %v7615_v18 = vpop.f32.mrf.mxu0 }
 0x1dc   : > { %2067 = vmatpush.bf16.msrb.mxu1 %v6133_v25  ;;  %v1577_v25 = vadd.f32 %v7602_v12, %v1528_v57  ;;  %v1652_v48 = vadd.f32 %v7615_v18, %v7636_v1 }
 0x1de   : > { %v7604_v29 = vpop.f32.mrf.mxu3  ;;  %v1701_v2 = vadd.f32 %v1700_v45, %v1652_v48  ;;  %v6144_v48 = vld [vmem:[%s9666_s8 + $0x18] sm:$0xff] }
 0x1df   : > { %v1626_v42 = vadd.f32 %v7604_v29, %v1577_v25 }
 0x1e1   : > { %v1855_v29 = vmax.f32 %v1626_v42, 0.0 }
 0x1e2   : > { %2034 = vmatmul.bf16.gmra.mxu0 %v1869_v7  ;;  %v1703_v33 = vpop.f32.mrf.mxu1 }
 0x1e3   : > { %v1578_v35 = vpop.f32.mrf.mxu2  ;;  %v7627_v51 = vpop.f32.mrf.mxu0 }
 0x1e4   : > { %v1579_v28 = vadd.f32 %v1578_v35, %v1530_v21 }
 0x1e6   : > { %v1627_v17 = vpop.f32.mrf.mxu3 }
 0x1e7   : > { %v1628_v56 = vadd.f32 %v1627_v17, %v1579_v28  ;;  %v1486_v17 = vadd.f32 %v7563_v16, %v7513_v14 }
 0x1e8   : > { %1776 = vmatmul.bf16.gmra.mxu2 %v7436_v58  ;;  %v1871_v58 = vpack.c.bf16 %v1849_v63, %v1847_v37  ;;  %v1484_v37 = vadd.f32 %v7552_v54, %v7513_v14 }
 0x1e9   : > { %v1857_v46 = vmax.f32 %v1628_v56, 0.0 }
 0x1ea   : > { %v1705_v9 = vpop.f32.mrf.mxu1 }
 0x1eb   : > { %1825 = vmatmul.bf16.gmra.mxu3 %v7438_v61  ;;  %v7621_v3 = vpop.f32.mrf.mxu2  ;;  %v1525_v61 = vadd.f32 %v7532_v5, %v1476_v41  ;;  %v7638_v50 = vpop.f32.mrf.mxu0  ;;  %v1621_v5 = vadd.f32 %v7581_v10, %v1572_v38  ;;  %v1699_v41 = vadd.f32 %v1698_v4, %v1650_v6  ;;  %v1533_v38 = vadd.f32 %v7574_v34, %v1484_v37 }
 0x1ec   : > { %v1655_v34 = vadd.f32 %v7627_v51, %v7636_v1 }
 0x1ed   : > { %v1574_v32 = vadd.f32 %v1573_v43, %v1525_v61  ;;  %v1535_v61 = vadd.f32 %v7587_v19, %v1486_v17  ;;  %v1582_v18 = vadd.f32 %v7621_v3, %v1533_v38  ;;  %v6146_v19 = vld [vmem:[%s9666_s8 + $0x28] sm:$0xff] }
 0x1ee   : > { %v7623_v36 = vpop.f32.mrf.mxu3  ;;  %2203 = vmatpush.bf16.msra.mxu2 %v6146_v19 }
 0x1ef   : > { %v1623_v8 = vadd.f32 %v1622_v52, %v1574_v32  ;;  %v1851_v52 = vmax.f32 %v1621_v5, 0.0 }
 0x1f1   : > { %v1853_v43 = vmax.f32 %v1623_v8, 0.0 }
 0x1f2   : > { %2039 = vmatmul.bf16.gmra.mxu0 %v1871_v58  ;;  %v1875_v58 = vpack.c.bf16 %v1857_v46, %v1855_v29  ;;  %v1708_v5 = vpop.f32.mrf.mxu1 }
 0x1f3   : > { %v1583_v13 = vpop.f32.mrf.mxu2  ;;  %v1873_v47 = vpack.c.bf16 %v1853_v43, %v1851_v52  ;;  %v7653_v30 = vpop.f32.mrf.mxu0 }
 0x1f4   : > { %v1584_v8 = vadd.f32 %v1583_v13, %v1535_v61  ;;  %v1631_v13 = vadd.f32 %v7623_v36, %v1582_v18 }
 0x1f6   : > { %v7633_v39 = vpop.f32.mrf.mxu3  ;;  %v1859_v44 = vmax.f32 %v1631_v13, 0.0 }
 0x1f7   : > { %v1633_v14 = vadd.f32 %v7633_v39, %v1584_v8  ;;  %v1657_v39 = vadd.f32 %v7638_v50, %v7636_v1  ;;  %v1660_v50 = vadd.f32 %v7653_v30, %v7636_v1 }
 0x1f9   : > { %v1861_v40 = vmax.f32 %v1633_v14, 0.0  ;;  %v1706_v21 = vadd.f32 %v1705_v9, %v1657_v39 }
 0x1fa   : > { %v1710_v52 = vpop.f32.mrf.mxu1 }
 0x1fb   : > { %v1742_v15 = vpop.f32.mrf.mxu2  ;;  %v1661_v12 = vpop.f32.mrf.mxu0 }
 0x1fc   : > { %v1743_v10 = vadd.f32 %v1742_v15, %v1694_v0  ;;  %v1704_v0 = vadd.f32 %v1703_v33, %v1655_v34  ;;  %v6145_v33 = vld [vmem:[%s9666_s8 + $0x20] sm:$0xff] }
 0x1fd   : > { %2204 = vmatpush.bf16.msra.mxu2 %v6145_v33 }
 0x1fe   : > { %v1791_v49 = vpop.f32.mrf.mxu3 }
 0x1ff   : > { %v1792_v59 = vadd.f32 %v1791_v49, %v1743_v10  ;;  %v1877_v10 = vpack.c.bf16 %v1861_v40, %v1859_v44 }
 0x201   : > { %v1832_v27 = vmax.f32 %v1792_v59, 0.0  ;;  %2205 = vmatpush.bf16.msra.mxu2 %v6144_v48 }
 0x202   : > { %2044 = vmatmul.bf16.gmra.mxu0 %v1873_v47 }
 0x203   : > { %v1744_v20 = vpop.f32.mrf.mxu2  ;;  %v1664_v15 = vpop.f32.mrf.mxu0 }
 0x204   : > { %v1745_v7 = vadd.f32 %v1744_v20, %v1696_v22  ;;  %v1665_v29 = vadd.f32 %v1664_v15, %v7636_v1 }
 0x206   : > { %v1793_v55 = vpop.f32.mrf.mxu3 }
 0x207   : > { %v1794_v60 = vadd.f32 %v1793_v55, %v1745_v7  ;;  %v1713_v7 = vpop.f32.mrf.mxu1 }
 0x209   : > { %v1834_v53 = vmax.f32 %v1794_v60, 0.0 }
 0x20b   : > { %v1864_v62 = vpack.c.bf16 %v1834_v53, %v1832_v27  ;;  %v1747_v35 = vpop.f32.mrf.mxu2  ;;  %v1666_v47 = vpop.f32.mrf.mxu0  ;;  %v1709_v27 = vadd.f32 %v1708_v5, %v1660_v50  ;;  %v1662_v53 = vadd.f32 %v1661_v12, %v7636_v1 }
 0x20c   : > { %v1748_v26 = vadd.f32 %v1747_v35, %v1699_v41  ;;  %v1667_v61 = vadd.f32 %v1666_v47, %v7636_v1 }
 0x20d   : > { %2068 = vmatmul.bf16.vlgmr.msrb.gmra.mxu1 %v1864_v62  ;;  %v1711_v42 = vadd.f32 %v1710_v52, %v1662_v53 }
 0x20e   : > { %v1796_v63 = vpop.f32.mrf.mxu3 }
 0x20f   : > { %v1797_v23 = vadd.f32 %v1796_v63, %v1748_v26  ;;  %v1715_v11 = vpop.f32.mrf.mxu1 }
 0x210   : > { %v1716_v8 = vadd.f32 %v1715_v11, %v1667_v61 }
 0x211   : > { %v1836_v54 = vmax.f32 %v1797_v23, 0.0 }
 0x212   : > { %2049 = vmatmul.bf16.gmra.mxu0 %v1875_v58  ;;  %v1714_v58 = vadd.f32 %v1713_v7, %v1665_v29 }
 0x213   : > { %v1749_v32 = vpop.f32.mrf.mxu2  ;;  %v1669_v25 = vpop.f32.mrf.mxu0 }
 0x214   : > { %v1750_v16 = vadd.f32 %v1749_v32, %v1701_v2  ;;  %v1670_v19 = vadd.f32 %v1669_v25, %v7636_v1 }
 0x216   : > { %v1798_v4 = vpop.f32.mrf.mxu3 }
 0x217   : > { %v1799_v24 = vadd.f32 %v1798_v4, %v1750_v16  ;;  %v1718_v2 = vpop.f32.mrf.mxu1 }
 0x219   : > { %v1838_v43 = vmax.f32 %v1799_v24, 0.0 }
 0x21b   : > { %v1866_v45 = vpack.c.bf16 %v1838_v43, %v1836_v54  ;;  %v1752_v49 = vpop.f32.mrf.mxu2  ;;  %v1671_v63 = vpop.f32.mrf.mxu0  ;;  %v6143_v54 = vld [vmem:[%s9666_s8 + $0x10] sm:$0xff] }
 0x21c   : > { %v1753_v31 = vadd.f32 %v1752_v49, %v1704_v0  ;;  %2206 = vmatpush.bf16.msra.mxu2 %v6143_v54  ;;  %v1719_v49 = vadd.f32 %v1718_v2, %v1670_v19  ;;  %v1672_v40 = vadd.f32 %v1671_v63, %v7636_v1 }
 0x21d   : > { %2073 = vmatmul.bf16.gmra.mxu1 %v1866_v45 }
 0x21e   : > { %v1801_v3 = vpop.f32.mrf.mxu3 }
 0x21f   : > { %v1802_v22 = vadd.f32 %v1801_v3, %v1753_v31  ;;  %v1720_v24 = vpop.f32.mrf.mxu1 }
 0x220   : > { %v1721_v0 = vadd.f32 %v1720_v24, %v1672_v40 }
 0x221   : > { %v1840_v28 = vmax.f32 %v1802_v22, 0.0 }
 0x222   : > { %2054 = vmatmul.bf16.gmra.mxu0 %v1877_v10 }
 0x223   : > { %v1754_v51 = vpop.f32.mrf.mxu2  ;;  %v1674_v32 = vpop.f32.mrf.mxu0 }
 0x224   : > { %v1755_v36 = vadd.f32 %v1754_v51, %v1706_v21 }
 0x226   : > { %v1803_v20 = vpop.f32.mrf.mxu3 }
 0x227   : > { %v1804_v57 = vadd.f32 %v1803_v20, %v1755_v36  ;;  %v1723_v39 = vpop.f32.mrf.mxu1  ;;  %v6142_v36 = vld [vmem:[%s9666_s8 + $0x8] sm:$0xff]  ;;  %v1675_v20 = vadd.f32 %v1674_v32, %v7636_v1 }
 0x228   : > { %2207 = vmatpush.bf16.msra.mxu2 %v6142_v36  ;;  %v2301_v36 = vld [vmem:[%s7720_s26 + $0x18] sm:$0xff] }
 0x229   : > { %v1842_v59 = vmax.f32 %v1804_v57, 0.0  ;;  %v1724_v7 = vadd.f32 %v1723_v39, %v1675_v20  ;;  %v2298_v20 = vld [vmem:[%s7720_s26] sm:$0xff]  ;;  %2336 = vrot.lane.b32.xlu0 %v2301_v36, %s6538_s28 }
 0x22a   : > { %2330 = vrot.lane.b32.xlu2 %v2298_v20, %s6538_s28 }
 0x22b   : > { %v1868_v55 = vpack.c.bf16 %v1842_v59, %v1840_v28  ;;  %v1757_v60 = vpop.f32.mrf.mxu2  ;;  %v1676_v43 = vpop.f32.mrf.mxu0 }
 0x22c   : > { %v1758_v6 = vadd.f32 %v1757_v60, %v1709_v27 }
 0x22d   : > { %2078 = vmatmul.bf16.gmra.mxu1 %v1868_v55  ;;  %v1677_v55 = vadd.f32 %v1676_v43, %v7636_v1 }
 0x22e   : > { %v1806_v56 = vpop.f32.mrf.mxu3 }
 0x22f   : > { %v1807_v35 = vadd.f32 %v1806_v56, %v1758_v6  ;;  %v1725_v33 = vpop.f32.mrf.mxu1 }
 0x230   : > { %v1726_v60 = vadd.f32 %v1725_v33, %v1677_v55 }
 0x231   : > { %v1844_v30 = vmax.f32 %v1807_v35, 0.0 }
 0x233   : > { %v1759_v62 = vpop.f32.mrf.mxu2  ;;  %v1679_v44 = vpop.f32.mrf.mxu0 }
 0x234   : > { %v1760_v9 = vadd.f32 %v1759_v62, %v1711_v42  ;;  %v1680_v63 = vadd.f32 %v1679_v44, %v7636_v1 }
 0x236   : > { %v1808_v46 = vpop.f32.mrf.mxu3 }
 0x237   : > { %v1809_v17 = vadd.f32 %v1808_v46, %v1760_v9  ;;  %v1728_v62 = vpop.f32.mrf.mxu1  ;;  %v6141_v46 = vld [vmem:[%s9666_s8] sm:$0xff] }
 0x238   : > { %2208 = vmatpush.bf16.msra.mxu2 %v6141_v46  ;;  %v1729_v48 = vadd.f32 %v1728_v62, %v1680_v63  ;;  %v2305_v62 = vld [vmem:[%s7720_s26 + $0x38] sm:$0xff] }
 0x239   : > { %v1846_v41 = vmax.f32 %v1809_v17, 0.0 }
 0x23b   : > { %v1870_v37 = vpack.c.bf16 %v1846_v41, %v1844_v30  ;;  %v1762_v12 = vpop.f32.mrf.mxu2  ;;  %v1681_v50 = vpop.f32.mrf.mxu0 }
 0x23c   : > { %v1763_v38 = vadd.f32 %v1762_v12, %v1714_v58  ;;  %v1682_v29 = vadd.f32 %v1681_v50, %v7636_v1  ;;  %v7710_v1 = vld [vmem:[%s9665_s7] ss:$0 sm:$0xff] }
 0x23d   : > { %2083 = vmatmul.bf16.gmra.mxu1 %v1870_v37 }
 0x23e   : > { %v1811_v26 = vpop.f32.mrf.mxu3 }
 0x23f   : > { %v1812_v16 = vadd.f32 %v1811_v26, %v1763_v38  ;;  %v1730_v12 = vpop.f32.mrf.mxu1 }
 0x240   : > { %v1731_v58 = vadd.f32 %v1730_v12, %v1682_v29  ;;  %v2307_v29 = vld [vmem:[%s7720_s26 + $0x48] sm:$0xff] }
 0x241   : > { %v1848_v14 = vmax.f32 %v1812_v16, 0.0 }
 0x243   : > { %v1764_v23 = vpop.f32.mrf.mxu2  ;;  %v2020_v11 = vpop.f32.mrf.mxu0 }
 0x244   : > { %v1765_v4 = vadd.f32 %v1764_v23, %v1716_v8 }
 0x246   : > { %v1813_v5 = vpop.f32.mrf.mxu3 }
 0x247   : > { %v1814_v18 = vadd.f32 %v1813_v5, %v1765_v4 }
 0x249   : > { %v1850_v15 = vmax.f32 %v1814_v18, 0.0 }
 0x24b   : > { %v1872_v34 = vpack.c.bf16 %v1850_v15, %v1848_v14  ;;  %v1767_v13 = vpop.f32.mrf.mxu2  ;;  %v2022_v26 = vpop.f32.mrf.mxu0  ;;  %v2021_v14 = vadd.f32 %v7710_v1, %v2020_v11  ;;  %v2300_v11 = vld [vmem:[%s7720_s26 + $0x10] sm:$0xff] }
 0x24c   : > { %v1768_v3 = vadd.f32 %v1767_v13, %v1719_v49  ;;  %v2023_v54 = vadd.f32 %v7710_v1, %v2022_v26 }
 0x24d   : > { %2088 = vmatmul.bf16.gmra.mxu1 %v1872_v34 }
 0x24e   : > { %v1816_v45 = vpop.f32.mrf.mxu3 }
 0x24f   : > { %v1817_v31 = vadd.f32 %v1816_v45, %v1768_v3 }
 0x251   : > { %v1852_v51 = vmax.f32 %v1817_v31, 0.0 }
 0x253   : > { %v1769_v52 = vpop.f32.mrf.mxu2  ;;  %v2025_v5 = vpop.f32.mrf.mxu0 }
 0x254   : > { %v1770_v10 = vadd.f32 %v1769_v52, %v1721_v0  ;;  %v2026_v0 = vadd.f32 %v7710_v1, %v2025_v5  ;;  %v2310_v5 = vld [vmem:[%s7720_s26 + $0x60] sm:$0xff] }
 0x256   : > { %v1818_v47 = vpop.f32.mrf.mxu3 }
 0x257   : > { %v1819_v21 = vadd.f32 %v1818_v47, %v1770_v10 }
 0x259   : > { %v1854_v22 = vmax.f32 %v1819_v21, 0.0 }
 0x25b   : > { %v1874_v57 = vpack.c.bf16 %v1854_v22, %v1852_v51  ;;  %v1772_v28 = vpop.f32.mrf.mxu2  ;;  %v2027_v18 = vpop.f32.mrf.mxu0 }
 0x25c   : > { %v1773_v25 = vadd.f32 %v1772_v28, %v1724_v7  ;;  %v2028_v39 = vadd.f32 %v7710_v1, %v2027_v18 }
 0x25d   : > { %2093 = vmatmul.bf16.gmra.mxu1 %v1874_v57 }
 0x25e   : > { %v1821_v59 = vpop.f32.mrf.mxu3 }
 0x25f   : > { %v1822_v27 = vadd.f32 %v1821_v59, %v1773_v25 }
 0x261   : > { %v1856_v35 = vmax.f32 %v1822_v27, 0.0  ;;  %v2299_v27 = vld [vmem:[%s7720_s26 + $0x8] sm:$0xff] }
 0x262   : > { %2332 = vrot.lane.b32.xlu2 %v2299_v27, %s6538_s28 }
 0x263   : > { %v1774_v56 = vpop.f32.mrf.mxu2  ;;  %v2030_v15 = vpop.f32.mrf.mxu0 }
 0x264   : > { %v1775_v53 = vadd.f32 %v1774_v56, %v1726_v60  ;;  %v2031_v28 = vadd.f32 %v7710_v1, %v2030_v15  ;;  %v2303_v60 = vld [vmem:[%s7720_s26 + $0x28] sm:$0xff]  ;;  %v2302_v56 = vld [vmem:[%s7720_s26 + $0x20] sm:$0xff] }
 0x265   : > { %2340 = vrot.lane.b32.xlu0 %v2303_v60, %s6538_s28  ;;  %2338 = vrot.lane.b32.xlu1 %v2302_v56, %s6538_s28 }
 0x266   : > { %v1823_v6 = vpop.f32.mrf.mxu3 }
 0x267   : > { %v1824_v42 = vadd.f32 %v1823_v6, %v1775_v53 }
 0x269   : > { %v1858_v9 = vmax.f32 %v1824_v42, 0.0 }
 0x26a   : > { %2334 = vrot.lane.b32.xlu2 %v2300_v11, %s6538_s28 }
 0x26b   : > { %v1876_v17 = vpack.c.bf16 %v1858_v9, %v1856_v35  ;;  %v1777_v30 = vpop.f32.mrf.mxu2  ;;  %v2032_v40 = vpop.f32.mrf.mxu0 }
 0x26c   : > { %v1778_v37 = vadd.f32 %v1777_v30, %v1729_v48  ;;  %v2033_v59 = vadd.f32 %v7710_v1, %v2032_v40  ;;  %v2312_v40 = vld [vmem:[%s7720_s26 + $0x70] sm:$0xff] }
 0x26d   : > { %2098 = vmatmul.bf16.gmra.mxu1 %v1876_v17  ;;  %2344 = vrot.lane.b32.xlu0 %v2305_v62, %s6538_s28 }
 0x26e   : > { %v1826_v41 = vpop.f32.mrf.mxu3 }
 0x26f   : > { %v1827_v2 = vadd.f32 %v1826_v41, %v1778_v37  ;;  %v2304_v37 = vld [vmem:[%s7720_s26 + $0x30] sm:$0xff] }
 0x270   : > { %2342 = vrot.lane.b32.xlu1 %v2304_v37, %s6538_s28 }
 0x271   : > { %v1860_v23 = vmax.f32 %v1827_v2, 0.0 }
 0x273   : > { %v1779_v61 = vpop.f32.mrf.mxu2  ;;  %v2035_v10 = vpop.f32.mrf.mxu0 }
 0x274   : > { %v1780_v32 = vadd.f32 %v1779_v61, %v1731_v58  ;;  %v2036_v35 = vadd.f32 %v7710_v1, %v2035_v10  ;;  %v2309_v61 = vld [vmem:[%s7720_s26 + $0x58] sm:$0xff] }
 0x275   : > { %2348 = vrot.lane.b32.xlu0 %v2307_v29, %s6538_s28 }
 0x276   : > { %v1828_v38 = vpop.f32.mrf.mxu3 }
 0x277   : > { %v1829_v8 = vadd.f32 %v1828_v38, %v1780_v32 }
 0x278   : > { %2358 = vrot.lane.b32.xlu1 %v2312_v40, %s6538_s28 }
 0x279   : > { %v1862_v16 = vmax.f32 %v1829_v8, 0.0 }
 0x27b   : > { %v1878_v4 = vpack.c.bf16 %v1862_v16, %v1860_v23  ;;  %v2037_v57 = vpop.f32.mrf.mxu0 }
 0x27c   : > { %v2038_v9 = vadd.f32 %v7710_v1, %v2037_v57 }
 0x27d   : > { %2103 = vmatmul.bf16.gmra.mxu1 %v1878_v4  ;;  %2352 = vrot.lane.b32.xlu0 %v2309_v61, %s6538_s28 }
 0x283   : > { %v2040_v6 = vpop.f32.mrf.mxu0 }
 0x284   : > { %v2041_v2 = vadd.f32 %v7710_v1, %v2040_v6 }
 0x285   : > { %2354 = vrot.lane.b32.xlu0 %v2310_v5, %s6538_s28 }
 0x28a   : > { %v2069_v24 = vpop.f32.mrf.mxu1 }
 0x28b   : > { %v2070_v43 = vadd.f32 %v2069_v24, %v2021_v14  ;;  %v2042_v63 = vpop.f32.mrf.mxu0 }
 0x28c   : > { %v2043_v32 = vadd.f32 %v7710_v1, %v2042_v63 }
 0x28d   : > { %v2109_v13 = vmax.f32 %v2070_v43, 0.0 }
 0x292   : > { %v2071_v19 = vpop.f32.mrf.mxu1 }
 0x293   : > { %v2072_v34 = vadd.f32 %v2071_v19, %v2023_v54  ;;  %v2045_v58 = vpop.f32.mrf.mxu0 }
 0x294   : > { %v2046_v15 = vadd.f32 %v7710_v1, %v2045_v58 }
 0x295   : > { %v2110_v45 = vmax.f32 %v2072_v34, 0.0 }
 0x297   : > { %v2125_v49 = vpack.c.bf16 %v2110_v45, %v2109_v13 }
 0x299   : > { %2209 = vmatmul.bf16.vlgmr.msra.gmra.mxu2 %v2125_v49 }
 0x29a   : > { %v2074_v3 = vpop.f32.mrf.mxu1 }
 0x29b   : > { %v2075_v44 = vadd.f32 %v2074_v3, %v2026_v0  ;;  %v2047_v18 = vpop.f32.mrf.mxu0  ;;  %v2306_v0 = vld [vmem:[%s7720_s26 + $0x40] sm:$0xff] }
 0x29c   : > { %v2048_v43 = vadd.f32 %v7710_v1, %v2047_v18  ;;  %2346 = vrot.lane.b32.xlu2 %v2306_v0, %s6538_s28 }
 0x29d   : > { %v2111_v47 = vmax.f32 %v2075_v44, 0.0 }
 0x2a2   : > { %v2076_v52 = vpop.f32.mrf.mxu1 }
 0x2a3   : > { %v2077_v31 = vadd.f32 %v2076_v52, %v2028_v39  ;;  %v2050_v54 = vpop.f32.mrf.mxu0 }
 0x2a4   : > { %v2051_v52 = vadd.f32 %v7710_v1, %v2050_v54 }
 0x2a5   : > { %v2112_v21 = vmax.f32 %v2077_v31, 0.0  ;;  %v2308_v31 = vld [vmem:[%s7720_s26 + $0x50] sm:$0xff] }
 0x2a6   : > { %2350 = vrot.lane.b32.xlu2 %v2308_v31, %s6538_s28 }
 0x2a7   : > { %v2126_v51 = vpack.c.bf16 %v2112_v21, %v2111_v47 }
 0x2a9   : > { %2214 = vmatmul.bf16.gmra.mxu2 %v2126_v51 }
 0x2aa   : > { %v2079_v22 = vpop.f32.mrf.mxu1 }
 0x2ab   : > { %v2080_v33 = vadd.f32 %v2079_v22, %v2031_v28  ;;  %v2052_v39 = vpop.f32.mrf.mxu0  ;;  %v2311_v28 = vld [vmem:[%s7720_s26 + $0x68] sm:$0xff] }
 0x2ac   : > { %v2053_v10 = vadd.f32 %v7710_v1, %v2052_v39 }
 0x2ad   : > { %v2113_v55 = vmax.f32 %v2080_v33, 0.0 }
 0x2ae   : > { %2356 = vrot.lane.b32.xlu2 %v2311_v28, %s6538_s28 }
 0x2b2   : > { %v2081_v50 = vpop.f32.mrf.mxu1 }
 0x2b3   : > { %v2082_v7 = vadd.f32 %v2081_v50, %v2033_v59  ;;  %v2055_v22 = vpop.f32.mrf.mxu0 }
 0x2b4   : > { %v2056_v50 = vadd.f32 %v7710_v1, %v2055_v22 }
 0x2b5   : > { %v2114_v25 = vmax.f32 %v2082_v7, 0.0  ;;  %v2313_v7 = vld [vmem:[%s7720_s26 + $0x78] sm:$0xff] }
 0x2b6   : > { %2360 = vrot.lane.b32.xlu2 %v2313_v7, %s6538_s28  ;;  %s6542_s28 = smov 110  }
 0x2b7   : > { %v2127_v53 = vpack.c.bf16 %v2114_v25, %v2113_v55 }
 0x2b9   : > { %2219 = vmatmul.bf16.gmra.mxu2 %v2127_v53 }
 0x2ba   : > { %v2084_v42 = vpop.f32.mrf.mxu1 }
 0x2bb   : > { %v2085_v46 = vadd.f32 %v2084_v42, %v2036_v35  ;;  %v2057_v33 = vpop.f32.mrf.mxu0  ;;  %v7769_v42 = vld [vmem:[%s9667_s9] ss:$0 sm:$0xff] }
 0x2bc   : > { %v2058_v55 = vadd.f32 %v7710_v1, %v2057_v33 }
 0x2bd   : > { %v2115_v41 = vmax.f32 %v2085_v46, 0.0  ;;  %v2331_v46 = vpop.permute.xlu2 %2330 }
 0x2c2   : > { %v2086_v17 = vpop.f32.mrf.mxu1 }
 0x2c3   : > { %v2087_v30 = vadd.f32 %v2086_v17, %v2038_v9 }
 0x2c5   : > { %v2116_v48 = vmax.f32 %v2087_v30, 0.0  ;;  %v2333_v58 = vpop.permute.xlu2 %2332 }
 0x2c7   : > { %v2128_v12 = vpack.c.bf16 %v2116_v48, %v2115_v41 }
 0x2c9   : > { %2224 = vmatmul.bf16.gmra.mxu2 %v2128_v12 }
 0x2ca   : > { %v2089_v26 = vpop.f32.mrf.mxu1 }
 0x2cb   : > { %v2090_v38 = vadd.f32 %v2089_v26, %v2041_v2 }
 0x2cd   : > { %v2117_v16 = vmax.f32 %v2090_v38, 0.0  ;;  %v2335_v5 = vpop.permute.xlu2 %2334 }
 0x2d2   : > { %v2091_v8 = vpop.f32.mrf.mxu1 }
 0x2d3   : > { %v2092_v23 = vadd.f32 %v2091_v8, %v2043_v32 }
 0x2d5   : > { %v2118_v4 = vmax.f32 %v2092_v23, 0.0 }
 0x2d7   : > { %v2129_v24 = vpack.c.bf16 %v2118_v4, %v2117_v16 }
 0x2d9   : > { %2229 = vmatmul.bf16.gmra.mxu2 %v2129_v24 }
 0x2da   : > { %v2094_v14 = vpop.f32.mrf.mxu1 }
 0x2db   : > { %v2095_v19 = vadd.f32 %v2094_v14, %v2046_v15 }
 0x2dd   : > { %v2119_v45 = vmax.f32 %v2095_v19, 0.0 }
 0x2e2   : > { %v2096_v34 = vpop.f32.mrf.mxu1 }
 0x2e3   : > { %v2097_v13 = vadd.f32 %v2096_v34, %v2048_v43  ;;  %v2337_v34 = vpop.permute.xlu0 %2336 }
 0x2e5   : > { %v2120_v49 = vmax.f32 %v2097_v13, 0.0 }
 0x2e7   : > { %v2130_v3 = vpack.c.bf16 %v2120_v49, %v2119_v45 }
 0x2e9   : > { %2234 = vmatmul.bf16.gmra.mxu2 %v2130_v3 }
 0x2ea   : > { %v2099_v44 = vpop.f32.mrf.mxu1 }
 0x2eb   : > { %v2100_v47 = vadd.f32 %v2099_v44, %v2051_v52 }
 0x2ed   : > { %v2121_v36 = vmax.f32 %v2100_v47, 0.0  ;;  %v2341_v47 = vpop.permute.xlu0 %2340 }
 0x2f2   : > { %v2101_v21 = vpop.f32.mrf.mxu1 }
 0x2f3   : > { %v2102_v51 = vadd.f32 %v2101_v21, %v2053_v10  ;;  %v2339_v10 = vpop.permute.xlu1 %2338 }
 0x2f5   : > { %v2122_v20 = vmax.f32 %v2102_v51, 0.0 }
 0x2f7   : > { %v2131_v57 = vpack.c.bf16 %v2122_v20, %v2121_v36 }
 0x2f9   : > { %2239 = vmatmul.bf16.gmra.mxu2 %v2131_v57 }
 0x2fa   : > { %v2104_v59 = vpop.f32.mrf.mxu1 }
 0x2fb   : > { %v2105_v25 = vadd.f32 %v2104_v59, %v2056_v50  ;;  %v2343_v28 = vpop.permute.xlu1 %2342 }
 0x2fd   : > { %v2123_v27 = vmax.f32 %v2105_v25, 0.0 }
 0x302   : > { %v2106_v60 = vpop.f32.mrf.mxu1 }
 0x303   : > { %v2107_v56 = vadd.f32 %v2106_v60, %v2058_v55 }
 0x305   : > { %v2124_v53 = vmax.f32 %v2107_v56, 0.0 }
 0x307   : > { %v2132_v6 = vpack.c.bf16 %v2124_v53, %v2123_v27 }
 0x309   : > { %2244 = vmatmul.bf16.gmra.mxu2 %v2132_v6 }
 0x31c   : > { %v2210_v62 = vpop.f32.mrf.mxu2 }
 0x31d   : > { %v7772_v11 = vadd.f32 %v7769_v42, %v2210_v62 }
 0x31f   : > { %v2748_v1 = vsel %vm2747_vm1, %v7772_v11, -inf  ;;  %v2250_v35 = vmul.f32 0.5, %v7772_v11 }
 0x320   : > { %2749 = vmax.xlane.f32.xlu0 %v2748_v1 }
 0x321   : > { %v2266_v9 = vmul.f32 1.442695, %v2250_v35 }
 0x323   : > { %6370 = vpow2.f32 %v2266_v9 }
 0x324   : > { %v2212_v63 = vpop.f32.mrf.mxu2 }
 0x325   : > { %v7778_v17 = vadd.f32 %v7769_v42, %v2212_v63  ;;  %v2345_v63 = vpop.permute.xlu0 %2344 }
 0x327   : > { %v2751_v30 = vsel %vm2747_vm1, %v7778_v17, -inf  ;;  %v2251_v41 = vmul.f32 0.5, %v7778_v17 }
 0x328   : > { %2752 = vmax.xlane.f32.xlu0 %v2751_v30  ;;  %v2347_v30 = vpop.permute.xlu2 %2346 }
 0x329   : > { %v7783_v48 = vpop.eup %6370  ;;  %v2268_v29 = vmul.f32 1.442695, %v2251_v41 }
 0x32a   : > { %v2378_v37 = vmul.f32 %v7783_v48, %v2331_v46 }
 0x32b   : > { %6372 = vpow2.f32 %v2268_v29 }
 0x32c   : > { %v2215_v12 = vpop.f32.mrf.mxu2  ;;  %2410 = vrot.lane.b32.xlu2 %v2378_v37, %s6539_s20 }
 0x32d   : > { %v7788_v26 = vadd.f32 %v7769_v42, %v2215_v12 }
 0x32f   : > { %v2754_v61 = vsel %vm2747_vm1, %v7788_v26, -inf  ;;  %v2252_v2 = vmul.f32 0.5, %v7788_v26 }
 0x330   : > { %2755 = vmax.xlane.f32.xlu1 %v2754_v61 }
 0x331   : > { %v7793_v32 = vpop.eup %6372  ;;  %v2270_v38 = vmul.f32 1.442695, %v2252_v2  ;;  %v2349_v2 = vpop.permute.xlu0 %2348 }
 0x332   : > { %v2379_v8 = vmul.f32 %v7793_v32, %v2333_v58 }
 0x333   : > { %6374 = vpow2.f32 %v2270_v38  ;;  %v2351_v38 = vpop.permute.xlu2 %2350 }
 0x334   : > { %v2217_v23 = vpop.f32.mrf.mxu2  ;;  %2412 = vrot.lane.b32.xlu2 %v2379_v8, %s6539_s20 }
 0x335   : > { %v7798_v16 = vadd.f32 %v7769_v42, %v2217_v23 }
 0x337   : > { %v2757_v4 = vsel %vm2747_vm1, %v7798_v16, -inf  ;;  %v2253_v18 = vmul.f32 0.5, %v7798_v16 }
 0x338   : > { %2758 = vmax.xlane.f32.xlu1 %v2757_v4 }
 0x339   : > { %v7803_v24 = vpop.eup %6374  ;;  %v2272_v14 = vmul.f32 1.442695, %v2253_v18  ;;  %v2353_v18 = vpop.permute.xlu0 %2352 }
 0x33a   : > { %v2380_v15 = vmul.f32 %v7803_v24, %v2335_v5 }
 0x33b   : > { %6376 = vpow2.f32 %v2272_v14 }
 0x33c   : > { %v2220_v54 = vpop.f32.mrf.mxu2  ;;  %2414 = vrot.lane.b32.xlu2 %v2380_v15, %s6539_s20 }
 0x33d   : > { %v7808_v43 = vadd.f32 %v7769_v42, %v2220_v54 }
 0x33f   : > { %v2760_v19 = vsel %vm2747_vm1, %v7808_v43, -inf  ;;  %v2254_v31 = vmul.f32 0.5, %v7808_v43 }
 0x340   : > { %2761 = vmax.xlane.f32.xlu0 %v2760_v19 }
 0x341   : > { %v7812_v13 = vpop.eup %6376  ;;  %v2274_v36 = vmul.f32 1.442695, %v2254_v31 }
 0x342   : > { %v2381_v45 = vmul.f32 %v7812_v13, %v2337_v34 }
 0x344   : > { %v2222_v49 = vpop.f32.mrf.mxu2  ;;  %2416 = vrot.lane.b32.xlu2 %v2381_v45, %s6539_s20 }
 0x345   : > { %v7817_v40 = vadd.f32 %v7769_v42, %v2222_v49 }
 0x347   : > { %v2763_v3 = vsel %vm2747_vm1, %v7817_v40, -inf  ;;  %v2255_v0 = vmul.f32 0.5, %v7817_v40 }
 0x348   : > { %2764 = vmax.xlane.f32.xlu1 %v2763_v3  ;;  %v7882_v3 = vpop.permute.xlu1 %2358 }
 0x349   : > { %v2276_v39 = vmul.f32 1.442695, %v2255_v0 }
 0x34b   : > { %6378 = vpow2.f32 %v2276_v39 }
 0x34c   : > { %v2225_v44 = vpop.f32.mrf.mxu2 }
 0x34d   : > { %v7823_v52 = vadd.f32 %v7769_v42, %v2225_v44 }
 0x34f   : > { %v2256_v21 = vmul.f32 0.5, %v7823_v52  ;;  %v2766_v8 = vsel %vm2747_vm1, %v7823_v52, -inf }
 0x351   : > { %v7827_v51 = vpop.eup %6378  ;;  %v2278_v22 = vmul.f32 1.442695, %v2256_v21  ;;  %v7890_v21 = vpop.permute.xlu0 %2354 }
 0x352   : > { %v2383_v20 = vmul.f32 %v7827_v51, %v2341_v47 }
 0x353   : > { %6380 = vpow2.f32 %v2278_v22 }
 0x354   : > { %v2227_v57 = vpop.f32.mrf.mxu2  ;;  %2420 = vrot.lane.b32.xlu0 %v2383_v20, %s6539_s20  ;;  %6382 = vpow2.f32 %v2274_v36  ;;  %v7895_v36 = vpop.permute.xlu2 %2356 }
 0x355   : > { %v7840_v60 = vadd.f32 %v7769_v42, %v2227_v57 }
 0x357   : > { %v2769_v56 = vsel %vm2747_vm1, %v7840_v60, -inf  ;;  %v2257_v58 = vmul.f32 0.5, %v7840_v60 }
 0x359   : > { %v7831_v59 = vpop.eup %6380  ;;  %v2280_v23 = vmul.f32 1.442695, %v2257_v58 }
 0x35a   : > { %v2384_v33 = vmul.f32 %v7831_v59, %v2343_v28  ;;  %v7834_v50 = vpop.eup %6382 }
 0x35b   : > { %v2382_v55 = vmul.f32 %v7834_v50, %v2339_v10 }
 0x35c   : > { %2422 = vrot.lane.b32.xlu0 %v2384_v33, %s6539_s20  ;;  %v2230_v7 = vpop.f32.mrf.mxu2 }
 0x35d   : > { %v7857_v41 = vadd.f32 %v7769_v42, %v2230_v7 }
 0x35f   : > { %v2772_v37 = vsel %vm2747_vm1, %v7857_v41, -inf  ;;  %v2258_v14 = vmul.f32 0.5, %v7857_v41 }
 0x361   : > { %2418 = vrot.lane.b32.xlu1 %v2382_v55, %s6539_s20  ;;  %v2282_v19 = vmul.f32 1.442695, %v2258_v14 }
 0x364   : > { %v2232_v25 = vpop.f32.mrf.mxu2 }
 0x365   : > { %v7845_v27 = vadd.f32 %v7769_v42, %v2232_v25  ;;  %v7902_v25 = vpop.permute.xlu2 %2360 }
 0x367   : > { %v2775_v6 = vsel %vm2747_vm1, %v7845_v27, -inf }
 0x36c   : > { %v2235_v53 = vpop.f32.mrf.mxu2 }
 0x36d   : > { %2770 = vmax.xlane.f32.xlu2 %v2769_v56  ;;  %v7850_v62 = vadd.f32 %v7769_v42, %v2235_v53  ;;  %v2259_v56 = vmul.f32 0.5, %v7845_v27 }
 0x36f   : > { %v2260_v1 = vmul.f32 0.5, %v7850_v62  ;;  %v2778_v55 = vsel %vm2747_vm1, %v7850_v62, -inf }
 0x371   : > { %v2286_v9 = vmul.f32 1.442695, %v2260_v1  ;;  %v2284_v1 = vmul.f32 1.442695, %v2259_v56 }
 0x373   : > { %6384 = vpow2.f32 %v2286_v9 }
 0x374   : > { %v2237_v35 = vpop.f32.mrf.mxu2 }
 0x375   : > { %2776 = vmax.xlane.f32.xlu2 %v2775_v6  ;;  %v7854_v46 = vadd.f32 %v7769_v42, %v2237_v35 }
 0x377   : > { %v2261_v29 = vmul.f32 0.5, %v7854_v46  ;;  %v2781_v9 = vsel %vm2747_vm1, %v7854_v46, -inf }
 0x379   : > { %v2288_v12 = vmul.f32 1.442695, %v2261_v29  ;;  %v7863_v61 = vpop.eup %6384 }
 0x37a   : > { %v2388_v4 = vmul.f32 %v7863_v61, %v2351_v38 }
 0x37b   : > { %6386 = vpow2.f32 %v2288_v12 }
 0x37c   : > { %6388 = vpow2.f32 %v2280_v23  ;;  %v7877_v45 = vpop.f32.mrf.mxu2 }
 0x37d   : > { %6390 = vpow2.f32 %v2282_v19  ;;  %v7956_v56 = vadd.f32 %v7769_v42, %v7877_v45 }
 0x381   : > { %v7869_v5 = vpop.eup %6386 }
 0x382   : > { %9694 = vst [vmem:[#allocation2_spill] sm:$0xff] %v7869_v5  ;;  %v2389_v15 = vmul.f32 %v7869_v5, %v2353_v18  ;;  %v7873_v54 = vpop.eup %6388 }
 0x383   : > { %v2385_v34 = vmul.f32 %v7873_v54, %v2345_v63  ;;  %v7880_v49 = vpop.eup %6390 }
 0x384   : > { %9695 = vst [vmem:[#allocation3_spill] sm:$0xff] %v7880_v49  ;;  %v2386_v0 = vmul.f32 %v7880_v49, %v2347_v30  ;;  %v2242_v39 = vpop.f32.mrf.mxu2 }
 0x385   : > { %v7912_v30 = vadd.f32 %v7769_v42, %v2242_v39 }
 0x386   : > { %2773 = vmax.xlane.f32.xlu0 %v2772_v37  ;;  %v2411_v63 = vpop.permute.xlu2 %2410 }
 0x387   : > { %v2787_v58 = vsel %vm2747_vm1, %v7912_v30, -inf }
 0x38b   : > { %2767 = vmax.xlane.f32.xlu1 %v2766_v8 }
 0x38c   : > { %v2245_v31 = vpop.f32.mrf.mxu2 }
 0x38d   : > { %2430 = vrot.lane.b32.xlu2 %v2388_v4, %s6539_s20  ;;  %v7924_v18 = vadd.f32 %v7769_v42, %v2245_v31 }
 0x38e   : > { %v2413_v23 = vpop.permute.xlu2 %2412 }
 0x393   : > { %v2750_v7 = vpop.xlane.xlu0 %2749 }
 0x394   : > { %v2247_v47 = vpop.f32.mrf.mxu2 }
 0x395   : > { %2432 = vrot.lane.b32.xlu2 %v2389_v15, %s6539_s20  ;;  %v7893_v22 = vadd.f32 %v7769_v42, %v2247_v47  ;;  %v2784_v42 = vsel %vm2747_vm1, %v7956_v56, -inf }
 0x396   : > { %v7939_v39 = vpop.permute.xlu2 %2414 }
 0x397   : > { %v2793_v28 = vsel %vm2747_vm1, %v7893_v22, -inf }
 0x39a   : > { %2424 = vrot.lane.b32.xlu0 %v2385_v34, %s6539_s20 }
 0x39b   : > { %v2753_v35 = vpop.xlane.xlu0 %2752 }
 0x39c   : > { %v2797_v12 = vsub.f32 %v7778_v17, %v2753_v35 }
 0x39e   : > { %v2814_v4 = vmul.f32 1.442695, %v2797_v12  ;;  %v7943_v47 = vpop.permute.xlu2 %2416 }
 0x3a3   : > { %v7886_v44 = vpop.xlane.xlu1 %2755 }
 0x3a4   : > { %2426 = vrot.lane.b32.xlu1 %v2386_v0, %s6539_s20 }
 0x3ab   : > { %v7888_v10 = vpop.xlane.xlu1 %2758 }
 0x3b3   : > { %v7914_v29 = vpop.xlane.xlu0 %2761 }
 0x3bb   : > { %v2765_v20 = vpop.xlane.xlu1 %2764 }
 0x3bc   : > { %v2801_v57 = vsub.f32 %v7817_v40, %v2765_v20 }
 0x3be   : > { %v2822_v33 = vmul.f32 1.442695, %v2801_v57  ;;  %2794 = vmax.xlane.f32.xlu2 %v2793_v28  ;;  %v2796_v57 = vsub.f32 %v7772_v11, %v2750_v7  ;;  %v7949_v28 = vadd.f32 %v2413_v23, %v7778_v17  ;;  %v2798_v7 = vsub.f32 %v7788_v26, %v7886_v44 }
 0x3c0   : > { %6392 = vpow2.f32 %v2822_v33  ;;  %9698 = vst [vmem:[#allocation6_spill] sm:$0xff] %v7949_v28  ;;  %v7952_v33 = vadd.f32 %v2411_v63, %v7772_v11  ;;  %v2816_v45 = vmul.f32 1.442695, %v2798_v7 }
 0x3c1   : > { %6394 = vpow2.f32 %v2284_v1 }
 0x3c2   : > { %6396 = vpow2.f32 %v2814_v4  ;;  %9699 = vst [vmem:[#allocation7_spill] sm:$0xff] %v7952_v33 }
 0x3c4   : > { %2779 = vmax.xlane.f32.xlu0 %v2778_v55  ;;  %v2812_v55 = vmul.f32 1.442695, %v2796_v57 }
 0x3c6   : > { %v7905_v53 = vpop.eup %6392  ;;  %v2421_v14 = vpop.permute.xlu0 %2420  ;;  %6398 = vpow2.f32 %v2812_v55 }
 0x3c7   : > { %v2859_v6 = vsel %vm2747_vm1, %v7905_v53, 0.0  ;;  %v7916_v37 = vpop.eup %6394  ;;  %v7930_v19 = vadd.f32 %v2421_v14, %v7817_v40 }
 0x3c8   : > { %2860 = vadd.xlane.f32.xlu2 %v2859_v6  ;;  %v2387_v38 = vmul.f32 %v7916_v37, %v2349_v2  ;;  %v2790_v2 = vsel %vm2747_vm1, %v7924_v18, -inf  ;;  %v7937_v0 = vpop.eup %6396  ;;  %v6286_v6 = vpack.i.bf16 %v7949_v28, %v7952_v33 }
 0x3c9   : > { %9697 = vst [vmem:[#allocation5_spill] sm:$0xff] %v7930_v19  ;;  %v2847_v31 = vsel %vm2747_vm1, %v7937_v0, 0.0 }
 0x3cc   : > { %v7967_v23 = vpop.eup %6398 }
 0x3cd   : > { %v2844_v44 = vsel %vm2747_vm1, %v7967_v23, 0.0 }
 0x3ce   : > { %2782 = vmax.xlane.f32.xlu1 %v2781_v9  ;;  %v2423_v1 = vpop.permute.xlu0 %2422 }
 0x3d3   : > { %v2419_v8 = vpop.permute.xlu1 %2418 }
 0x3d4   : > { %v7927_v15 = vadd.f32 %v2419_v8, %v7808_v43 }
 0x3d6   : > { %2788 = vmax.xlane.f32.xlu1 %v2787_v58  ;;  %9696 = vst [vmem:[#allocation4_spill] sm:$0xff] %v7927_v15  ;;  %v6296_v34 = vpack.i.bf16 %v7930_v19, %v7927_v15 }
 0x3d8   : > { %2428 = vrot.lane.b32.xlu0 %v2387_v38, %s6539_s20 }
 0x3de   : > { %2791 = vmax.xlane.f32.xlu1 %v2790_v2 }
 0x3e0   : > { %6297 = vrot.lane.b32.xlu2 %v6296_v34, %s6540_s21  ;;  %v7945_v20 = vpop.xlane.xlu2 %2770 }
 0x3e6   : > { %2848 = vadd.xlane.f32.xlu1 %v2847_v31 }
 0x3e8   : > { %v2777_v35 = vpop.xlane.xlu2 %2776 }
 0x3e9   : > { %v2805_v63 = vsub.f32 %v7845_v27, %v2777_v35 }
 0x3eb   : > { %v2830_v38 = vmul.f32 1.442695, %v2805_v63  ;;  %v2263_v63 = vmul.f32 0.5, %v7912_v30 }
 0x3f9   : > { %v2774_v8 = vpop.xlane.xlu0 %2773 }
 0x3fa   : > { %v2804_v4 = vsub.f32 %v7857_v41, %v2774_v8  ;;  %v7997_v8 = vadd.f32 %v2423_v1, %v7823_v52 }
 0x3fc   : > { %v2828_v34 = vmul.f32 1.442695, %v2804_v4  ;;  %9701 = vst [vmem:[#allocation9_spill] sm:$0xff] %v7997_v8 }
 0x3fe   : > { %v2768_v9 = vpop.xlane.xlu1 %2767 }
 0x3ff   : > { %v2802_v12 = vsub.f32 %v7823_v52, %v2768_v9  ;;  %6287 = vrot.lane.b32.xlu1 %v6286_v6, %s6540_s21  ;;  %v2799_v9 = vsub.f32 %v7798_v16, %v7888_v10 }
 0x401   : > { %v2824_v58 = vmul.f32 1.442695, %v2802_v12  ;;  %v2818_v7 = vmul.f32 1.442695, %v2799_v9  ;;  %v8016_v9 = vadd.f32 %v7939_v39, %v7788_v26  ;;  %v2803_v39 = vsub.f32 %v7840_v60, %v7945_v20 }
 0x402   : > { %2785 = vmax.xlane.f32.xlu0 %v2784_v42  ;;  %v2292_v42 = vmul.f32 1.442695, %v2263_v63 }
 0x403   : > { %6400 = vpow2.f32 %v2824_v58  ;;  %9703 = vst [vmem:[#allocation11_spill] sm:$0xff] %v8016_v9 }
 0x404   : > { %6402 = vpow2.f32 %v2816_v45 }
 0x405   : > { %6404 = vpow2.f32 %v2830_v38 }
 0x406   : > { %6406 = vpow2.f32 %v2828_v34 }
 0x407   : > { %6408 = vpow2.f32 %v2818_v7 }
 0x408   : > { %6410 = vpow2.f32 %v2292_v42 }
 0x409   : > { %v7970_v14 = vpop.eup %6400 }
 0x40a   : > { %2845 = vadd.xlane.f32.xlu0 %v2844_v44  ;;  %v2862_v2 = vsel %vm2747_vm1, %v7970_v14, 0.0  ;;  %v7976_v31 = vpop.eup %6402 }
 0x40b   : > { %2863 = vadd.xlane.f32.xlu2 %v2862_v2  ;;  %v7978_v57 = vpop.eup %6404  ;;  %v2850_v55 = vsel %vm2747_vm1, %v7976_v31, 0.0 }
 0x40c   : > { %v2871_v6 = vsel %vm2747_vm1, %v7978_v57, 0.0  ;;  %v7984_v35 = vpop.eup %6406  ;;  %v2425_v58 = vpop.permute.xlu0 %2424 }
 0x40d   : > { %v2868_v12 = vsel %vm2747_vm1, %v7984_v35, 0.0  ;;  %v7991_v45 = vpop.eup %6408  ;;  %v7994_v38 = vadd.f32 %v2425_v58, %v7840_v60 }
 0x40e   : > { %v2853_v10 = vsel %vm2747_vm1, %v7991_v45, 0.0  ;;  %v8004_v44 = vpop.eup %6410 }
 0x40f   : > { %9700 = vst [vmem:[#allocation8_spill] sm:$0xff] %v7994_v38  ;;  %v6311_v4 = vpack.i.bf16 %v7994_v38, %v7997_v8  ;;  %v2391_v2 = vmul.f32 %v8004_v44, %v7895_v36 }
 0x412   : > { %2851 = vadd.xlane.f32.xlu0 %v2850_v55 }
 0x413   : > { %2872 = vadd.xlane.f32.xlu2 %v2871_v6  ;;  %v8012_v6 = vadd.f32 %v7943_v47, %v7798_v16  ;;  %v2800_v47 = vsub.f32 %v7808_v43, %v7914_v29  ;;  %v8034_v29 = vpop.permute.xlu2 %2430 }
 0x415   : > { %9702 = vst [vmem:[#allocation10_spill] sm:$0xff] %v8012_v6  ;;  %v2820_v42 = vmul.f32 1.442695, %v2800_v47 }
 0x416   : > { %v2427_v63 = vpop.permute.xlu1 %2426 }
 0x41a   : > { %2869 = vadd.xlane.f32.xlu0 %v2868_v12  ;;  %v6291_v12 = vpack.i.bf16 %v8012_v6, %v8016_v9 }
 0x429   : > { %2854 = vadd.xlane.f32.xlu1 %v2853_v10 }
 0x42b   : > { %6312 = vrot.lane.b32.xlu2 %v6311_v4, %s6540_s21  ;;  %v2826_v4 = vmul.f32 1.442695, %v2803_v39 }
 0x433   : > { %2436 = vrot.lane.b32.xlu2 %v2391_v2, %s6539_s20 }
 0x437   : > { %v2780_v34 = vpop.xlane.xlu0 %2779 }
 0x438   : > { %v2806_v1 = vsub.f32 %v7850_v62, %v2780_v34 }
 0x43a   : > { %v2832_v55 = vmul.f32 1.442695, %v2806_v1 }
 0x43c   : > { %6412 = vpow2.f32 %v2832_v55 }
 0x43d   : > { %6414 = vpow2.f32 %v2820_v42 }
 0x43e   : > { %6416 = vpow2.f32 %v2826_v4 }
 0x441   : > { %v2783_v58 = vpop.xlane.xlu1 %2782 }
 0x442   : > { %v8020_v7 = vpop.eup %6412  ;;  %6292 = vrot.lane.b32.xlu1 %v6291_v12, %s6540_s21  ;;  %v2807_v34 = vsub.f32 %v7854_v46, %v2783_v58 }
 0x443   : > { %v2874_v36 = vsel %vm2747_vm1, %v8020_v7, 0.0  ;;  %v8029_v2 = vpop.eup %6414 }
 0x444   : > { %2875 = vadd.xlane.f32.xlu0 %v2874_v36  ;;  %v2856_v1 = vsel %vm2747_vm1, %v8029_v2, 0.0  ;;  %v2834_v12 = vmul.f32 1.442695, %v2807_v34  ;;  %v8038_v47 = vpop.eup %6416 }
 0x445   : > { %v2865_v42 = vsel %vm2747_vm1, %v8038_v47, 0.0 }
 0x446   : > { %6418 = vpow2.f32 %v2834_v12 }
 0x449   : > { %v2789_v10 = vpop.xlane.xlu1 %2788 }
 0x44a   : > { %v2429_v55 = vpop.permute.xlu0 %2428  ;;  %v2809_v20 = vsub.f32 %v7912_v30, %v2789_v10 }
 0x44c   : > { %v2838_v39 = vmul.f32 1.442695, %v2809_v20  ;;  %v8045_v4 = vpop.eup %6418 }
 0x44d   : > { %v2877_v38 = vsel %vm2747_vm1, %v8045_v4, 0.0 }
 0x44e   : > { %6420 = vpow2.f32 %v2838_v39 }
 0x451   : > { %v8036_v36 = vpop.xlane.xlu1 %2791 }
 0x454   : > { %v8051_v10 = vpop.eup %6420 }
 0x455   : > { %v2883_v20 = vsel %vm2747_vm1, %v8051_v10, 0.0 }
 0x459   : > { %v2849_v34 = vpop.xlane.xlu1 %2848 }
 0x45a   : > { %6422 = vrcp.f32 %v2849_v34 }
 0x46c   : > { %2857 = vadd.xlane.f32.xlu1 %v2856_v1  ;;  %v8047_v1 = vpop.permute.xlu2 %2432 }
 0x471   : > { %v8063_v8 = vpop.permute.xlu1 %6287 }
 0x474   : > { %2866 = vadd.xlane.f32.xlu1 %v2865_v42  ;;  %v8053_v15 = vpop.xlane.xlu2 %2794  ;;  %v6423_v42 = vpop.eup %6422 }
 0x475   : > { %v8043_v58 = vpop.xlane.xlu0 %2785  ;;  %v2909_v39 = vmul.f32 %v6423_v42, %v7937_v0  ;;  %v8072_v42 = vadd.f32 %v2429_v55, %v7845_v27 }
 0x47c   : > { %2878 = vadd.xlane.f32.xlu1 %v2877_v38  ;;  %v2861_v33 = vpop.xlane.xlu2 %2860  ;;  %v2262_v38 = vmul.f32 0.5, %v7956_v56 }
 0x47d   : > { %v2846_v12 = vpop.xlane.xlu0 %2845 }
 0x47e   : > { %6424 = vrcp.f32 %v2846_v12  ;;  %v2290_v34 = vmul.f32 1.442695, %v2262_v38  ;;  %v8075_v38 = vadd.f32 %v2427_v63, %v7857_v41  ;;  %v2265_v63 = vmul.f32 0.5, %v7893_v22 }
 0x480   : > { %6426 = vpow2.f32 %v2290_v34  ;;  %v6326_v5 = vpack.i.bf16 %v8072_v42, %v8075_v38 }
 0x484   : > { %v6425_v28 = vpop.eup %6424  ;;  %2884 = vadd.xlane.f32.xlu1 %v2883_v20  ;;  %v8061_v12 = vpop.permute.xlu2 %6297 }
 0x485   : > { %v2908_v19 = vmul.f32 %v6425_v28, %v7967_v23  ;;  %v2852_v20 = vpop.xlane.xlu0 %2851  ;;  %v2264_v28 = vmul.f32 0.5, %v7924_v18 }
 0x486   : > { %v8065_v9 = vpop.eup %6426  ;;  %6428 = vrcp.f32 %v2852_v20 }
 0x487   : > { %v6301_v6 = vpack.i.bf16 %v2909_v39, %v2908_v19  ;;  %v2390_v19 = vmul.f32 %v8065_v9, %v7890_v21 }
 0x489   : > { %6302 = vrot.lane.b32.xlu0 %v6301_v6, %s6541_s22  ;;  %v2294_v6 = vmul.f32 1.442695, %v2264_v28 }
 0x48c   : > { %v2864_v0 = vpop.xlane.xlu2 %2863  ;;  %v6429_v39 = vpop.eup %6428 }
 0x48d   : > { %v2870_v21 = vpop.xlane.xlu0 %2869  ;;  %v2910_v20 = vmul.f32 %v6429_v39, %v7976_v31 }
 0x494   : > { %v2873_v49 = vpop.xlane.xlu2 %2872 }
 0x49c   : > { %v2855_v23 = vpop.xlane.xlu1 %2854 }
 0x49d   : > { %6430 = vrcp.f32 %v2855_v23  ;;  %2434 = vrot.lane.b32.xlu1 %v2390_v19, %s6539_s20 }
 0x49e   : > { %6432 = vpow2.f32 %v2294_v6 }
 0x49f   : > { %6434 = vrcp.f32 %v2870_v21 }
 0x4a0   : > { %6436 = vrcp.f32 %v2873_v49 }
 0x4a3   : > { %v6431_v34 = vpop.eup %6430 }
 0x4a4   : > { %v2911_v23 = vmul.f32 %v6431_v34, %v7991_v45  ;;  %v8082_v28 = vpop.eup %6432  ;;  %v2296_v45 = vmul.f32 1.442695, %v2265_v63 }
 0x4a5   : > { %6327 = vrot.lane.b32.xlu1 %v6326_v5, %s6540_s21  ;;  %v2392_v19 = vmul.f32 %v8082_v28, %v7882_v3  ;;  %v6435_v6 = vpop.eup %6434  ;;  %v2808_v3 = vsub.f32 %v7956_v56, %v8043_v58  ;;  %v6149_v58 = vld [vmem:[%s9668_s10] sm:$0xff] }
 0x4a6   : > { %v6306_v55 = vpack.i.bf16 %v2911_v23, %v2910_v20  ;;  %v6437_v31 = vpop.eup %6436  ;;  %v2916_v39 = vmul.f32 %v6435_v6, %v7984_v35  ;;  %6438 = vpow2.f32 %v2296_v45  ;;  %v3078_v35 = vld [vmem:[%s9668_s10 + $0x8] sm:$0x1] }
 0x4a7   : > { %v2917_v5 = vmul.f32 %v6437_v31, %v7978_v57  ;;  %v2836_v20 = vmul.f32 1.442695, %v2808_v3 }
 0x4a8   : > { %6307 = vrot.lane.b32.xlu0 %v6306_v55, %s6541_s22  ;;  %v3088_v55 = vunpack.c.l.b16 %v3078_v35 }
 0x4a9   : > { %v6331_v34 = vpack.i.bf16 %v2917_v5, %v2916_v39  ;;  %6440 = vpow2.f32 %v2836_v20 }
 0x4aa   : > { %6442 = vrcp.f32 %v2861_v33 }
 0x4ac   : > { %v8092_v49 = vpop.eup %6438 }
 0x4ad   : > { %2438 = vrot.lane.b32.xlu1 %v2392_v19, %s6539_s20  ;;  %v2393_v21 = vmul.f32 %v8092_v49, %v7902_v25  ;;  %v3090_v25 = vpack.c.b16 %v3088_v55, %v3088_v55 }
 0x4af   : > { %v8099_v23 = vpop.eup %6440  ;;  %v3119_v19 = vsel %vm3117_vm2, %v3090_v25, 0 }
 0x4b0   : > { %v2880_v57 = vsel %vm2747_vm1, %v8099_v23, 0.0  ;;  %3127 = vmatpush.bf16.msra.mxu3 %v3119_v19  ;;  %v6443_v31 = vpop.eup %6442 }
 0x4b4   : > { %v8106_v63 = vpop.permute.xlu1 %6292  ;;  %3128 = vmatpush.bf16.msra.mxu3 %v6149_v58 }
 0x4b5   : > { %6332 = vrot.lane.b32.xlu1 %v6331_v34, %s6541_s22  ;;  %v2913_v34 = vmul.f32 %v6443_v31, %v7905_v53  ;;  %v6290_v31 = vunpack.i.h.bf16 %v8063_v8 }
 0x4b7   : > { %v2876_v3 = vpop.xlane.xlu0 %2875 }
 0x4bd   : > { %2440 = vrot.lane.b32.xlu1 %v2393_v21, %s6539_s20 }
 0x4d2   : > { %2881 = vadd.xlane.f32.xlu0 %v2880_v57 }
 0x4df   : > { %v2858_v6 = vpop.xlane.xlu1 %2857 }
 0x4e0   : > { %6444 = vrcp.f32 %v2858_v6 }
 0x4e1   : > { %6446 = vrcp.f32 %v2864_v0 }
 0x4e6   : > { %v6445_v45 = vpop.eup %6444 }
 0x4e7   : > { %v2867_v39 = vpop.xlane.xlu1 %2866  ;;  %v2912_v5 = vmul.f32 %v6445_v45, %v8029_v2  ;;  %v6447_v20 = vpop.eup %6446 }
 0x4e8   : > { %6448 = vrcp.f32 %v2867_v39  ;;  %v2914_v35 = vmul.f32 %v6447_v20, %v7970_v14  ;;  %v6289_v14 = vunpack.i.l.bf16 %v8063_v8 }
 0x4e9   : > { %v6316_v21 = vpack.i.bf16 %v2913_v34, %v2912_v5  ;;  %6450 = vrcp.f32 %v2876_v3 }
 0x4eb   : > { %6317 = vrot.lane.b32.xlu2 %v6316_v21, %s6541_s22  ;;  %v2811_v21 = vsub.f32 %v7893_v22, %v8053_v15 }
 0x4ed   : > { %v2842_v3 = vmul.f32 1.442695, %v2811_v21 }
 0x4ee   : > { %v6449_v57 = vpop.eup %6448 }
 0x4ef   : > { %v2879_v33 = vpop.xlane.xlu1 %2878  ;;  %v2915_v55 = vmul.f32 %v6449_v57, %v8038_v47  ;;  %v6451_v2 = vpop.eup %6450 }
 0x4f0   : > { %6452 = vrcp.f32 %v2879_v33  ;;  %v2918_v53 = vmul.f32 %v6451_v2, %v8020_v7  ;;  %v2810_v7 = vsub.f32 %v7924_v18, %v8036_v36  ;;  %v6294_v36 = vunpack.i.l.bf16 %v8106_v63 }
 0x4f1   : > { %v6321_v0 = vpack.i.bf16 %v2915_v55, %v2914_v35  ;;  %v6295_v35 = vunpack.i.h.bf16 %v8106_v63  ;;  %v8150_v63 = vadd.f32 %v8034_v29, %v7850_v62 }
 0x4f3   : > { %6322 = vrot.lane.b32.xlu0 %v6321_v0, %s6541_s22 }
 0x4f6   : > { %v6453_v25 = vpop.eup %6452 }
 0x4f7   : > { %v2919_v19 = vmul.f32 %v6453_v25, %v8045_v4  ;;  %v2840_v4 = vmul.f32 1.442695, %v2810_v7  ;;  %v2493_v7 = vmul.f32 %v7798_v16, %v7798_v16 }
 0x4f9   : > { %v6341_v58 = vpack.i.bf16 %v2919_v19, %v2918_v53  ;;  %6454 = vpow2.f32 %v2840_v4  ;;  %v8141_v19 = vpop.permute.xlu2 %6312  ;;  %v6300_v4 = vunpack.i.h.bf16 %v8061_v12 }
 0x4fa   : > { %6456 = vpow2.f32 %v2842_v3 }
 0x4fb   : > { %v6303_v6 = vpop.permute.xlu0 %6302  ;;  %6342 = vrot.lane.b32.xlu1 %v6341_v58, %s6541_s22  ;;  %v2885_v58 = vpop.xlane.xlu1 %2884 }
 0x4fc   : > { %v6305_v47 = vunpack.i.h.bf16 %v6303_v6  ;;  %v6304_v45 = vunpack.i.l.bf16 %v6303_v6  ;;  %v8146_v6 = vadd.f32 %v8047_v1, %v7854_v46  ;;  %6458 = vrcp.f32 %v2885_v58 }
 0x4fe   : > { %v3052_v39 = vsel %vm2682_vm3, %v6289_v14, %v6304_v45  ;;  %v3053_v5 = vsel %vm2682_vm3, %v6290_v31, %v6305_v47  ;;  %v6336_v14 = vpack.i.bf16 %v8146_v6, %v8150_v63 }
 0x4ff   : > { %v3068_v34 = vpack.c.bf16 %v3053_v5, %v3052_v39  ;;  %v8129_v8 = vpop.eup %6454  ;;  %v2490_v5 = vmul.f32 %v7772_v11, %v7772_v11 }
 0x500   : > { %v2886_v20 = vsel %vm2747_vm1, %v8129_v8, 0.0  ;;  %v8133_v57 = vpop.eup %6456 }
 0x501   : > { %5587 = vmatmul.msk.bf16.vlgmr.msra.gmra.mxu3 %vm3092_vm4, %v3068_v34  ;;  %v2889_v15 = vsel %vm2747_vm1, %v8133_v57, 0.0  ;;  %v2437_v47 = vpop.permute.xlu2 %2436 }
 0x502   : > { %v8159_v39 = vadd.f32 %v2437_v47, %v7912_v30 }
 0x50f   : > { %v2435_v31 = vpop.permute.xlu1 %2434 }
 0x510   : > { %v8155_v45 = vadd.f32 %v2435_v31, %v7956_v56 }
 0x512   : > { %v6346_v1 = vpack.i.bf16 %v8159_v39, %v8155_v45 }
 0x514   : > { %2887 = vadd.xlane.f32.xlu2 %v2886_v20  ;;  %v6299_v20 = vunpack.i.l.bf16 %v8061_v12 }
 0x517   : > { %v8164_v29 = vpop.permute.xlu1 %6327 }
 0x51a   : > { %v6308_v33 = vpop.permute.xlu0 %6307 }
 0x51b   : > { %v6310_v55 = vunpack.i.h.bf16 %v6308_v33  ;;  %v6309_v0 = vunpack.i.l.bf16 %v6308_v33 }
 0x51d   : > { %v3054_v2 = vsel %vm2682_vm3, %v6294_v36, %v6309_v0  ;;  %v3055_v25 = vsel %vm2682_vm3, %v6295_v35, %v6310_v55  ;;  %2890 = vadd.xlane.f32.xlu0 %v2889_v15  ;;  %v2496_v55 = vmul.f32 %v7823_v52, %v7823_v52 }
 0x51e   : > { %v3069_v53 = vpack.c.bf16 %v3055_v25, %v3054_v2  ;;  %v6459_v25 = vpop.eup %6458 }
 0x51f   : > { %v2439_v34 = vpop.permute.xlu1 %2438  ;;  %v2921_v58 = vmul.f32 %v6459_v25, %v8051_v10  ;;  %v6164_v10 = vld [vmem:[%s9670_s12 + $0x74] sm:$0xf]  ;;  %v2502_v25 = vmul.f32 %v7956_v56, %v7956_v56 }
 0x520   : > { %5588 = vmatmul.msk.bf16.gmra.mxu3 %vm3092_vm4, %v3069_v53 }
 0x527   : > { %v8174_v33 = vpop.permute.xlu1 %6332 }
 0x52c   : > { %6337 = vrot.lane.b32.xlu2 %v6336_v14, %s6540_s21  ;;  %v2499_v14 = vmul.f32 %v7845_v27, %v7845_v27 }
 0x52f   : > { %v2441_v47 = vpop.permute.xlu1 %2440 }
 0x531   : > { %6347 = vrot.lane.b32.xlu0 %v6346_v1, %s6540_s21  ;;  %v5653_v1 = vld [vmem:[%s9670_s12 + $0x70] sm:$0xf] }
 0x539   : > { %2522 = vrot.lane.b32.xlu0 %v2490_v5, %s6541_s22  ;;  %v6165_v5 = vld [vmem:[%s9670_s12 + $0x74] sm:$0xf0] }
 0x541   : > { %2528 = vrot.lane.b32.xlu0 %v2493_v7, %s6541_s22  ;;  %v5655_v7 = vld [vmem:[%s9670_s12 + $0x78] sm:$0xf0] }
 0x545   : > { %v2882_v21 = vpop.xlane.xlu0 %2881  ;;  %v6318_v3 = vpop.permute.xlu2 %6317 }
 0x546   : > { %6460 = vrcp.f32 %v2882_v21  ;;  %v6320_v35 = vunpack.i.h.bf16 %v6318_v3  ;;  %v6319_v36 = vunpack.i.l.bf16 %v6318_v3  ;;  %v8204_v21 = vadd.f32 %v2441_v47, %v7893_v22  ;;  %v6159_v47 = vld [vmem:[%s9670_s12 + $0x44] sm:$0xf0] }
 0x547   : > { %v5658_v3 = vor.u32 %v6164_v10, %v5655_v7 }
 0x548   : > { %v3056_v0 = vsel %vm2682_vm3, %v6299_v20, %v6319_v36  ;;  %v3057_v15 = vsel %vm2682_vm3, %v6300_v4, %v6320_v35  ;;  %v5645_v4 = vld [vmem:[%s9670_s12 + $0x60] sm:$0xf]  ;;  %v6163_v20 = vld [vmem:[%s9670_s12 + $0x64] sm:$0xf0]  ;;  %v6162_v35 = vld [vmem:[%s9670_s12 + $0x64] sm:$0xf] }
 0x549   : > { %v3070_v2 = vpack.c.bf16 %v3057_v15, %v3056_v0  ;;  %2534 = vrot.lane.b32.xlu0 %v2496_v55, %s6541_s22  ;;  %v5647_v36 = vld [vmem:[%s9670_s12 + $0x68] sm:$0xf0]  ;;  %v5646_v55 = vor.u32 %v6163_v20, %v5645_v4  ;;  %v8216_v0 = vadd.f32 %v2439_v34, %v7924_v18  ;;  %3345 = vmatpush.bf16.msra.mxu1 %v5658_v3  ;;  %v6161_v34 = vld [vmem:[%s9670_s12 + $0x54] sm:$0xf0]  ;;  %v5621_v20 = vld [vmem:[%s9670_s12 + $0x30] sm:$0xf] }
 0x54a   : > { %v5650_v15 = vor.u32 %v6162_v35, %v5647_v36  ;;  %v2491_v4 = vmul.f32 %v7778_v17, %v7778_v17  ;;  %v2505_v3 = vmul.f32 %v7893_v22, %v7893_v22  ;;  %v6157_v35 = vld [vmem:[%s9670_s12 + $0x34] sm:$0xf0]  ;;  %v6156_v36 = vld [vmem:[%s9670_s12 + $0x34] sm:$0xf] }
 0x54b   : > { %5589 = vmatmul.msk.bf16.gmra.mxu3 %vm3092_vm4, %v3070_v2  ;;  %v6356_v2 = vpack.i.bf16 %v8204_v21, %v8216_v0 }
 0x54c   : > { %v6461_v53 = vpop.eup %6460 }
 0x54d   : > { %v2920_v12 = vmul.f32 %v6461_v53, %v8099_v23  ;;  %v5654_v23 = vor.u32 %v6165_v5, %v5653_v1  ;;  %3346 = vmatpush.bf16.msra.mxu1 %v5650_v15  ;;  %v5637_v53 = vld [vmem:[%s9670_s12 + $0x50] sm:$0xf]  ;;  %v6158_v5 = vld [vmem:[%s9670_s12 + $0x44] sm:$0xf]  ;;  %v5623_v15 = vld [vmem:[%s9670_s12 + $0x38] sm:$0xf0] }
 0x54f   : > { %v6351_v31 = vpack.i.bf16 %v2921_v58, %v2920_v12  ;;  %3296 = vmatpush.bf16.msra.mxu0 %v5654_v23  ;;  %v6160_v12 = vld [vmem:[%s9670_s12 + $0x54] sm:$0xf]  ;;  %v5638_v58 = vor.u32 %v6161_v34, %v5637_v53  ;;  %v5631_v23 = vld [vmem:[%s9670_s12 + $0x48] sm:$0xf0]  ;;  %v6315_v53 = vunpack.i.h.bf16 %v8141_v19  ;;  %v6314_v34 = vunpack.i.l.bf16 %v8141_v19 }
 0x550   : > { %v5634_v7 = vor.u32 %v6158_v5, %v5631_v23  ;;  %v5615_v5 = vld [vmem:[%s9670_s12 + $0x28] sm:$0xf0] }
 0x551   : > { %6352 = vrot.lane.b32.xlu1 %v6351_v31, %s6541_s22  ;;  %2540 = vrot.lane.b32.xlu0 %v2499_v14, %s6541_s22  ;;  %v5639_v31 = vld [vmem:[%s9670_s12 + $0x58] sm:$0xf0]  ;;  %v5629_v14 = vld [vmem:[%s9670_s12 + $0x40] sm:$0xf] }
 0x552   : > { %v5642_v1 = vor.u32 %v6160_v12, %v5639_v31  ;;  %v5630_v10 = vor.u32 %v6159_v47, %v5629_v14  ;;  %v5613_v31 = vld [vmem:[%s9670_s12 + $0x20] sm:$0xf]  ;;  %v6155_v14 = vld [vmem:[%s9670_s12 + $0x24] sm:$0xf0]  ;;  %v6154_v47 = vld [vmem:[%s9670_s12 + $0x24] sm:$0xf] }
 0x553   : > { %3297 = vmatpush.bf16.msra.mxu0 %v5646_v55  ;;  %v5622_v55 = vor.u32 %v6157_v35, %v5621_v20  ;;  %v5614_v19 = vor.u32 %v6155_v14, %v5613_v31  ;;  %v6153_v20 = vld [vmem:[%s9670_s12 + $0x14] sm:$0xf0]  ;;  %v6152_v35 = vld [vmem:[%s9670_s12 + $0x14] sm:$0xf]  ;;  %v6335_v14 = vunpack.i.h.bf16 %v8174_v33 }
 0x554   : > { %3347 = vmatpush.bf16.msra.mxu1 %v5642_v1  ;;  %v2494_v1 = vmul.f32 %v7808_v43, %v7808_v43 }
 0x557   : > { %3298 = vmatpush.bf16.msra.mxu0 %v5638_v58 }
 0x558   : > { %3348 = vmatpush.bf16.msra.mxu1 %v5634_v7  ;;  %v5618_v7 = vor.u32 %v6154_v47, %v5615_v5  ;;  %v6334_v47 = vunpack.i.l.bf16 %v8174_v33  ;;  %v2503_v33 = vmul.f32 %v7912_v30, %v7912_v30 }
 0x559   : > { %6357 = vrot.lane.b32.xlu1 %v6356_v2, %s6540_s21  ;;  %2546 = vrot.lane.b32.xlu0 %v2502_v25, %s6541_s22  ;;  %v5626_v2 = vor.u32 %v6156_v36, %v5623_v15 }
 0x55b   : > { %3299 = vmatpush.bf16.msra.mxu0 %v5630_v10 }
 0x55c   : > { %3349 = vmatpush.bf16.msra.mxu1 %v5626_v2  ;;  %v5597_v2 = vld [vmem:[%s9670_s12] sm:$0xf] }
 0x55f   : > { %3300 = vmatpush.bf16.msra.mxu0 %v5622_v55  ;;  %v5607_v55 = vld [vmem:[%s9670_s12 + $0x18] sm:$0xf0] }
 0x560   : > { %3350 = vmatpush.bf16.msra.mxu1 %v5618_v7  ;;  %v5610_v15 = vor.u32 %v6152_v35, %v5607_v55 }
 0x561   : > { %2524 = vrot.lane.b32.xlu1 %v2491_v4, %s6541_s22  ;;  %2552 = vrot.lane.b32.xlu0 %v2505_v3, %s6541_s22  ;;  %v5605_v3 = vld [vmem:[%s9670_s12 + $0x10] sm:$0xf] }
 0x562   : > { %v5606_v36 = vor.u32 %v6153_v20, %v5605_v3 }
 0x563   : > { %3301 = vmatpush.bf16.msra.mxu0 %v5614_v19  ;;  %v6329_v19 = vunpack.i.l.bf16 %v8164_v29 }
 0x564   : > { %3351 = vmatpush.bf16.msra.mxu1 %v5610_v15 }
 0x565   : > { %v6323_v25 = vpop.permute.xlu0 %6322 }
 0x566   : > { %v6325_v12 = vunpack.i.h.bf16 %v6323_v25  ;;  %v6324_v58 = vunpack.i.l.bf16 %v6323_v25  ;;  %v6151_v25 = vld [vmem:[%s9670_s12 + $0x4] sm:$0xf0] }
 0x567   : > { %3302 = vmatpush.bf16.msra.mxu0 %v5606_v36 }
 0x568   : > { %v3058_v23 = vsel %vm2682_vm3, %v6314_v34, %v6324_v58  ;;  %v3059_v10 = vsel %vm2682_vm3, %v6315_v53, %v6325_v12  ;;  %v6150_v53 = vld [vmem:[%s9670_s12 + $0x4] sm:$0xf]  ;;  %v2497_v34 = vmul.f32 %v7840_v60, %v7840_v60  ;;  %v5598_v12 = vor.u32 %v6151_v25, %v5597_v2  ;;  %v5599_v58 = vld [vmem:[%s9670_s12 + $0x8] sm:$0xf0] }
 0x569   : > { %v3071_v4 = vpack.c.bf16 %v3059_v10, %v3058_v23  ;;  %2530 = vrot.lane.b32.xlu1 %v2494_v1, %s6541_s22  ;;  %v5602_v31 = vor.u32 %v6150_v53, %v5599_v58  ;;  %v6330_v1 = vunpack.i.h.bf16 %v8164_v29  ;;  %v3060_v23 = vsel %vm2682_vm3, %v6329_v19, %v6334_v47  ;;  %v8329_v29 = vld [vmem:[%s9669_s11] ss:$0 sm:$0xff] }
 0x56a   : > { %v2500_v10 = vmul.f32 %v7850_v62, %v7850_v62 }
 0x56b   : > { %5590 = vmatmul.msk.bf16.gmra.mxu3 %vm3092_vm4, %v3071_v4  ;;  %3303 = vmatpush.bf16.msra.mxu0 %v5598_v12  ;;  %v3061_v5 = vsel %vm2682_vm3, %v6330_v1, %v6335_v14 }
 0x56c   : > { %3352 = vmatpush.bf16.msra.mxu1 %v5602_v31  ;;  %v3072_v7 = vpack.c.bf16 %v3061_v5, %v3060_v23 }
 0x56d   : > { %v6343_v36 = vpop.permute.xlu1 %6342 }
 0x56e   : > { %v6345_v53 = vunpack.i.h.bf16 %v6343_v36 }
 0x571   : > { %2536 = vrot.lane.b32.xlu1 %v2497_v34, %s6541_s22  ;;  %v6344_v34 = vunpack.i.l.bf16 %v6343_v36  ;;  %v2474_v36 = vsub.f32 -1.0, %v7772_v11 }
 0x579   : > { %2542 = vrot.lane.b32.xlu1 %v2500_v10, %s6541_s22 }
 0x57b   : > { %5591 = vmatmul.msk.bf16.gmra.mxu3 %vm3092_vm4, %v3072_v7 }
 0x581   : > { %2548 = vrot.lane.b32.xlu1 %v2503_v33, %s6541_s22 }
 0x584   : > { %v3130_v4 = vpop.f32.mrf.mxu3 }
 0x585   : > { %v3131_v20 = vadd.f32 %v8329_v29, %v3130_v4  ;;  %v2492_v4 = vmul.f32 %v7788_v26, %v7788_v26 }
 0x587   : > { %v2888_v3 = vpop.xlane.xlu2 %2887  ;;  %v3170_v15 = vmax.f32 %v3131_v20, 0.0 }
 0x588   : > { %6462 = vrcp.f32 %v2888_v3 }
 0x58c   : > { %v3132_v35 = vpop.f32.mrf.mxu3 }
 0x58d   : > { %v3133_v55 = vadd.f32 %v8329_v29, %v3132_v35 }
 0x58e   : > { %v6463_v5 = vpop.eup %6462 }
 0x58f   : > { %v3171_v2 = vmax.f32 %v3133_v55, 0.0  ;;  %v6338_v25 = vpop.permute.xlu2 %6337  ;;  %v2922_v10 = vmul.f32 %v6463_v5, %v8129_v8  ;;  %v2495_v55 = vmul.f32 %v7817_v40, %v7817_v40  ;;  %v2480_v5 = vsub.f32 -1.0, %v7823_v52 }
 0x590   : > { %v6340_v12 = vunpack.i.h.bf16 %v6338_v25  ;;  %v6339_v58 = vunpack.i.l.bf16 %v6338_v25  ;;  %v2891_v31 = vpop.xlane.xlu0 %2890 }
 0x591   : > { %v3186_v14 = vpack.c.bf16 %v3171_v2, %v3170_v15  ;;  %6464 = vrcp.f32 %v2891_v31  ;;  %v2586_v2 = vmul.f32 %v7783_v48, %v7783_v48  ;;  %v2477_v31 = vsub.f32 -1.0, %v7798_v16 }
 0x592   : > { %v3063_v47 = vsel %vm2682_vm3, %v6340_v12, %v6345_v53  ;;  %v3062_v1 = vsel %vm2682_vm3, %v6339_v58, %v6344_v34  ;;  %v2589_v48 = vmul.f32 %v7812_v13, %v7812_v13  ;;  %v2483_v13 = vsub.f32 -1.0, %v7845_v27 }
 0x593   : > { %v3073_v19 = vpack.c.bf16 %v3063_v47, %v3062_v1  ;;  %3304 = vmatmul.bf16.vlgmr.msra.gmra.mxu0 %v3186_v14  ;;  %3353 = vmatmul.bf16.vlgmr.msra.gmra.mxu1 %v3186_v14  ;;  %v2498_v14 = vmul.f32 %v7857_v41, %v7857_v41 }
 0x595   : > { %5592 = vmatmul.msk.bf16.gmra.mxu3 %vm3092_vm4, %v3073_v19 }
 0x597   : > { %v6465_v23 = vpop.eup %6464 }
 0x598   : > { %v2923_v7 = vmul.f32 %v6465_v23, %v8133_v57  ;;  %v2501_v23 = vmul.f32 %v7854_v46, %v7854_v46 }
 0x59a   : > { %v6361_v33 = vpack.i.bf16 %v2923_v7, %v2922_v10  ;;  %v2592_v7 = vmul.f32 %v7831_v59, %v7831_v59 }
 0x59c   : > { %6362 = vrot.lane.b32.xlu2 %v6361_v33, %s6541_s22 }
 0x5a3   : > { %v3135_v3 = vpop.f32.mrf.mxu3  ;;  %v6348_v20 = vpop.permute.xlu0 %6347 }
 0x5a4   : > { %2526 = vrot.lane.b32.xlu2 %v2492_v4, %s6541_s22  ;;  %v3136_v35 = vadd.f32 %v8329_v29, %v3135_v3  ;;  %v2504_v3 = vmul.f32 %v7924_v18, %v7924_v18 }
 0x5a6   : > { %v3172_v53 = vmax.f32 %v3136_v35, 0.0  ;;  %v6350_v35 = vunpack.i.h.bf16 %v6348_v20 }
 0x5ab   : > { %v3137_v8 = vpop.f32.mrf.mxu3  ;;  %v2523_v15 = vpop.permute.xlu0 %2522 }
 0x5ac   : > { %v3138_v57 = vadd.f32 %v8329_v29, %v3137_v8  ;;  %v2570_v25 = vadd.f32 %v2523_v15, %v2474_v36  ;;  %2532 = vrot.lane.b32.xlu2 %v2495_v55, %s6541_s22  ;;  %v2595_v55 = vmul.f32 %v7916_v37, %v7916_v37  ;;  %v6349_v15 = vunpack.i.l.bf16 %v6348_v20 }
 0x5ae   : > { %v3173_v34 = vmax.f32 %v3138_v57, 0.0  ;;  %v2602_v12 = vadd.f32 %v2586_v2, %v2570_v25 }
 0x5b0   : > { %2634 = vrot.lane.b32.xlu1 %v2602_v12, %s6542_s28  ;;  %v3187_v58 = vpack.c.bf16 %v3173_v34, %v3172_v53 }
 0x5b2   : > { %3309 = vmatmul.bf16.gmra.mxu0 %v3187_v58  ;;  %3358 = vmatmul.bf16.gmra.mxu1 %v3187_v58  ;;  %v2486_v58 = vsub.f32 -1.0, %v7956_v56 }
 0x5b3   : > { %v2529_v47 = vpop.permute.xlu0 %2528 }
 0x5b4   : > { %v2573_v1 = vadd.f32 %v2529_v47, %v2477_v31  ;;  %2538 = vrot.lane.b32.xlu2 %v2498_v14, %s6541_s22  ;;  %v2598_v31 = vmul.f32 %v8065_v9, %v8065_v9 }
 0x5b6   : > { %v2605_v19 = vadd.f32 %v2589_v48, %v2573_v1  ;;  %v2475_v1 = vsub.f32 -1.0, %v7778_v17 }
 0x5b8   : > { %2640 = vrot.lane.b32.xlu1 %v2605_v19, %s6542_s28  ;;  %v2489_v19 = vsub.f32 -1.0, %v7893_v22 }
 0x5bb   : > { %v2535_v10 = vpop.permute.xlu0 %2534 }
 0x5bc   : > { %v2576_v33 = vadd.f32 %v2535_v10, %v2480_v5  ;;  %2544 = vrot.lane.b32.xlu2 %v2501_v23, %s6541_s22  ;;  %v2587_v10 = vmul.f32 %v7793_v32, %v7793_v32  ;;  %v2478_v32 = vsub.f32 -1.0, %v7808_v43 }
 0x5be   : > { %v2608_v4 = vadd.f32 %v2592_v7, %v2576_v33  ;;  %v2601_v33 = vmul.f32 %v8092_v49, %v8092_v49  ;;  %v2590_v49 = vmul.f32 %v7834_v50, %v7834_v50  ;;  %v6228_v50 = vld [vmem:[%s9672_s14 + $0x1ec] sm:$0xf0] }
 0x5c0   : > { %2646 = vrot.lane.b32.xlu1 %v2608_v4, %s6542_s28 }
 0x5c3   : > { %v6353_v36 = vpop.permute.xlu1 %6352  ;;  %v2541_v8 = vpop.permute.xlu0 %2540 }
 0x5c4   : > { %v6355_v57 = vunpack.i.h.bf16 %v6353_v36  ;;  %v6354_v59 = vunpack.i.l.bf16 %v6353_v36  ;;  %v2579_v2 = vadd.f32 %v2541_v8, %v2483_v13  ;;  %2550 = vrot.lane.b32.xlu2 %v2504_v3, %s6541_s22 }
 0x5c6   : > { %v3064_v25 = vsel %vm2682_vm3, %v6349_v15, %v6354_v59  ;;  %v3065_v53 = vsel %vm2682_vm3, %v6350_v35, %v6355_v57  ;;  %v2611_v34 = vadd.f32 %v2595_v55, %v2579_v2 }
 0x5c7   : > { %v3074_v12 = vpack.c.bf16 %v3065_v53, %v3064_v25  ;;  %v5773_v25 = vld [vmem:[%s9672_s14 + $0xe0] sm:$0xf]  ;;  %v6196_v53 = vld [vmem:[%s9672_s14 + $0xec] sm:$0xf0] }
 0x5c8   : > { %2652 = vrot.lane.b32.xlu1 %v2611_v34, %s6542_s28  ;;  %v5901_v34 = vld [vmem:[%s9672_s14 + $0x1e0] sm:$0xf] }
 0x5c9   : > { %5593 = vmatmul.msk.bf16.gmra.mxu3 %vm3092_vm4, %v3074_v12  ;;  %v5774_v12 = vor.u32 %v6196_v53, %v5773_v25 }
 0x5cb   : > { %v8376_v37 = vpop.permute.xlu1 %6357  ;;  %v2547_v20 = vpop.permute.xlu0 %2546  ;;  %3836 = vmatpush.bf16.msrb.mxu2 %v5774_v12  ;;  %v6180_v12 = vld [vmem:[%s9672_s14 + $0x6c] sm:$0xf0] }
 0x5cc   : > { %v2582_v14 = vadd.f32 %v2547_v20, %v2486_v58  ;;  %v5902_v58 = vor.u32 %v6228_v50, %v5901_v34  ;;  %v2481_v20 = vsub.f32 -1.0, %v7840_v60  ;;  %v5709_v34 = vld [vmem:[%s9672_s14 + $0x60] sm:$0xf] }
 0x5cd   : > { %v5837_v50 = vld [vmem:[%s9672_s14 + $0x160] sm:$0xf] }
 0x5ce   : > { %v2614_v47 = vadd.f32 %v2598_v31, %v2582_v14  ;;  %v3140_v48 = vpop.f32.mrf.mxu3  ;;  %3885 = vmatpush.bf16.msrb.mxu3 %v5902_v58  ;;  %v5757_v31 = vld [vmem:[%s9672_s14 + $0xc0] sm:$0xf]  ;;  %v6192_v14 = vld [vmem:[%s9672_s14 + $0xcc] sm:$0xf0]  ;;  %v5710_v58 = vor.u32 %v6180_v12, %v5709_v34 }
 0x5cf   : > { %v3141_v9 = vadd.f32 %v8329_v29, %v3140_v48  ;;  %v5661_v34 = vld [vmem:[%s9672_s14] sm:$0xf]  ;;  %v6168_v12 = vld [vmem:[%s9672_s14 + $0xc] sm:$0xf0] }
 0x5d0   : > { %2658 = vrot.lane.b32.xlu1 %v2614_v47, %s6542_s28  ;;  %v5885_v47 = vld [vmem:[%s9672_s14 + $0x1c0] sm:$0xf] }
 0x5d1   : > { %v3174_v55 = vmax.f32 %v3141_v9, 0.0  ;;  %v5869_v9 = vld [vmem:[%s9672_s14 + $0x1a0] sm:$0xf] }
 0x5d3   : > { %v2525_v5 = vpop.permute.xlu1 %2524  ;;  %v2553_v23 = vpop.permute.xlu0 %2552 }
 0x5d4   : > { %v2571_v7 = vadd.f32 %v2525_v5, %v2475_v1  ;;  %v2585_v4 = vadd.f32 %v2553_v23, %v2489_v19  ;;  %v5758_v1 = vor.u32 %v6192_v14, %v5757_v31  ;;  %v6224_v19 = vld [vmem:[%s9672_s14 + $0x1cc] sm:$0xf0]  ;;  %v2593_v5 = vmul.f32 %v7873_v54, %v7873_v54  ;;  %v5693_v14 = vld [vmem:[%s9672_s14 + $0x40] sm:$0xf] }
 0x5d5   : > { %v6220_v54 = vld [vmem:[%s9672_s14 + $0x1ac] sm:$0xf0]  ;;  %v2487_v31 = vsub.f32 -1.0, %v7912_v30 }
 0x5d6   : > { %v2603_v13 = vadd.f32 %v2587_v10, %v2571_v7  ;;  %v2617_v3 = vadd.f32 %v2601_v33, %v2585_v4  ;;  %v3142_v35 = vpop.f32.mrf.mxu3  ;;  %v5886_v10 = vor.u32 %v6224_v19, %v5885_v47  ;;  %3837 = vmatpush.bf16.msrb.mxu2 %v5758_v1  ;;  %v5741_v33 = vld [vmem:[%s9672_s14 + $0xa0] sm:$0xf]  ;;  %v6188_v4 = vld [vmem:[%s9672_s14 + $0xac] sm:$0xf0] }
 0x5d7   : > { %v3143_v36 = vadd.f32 %v8329_v29, %v3142_v35  ;;  %v2484_v35 = vsub.f32 -1.0, %v7850_v62  ;;  %v6176_v47 = vld [vmem:[%s9672_s14 + $0x4c] sm:$0xf0] }
 0x5d8   : > { %2664 = vrot.lane.b32.xlu1 %v2617_v3, %s6542_s28  ;;  %2636 = vrot.lane.b32.xlu2 %v2603_v13, %s6542_s28  ;;  %v5742_v13 = vor.u32 %v6188_v4, %v5741_v33  ;;  %v5870_v3 = vor.u32 %v6220_v54, %v5869_v9  ;;  %v5694_v19 = vor.u32 %v6176_v47, %v5693_v14  ;;  %v6360_v4 = vunpack.i.h.bf16 %v8376_v37 }
 0x5d9   : > { %v3175_v8 = vmax.f32 %v3143_v36, 0.0  ;;  %3886 = vmatpush.bf16.msrb.mxu3 %v5886_v10  ;;  %v5725_v36 = vld [vmem:[%s9672_s14 + $0x80] sm:$0xf]  ;;  %v6359_v9 = vunpack.i.l.bf16 %v8376_v37  ;;  %v2476_v14 = vsub.f32 -1.0, %v7788_v26 }
 0x5da   : > { %3838 = vmatpush.bf16.msrb.mxu2 %v5742_v13 }
 0x5db   : > { %v2531_v15 = vpop.permute.xlu1 %2530  ;;  %v3188_v57 = vpack.c.bf16 %v3175_v8, %v3174_v55  ;;  %v6184_v55 = vld [vmem:[%s9672_s14 + $0x8c] sm:$0xf0]  ;;  %v5853_v8 = vld [vmem:[%s9672_s14 + $0x180] sm:$0xf] }
 0x5dc   : > { %v2574_v59 = vadd.f32 %v2531_v15, %v2478_v32  ;;  %v5726_v15 = vor.u32 %v6184_v55, %v5725_v36  ;;  %v5805_v36 = vld [vmem:[%s9672_s14 + $0x120] sm:$0xf] }
 0x5dd   : > { %3314 = vmatmul.bf16.gmra.mxu0 %v3188_v57  ;;  %3363 = vmatmul.bf16.gmra.mxu1 %v3188_v57  ;;  %v6216_v57 = vld [vmem:[%s9672_s14 + $0x18c] sm:$0xf0] }
 0x5de   : > { %v2606_v2 = vadd.f32 %v2590_v49, %v2574_v59  ;;  %3887 = vmatpush.bf16.msrb.mxu3 %v5870_v3  ;;  %v2596_v49 = vmul.f32 %v7863_v61, %v7863_v61  ;;  %3839 = vmatpush.bf16.msrb.mxu2 %v5726_v15  ;;  %v6212_v61 = vld [vmem:[%s9672_s14 + $0x16c] sm:$0xf0] }
 0x5df   : > { %v6204_v15 = vld [vmem:[%s9672_s14 + $0x12c] sm:$0xf0] }
 0x5e0   : > { %2642 = vrot.lane.b32.xlu2 %v2606_v2, %s6542_s28  ;;  %v5854_v2 = vor.u32 %v6216_v57, %v5853_v8  ;;  %v5806_v57 = vor.u32 %v6204_v15, %v5805_v36 }
 0x5e2   : > { %3888 = vmatpush.bf16.msrb.mxu3 %v5854_v2  ;;  %3840 = vmatpush.bf16.msrb.mxu2 %v5710_v58 }
 0x5e3   : > { %v2537_v48 = vpop.permute.xlu1 %2536 }
 0x5e4   : > { %v2577_v23 = vadd.f32 %v2537_v48, %v2481_v20  ;;  %v5838_v20 = vor.u32 %v6212_v61, %v5837_v50  ;;  %v5821_v48 = vld [vmem:[%s9672_s14 + $0x140] sm:$0xf]  ;;  %v5662_v61 = vor.u32 %v6168_v12, %v5661_v34  ;;  %v5903_v34 = vld [vmem:[%s9672_s14 + $0x1f0] sm:$0xf0] }
 0x5e5   : > { %v5789_v50 = vld [vmem:[%s9672_s14 + $0x100] sm:$0xf] }
 0x5e6   : > { %v2609_v7 = vadd.f32 %v2593_v5, %v2577_v23  ;;  %3889 = vmatpush.bf16.msrb.mxu3 %v5838_v20  ;;  %v6208_v5 = vld [vmem:[%s9672_s14 + $0x14c] sm:$0xf0]  ;;  %v2599_v23 = vmul.f32 %v8004_v44, %v8004_v44  ;;  %3841 = vmatpush.bf16.msrb.mxu2 %v5694_v19 }
 0x5e7   : > { %v6172_v44 = vld [vmem:[%s9672_s14 + $0x2c] sm:$0xf0] }
 0x5e8   : > { %2648 = vrot.lane.b32.xlu2 %v2609_v7, %s6542_s28  ;;  %v5822_v7 = vor.u32 %v6208_v5, %v5821_v48  ;;  %v6200_v20 = vld [vmem:[%s9672_s14 + $0x10c] sm:$0xf0] }
 0x5ea   : > { %3890 = vmatpush.bf16.msrb.mxu3 %v5822_v7 }
 0x5eb   : > { %v2543_v32 = vpop.permute.xlu1 %2542 }
 0x5ec   : > { %v2580_v59 = vadd.f32 %v2543_v32, %v2484_v35  ;;  %v5677_v35 = vld [vmem:[%s9672_s14 + $0x20] sm:$0xf] }
 0x5ed   : > { %v5678_v32 = vor.u32 %v6172_v44, %v5677_v35  ;;  %v2482_v44 = vsub.f32 -1.0, %v7857_v41 }
 0x5ee   : > { %v2612_v25 = vadd.f32 %v2596_v49, %v2580_v59  ;;  %v3145_v53 = vpop.f32.mrf.mxu3  ;;  %3891 = vmatpush.bf16.msrb.mxu3 %v5806_v57 }
 0x5ef   : > { %v3146_v33 = vadd.f32 %v8329_v29, %v3145_v53  ;;  %3842 = vmatpush.bf16.msrb.mxu2 %v5678_v32 }
 0x5f0   : > { %2654 = vrot.lane.b32.xlu2 %v2612_v25, %s6542_s28 }
 0x5f1   : > { %v3176_v49 = vmax.f32 %v3146_v33, 0.0 }
 0x5f3   : > { %v2549_v1 = vpop.permute.xlu1 %2548  ;;  %3843 = vmatpush.bf16.msrb.mxu2 %v5662_v61 }
 0x5f4   : > { %v2583_v10 = vadd.f32 %v2549_v1, %v2487_v31  ;;  %v5790_v31 = vor.u32 %v6200_v20, %v5789_v50  ;;  %v2588_v1 = vmul.f32 %v7803_v24, %v7803_v24 }
 0x5f6   : > { %v2615_v13 = vadd.f32 %v2599_v23, %v2583_v10  ;;  %v6363_v54 = vpop.permute.xlu2 %6362  ;;  %v3147_v3 = vpop.f32.mrf.mxu3  ;;  %3892 = vmatpush.bf16.msrb.mxu3 %v5790_v31  ;;  %v2479_v10 = vsub.f32 -1.0, %v7817_v40  ;;  %v9705_v31 = vld [vmem:[#allocation2_spill] sm:$0xff] }
 0x5f7   : > { %v6365_v55 = vunpack.i.h.bf16 %v6363_v54  ;;  %v6364_v8 = vunpack.i.l.bf16 %v6363_v54  ;;  %v3148_v37 = vadd.f32 %v8329_v29, %v3147_v3 }
 0x5f8   : > { %2660 = vrot.lane.b32.xlu2 %v2615_v13, %s6542_s28 }
 0x5f9   : > { %v3067_v59 = vsel %vm2682_vm3, %v6360_v4, %v6365_v55  ;;  %v3066_v2 = vsel %vm2682_vm3, %v6359_v9, %v6364_v8  ;;  %v3177_v25 = vmax.f32 %v3148_v37, 0.0  ;;  %v2591_v4 = vmul.f32 %v7827_v51, %v7827_v51  ;;  %v9704_v55 = vld [vmem:[#allocation3_spill] sm:$0xff]  ;;  %v3210_v51 = vld [vmem:[%s9671_s13] sm:$0x3] }
 0x5fa   : > { %v3075_v53 = vpack.c.bf16 %v3067_v59, %v3066_v2  ;;  %v2594_v8 = vmul.f32 %v9704_v55, %v9704_v55  ;;  %v5775_v59 = vld [vmem:[%s9672_s14 + $0xf0] sm:$0xf0]  ;;  %v6226_v2 = vld [vmem:[%s9672_s14 + $0x1e4] sm:$0xf]  ;;  %v8541_v12 = vperm.slane %v3210_v51, 1 }
 0x5fb   : > { %v3189_v58 = vpack.c.bf16 %v3177_v25, %v3176_v49  ;;  %v6194_v49 = vld [vmem:[%s9672_s14 + $0xe4] sm:$0xf]  ;;  %v8535_v25 = vperm.slane %v3210_v51, 0  ;;  %v5906_v50 = vor.u32 %v6226_v2, %v5903_v34 }
 0x5fc   : > { %5594 = vmatmul.msk.bf16.gmra.mxu3 %vm3092_vm4, %v3075_v53  ;;  %v5778_v53 = vor.u32 %v6194_v49, %v5775_v59  ;;  %v6222_v59 = vld [vmem:[%s9672_s14 + $0x1c4] sm:$0xf] }
 0x5fd   : > { %3319 = vmatmul.bf16.gmra.mxu0 %v3189_v58  ;;  %3368 = vmatmul.bf16.gmra.mxu1 %v3189_v58  ;;  %v2485_v58 = vsub.f32 -1.0, %v7854_v46 }
 0x5fe   : > { %v2527_v47 = vpop.permute.xlu2 %2526  ;;  %v3150_v48 = vpop.f32.mrf.mxu3  ;;  %3934 = vmatpush.bf16.msrb.mxu0 %v5778_v53  ;;  %3983 = vmatpush.bf16.msrb.mxu1 %v5906_v50 }
 0x5ff   : > { %v2572_v19 = vadd.f32 %v2527_v47, %v2476_v14  ;;  %v3151_v23 = vadd.f32 %v8329_v29, %v3150_v48  ;;  %v2597_v14 = vmul.f32 %v9705_v31, %v9705_v31 }
 0x601   : > { %v2604_v5 = vadd.f32 %v2588_v1, %v2572_v19  ;;  %v3178_v54 = vmax.f32 %v3151_v23, 0.0 }
 0x603   : > { %2638 = vrot.lane.b32.xlu0 %v2604_v5, %s6542_s28 }
 0x606   : > { %v2533_v7 = vpop.permute.xlu2 %2532  ;;  %v3152_v33 = vpop.f32.mrf.mxu3 }
 0x607   : > { %v2575_v9 = vadd.f32 %v2533_v7, %v2479_v10  ;;  %v3153_v13 = vadd.f32 %v8329_v29, %v3152_v33 }
 0x609   : > { %v2607_v3 = vadd.f32 %v2591_v4, %v2575_v9  ;;  %v3179_v35 = vmax.f32 %v3153_v13, 0.0 }
 0x60b   : > { %2644 = vrot.lane.b32.xlu0 %v2607_v3, %s6542_s28  ;;  %v3190_v24 = vpack.c.bf16 %v3179_v35, %v3178_v54  ;;  %v2488_v3 = vsub.f32 -1.0, %v7924_v18 }
 0x60d   : > { %3324 = vmatmul.bf16.gmra.mxu0 %v3190_v24  ;;  %3373 = vmatmul.bf16.gmra.mxu1 %v3190_v24 }
 0x60e   : > { %v2539_v36 = vpop.permute.xlu2 %2538 }
 0x60f   : > { %v2578_v37 = vadd.f32 %v2539_v36, %v2482_v44  ;;  %v6190_v44 = vld [vmem:[%s9672_s14 + $0xc4] sm:$0xf]  ;;  %v5759_v36 = vld [vmem:[%s9672_s14 + $0xd0] sm:$0xf0] }
 0x610   : > { %v3305_v32 = vpop.f32.mrf.mxu0  ;;  %v3354_v15 = vpop.f32.mrf.mxu1  ;;  %v5762_v51 = vor.u32 %v6190_v44, %v5759_v36 }
 0x611   : > { %v2610_v57 = vadd.f32 %v2594_v8, %v2578_v37  ;;  %v3306_v20 = vadd.f32 %v3305_v32, %v8535_v25  ;;  %v3355_v48 = vadd.f32 %v3354_v15, %v8541_v12  ;;  %v2600_v8 = vmul.f32 %v8082_v28, %v8082_v28  ;;  %v5887_v28 = vld [vmem:[%s9672_s14 + $0x1d0] sm:$0xf0] }
 0x612   : > { %3935 = vmatpush.bf16.msrb.mxu0 %v5762_v51  ;;  %v5890_v50 = vor.u32 %v6222_v59, %v5887_v28  ;;  %v6182_v28 = vld [vmem:[%s9672_s14 + $0x84] sm:$0xf] }
 0x613   : > { %2650 = vrot.lane.b32.xlu0 %v2610_v57, %s6542_s28  ;;  %v3394_v33 = vmax.f32 %v3306_v20, 0.0  ;;  %v3395_v9 = vmax.f32 %v3355_v48, 0.0  ;;  %v5743_v48 = vld [vmem:[%s9672_s14 + $0xb0] sm:$0xf0] }
 0x614   : > { %3984 = vmatpush.bf16.msrb.mxu1 %v5890_v50  ;;  %v5855_v50 = vld [vmem:[%s9672_s14 + $0x190] sm:$0xf0] }
 0x616   : > { %v2545_v61 = vpop.permute.xlu2 %2544 }
 0x617   : > { %v2581_v47 = vadd.f32 %v2545_v61, %v2485_v58 }
 0x618   : > { %v3155_v1 = vpop.f32.mrf.mxu3  ;;  %v3307_v19 = vpop.f32.mrf.mxu0 }
 0x619   : > { %v2613_v5 = vadd.f32 %v2597_v14, %v2581_v47  ;;  %v3308_v23 = vadd.f32 %v3307_v19, %v8535_v25  ;;  %v3356_v10 = vpop.f32.mrf.mxu1  ;;  %v3156_v55 = vadd.f32 %v8329_v29, %v3155_v1  ;;  %v6186_v47 = vld [vmem:[%s9672_s14 + $0xa4] sm:$0xf] }
 0x61a   : > { %v3357_v7 = vadd.f32 %v3356_v10, %v8541_v12  ;;  %v5746_v1 = vor.u32 %v6186_v47, %v5743_v48  ;;  %v6178_v48 = vld [vmem:[%s9672_s14 + $0x64] sm:$0xf] }
 0x61b   : > { %v3396_v4 = vmax.f32 %v3308_v23, 0.0  ;;  %2656 = vrot.lane.b32.xlu0 %v2613_v5, %s6542_s28  ;;  %v3180_v2 = vmax.f32 %v3156_v55, 0.0 }
 0x61c   : > { %v3397_v13 = vmax.f32 %v3357_v7, 0.0  ;;  %3936 = vmatpush.bf16.msrb.mxu0 %v5746_v1  ;;  %v5711_v1 = vld [vmem:[%s9672_s14 + $0x70] sm:$0xf0] }
 0x61d   : > { %v8551_v54 = vpack.c.bf16 %v3396_v4, %v3394_v33  ;;  %v6218_v4 = vld [vmem:[%s9672_s14 + $0x1a4] sm:$0xf] }
 0x61e   : > { %v8554_v35 = vpack.c.bf16 %v3397_v13, %v3395_v9  ;;  %v2551_v24 = vpop.permute.xlu2 %2550  ;;  %v5871_v9 = vld [vmem:[%s9672_s14 + $0x1b0] sm:$0xf0] }
 0x61f   : > { %v2584_v37 = vadd.f32 %v2551_v24, %v2488_v3  ;;  %3844 = vmatmul.bf16.vlgmr.msrb.gmra.mxu2 %v8551_v54  ;;  %v5874_v24 = vor.u32 %v6218_v4, %v5871_v9 }
 0x620   : > { %3893 = vmatmul.bf16.vlgmr.msrb.gmra.mxu3 %v8554_v35  ;;  %v3157_v32 = vpop.f32.mrf.mxu3 }
 0x621   : > { %v2616_v15 = vadd.f32 %v2600_v8, %v2584_v37  ;;  %v3158_v57 = vadd.f32 %v8329_v29, %v3157_v32  ;;  %3985 = vmatpush.bf16.msrb.mxu1 %v5874_v24 }
 0x622   : > { %v2635_v49 = vpop.permute.xlu1 %2634 }
 0x623   : > { %v3181_v53 = vmax.f32 %v3158_v57, 0.0  ;;  %2662 = vrot.lane.b32.xlu0 %v2616_v15, %s6542_s28  ;;  %v2683_v34 = vsel %vm2682_vm3, %v2635_v49, 0.0  ;;  %s6544_s28 = smov 80  }
 0x624   : > { %2684 = vadd.xlane.f32.xlu2 %v2683_v34 }
 0x625   : > { %v3191_v58 = vpack.c.bf16 %v3181_v53, %v3180_v2  ;;  %v5727_v2 = vld [vmem:[%s9672_s14 + $0x90] sm:$0xf0]  ;;  %v6214_v53 = vld [vmem:[%s9672_s14 + $0x184] sm:$0xf] }
 0x626   : > { %v5730_v34 = vor.u32 %v6182_v28, %v5727_v2 }
 0x627   : > { %3329 = vmatmul.bf16.gmra.mxu0 %v3191_v58  ;;  %3378 = vmatmul.bf16.gmra.mxu1 %v3191_v58  ;;  %v5858_v58 = vor.u32 %v6214_v53, %v5855_v50  ;;  %v9706_v53 = vld [vmem:[#allocation11_spill] sm:$0xff] }
 0x628   : > { %3937 = vmatpush.bf16.msrb.mxu0 %v5730_v34 }
 0x629   : > { %3986 = vmatpush.bf16.msrb.mxu1 %v5858_v58 }
 0x62a   : > { %v2641_v61 = vpop.permute.xlu1 %2640 }
 0x62b   : > { %v2692_v20 = vsel %vm2682_vm3, %v2641_v61, 0.0 }
 0x62c   : > { %2693 = vadd.xlane.f32.xlu2 %v2692_v20 }
 0x62f   : > { %v3310_v31 = vpop.f32.mrf.mxu0  ;;  %v3359_v14 = vpop.f32.mrf.mxu1 }
 0x630   : > { %v3311_v23 = vadd.f32 %v3310_v31, %v8535_v25  ;;  %v3360_v10 = vadd.f32 %v3359_v14, %v8541_v12 }
 0x632   : > { %v2647_v19 = vpop.permute.xlu1 %2646  ;;  %v3398_v44 = vmax.f32 %v3311_v23, 0.0  ;;  %v3399_v36 = vmax.f32 %v3360_v10, 0.0  ;;  %v2637_v57 = vpop.permute.xlu2 %2636  ;;  %v5839_v23 = vld [vmem:[%s9672_s14 + $0x170] sm:$0xf0] }
 0x633   : > { %v2701_v5 = vsel %vm2682_vm3, %v2647_v19, 0.0  ;;  %v2686_v47 = vsel %vm2682_vm3, %v2637_v57, 0.0  ;;  %v6210_v19 = vld [vmem:[%s9672_s14 + $0x164] sm:$0xf] }
 0x634   : > { %2702 = vadd.xlane.f32.xlu2 %v2701_v5  ;;  %v5714_v5 = vor.u32 %v6178_v48, %v5711_v1  ;;  %v5842_v10 = vor.u32 %v6210_v19, %v5839_v23  ;;  %v5695_v48 = vld [vmem:[%s9672_s14 + $0x50] sm:$0xf0]  ;;  %v6206_v1 = vld [vmem:[%s9672_s14 + $0x144] sm:$0xf] }
 0x636   : > { %3938 = vmatpush.bf16.msrb.mxu0 %v5714_v5  ;;  %3987 = vmatpush.bf16.msrb.mxu1 %v5842_v10  ;;  %v5823_v5 = vld [vmem:[%s9672_s14 + $0x150] sm:$0xf0] }
 0x637   : > { %v3312_v7 = vpop.f32.mrf.mxu0  ;;  %v3361_v33 = vpop.f32.mrf.mxu1  ;;  %v5826_v10 = vor.u32 %v6206_v1, %v5823_v5 }
 0x638   : > { %v3313_v13 = vadd.f32 %v3312_v7, %v8535_v25  ;;  %v3362_v3 = vadd.f32 %v3361_v33, %v8541_v12 }
 0x63a   : > { %v3400_v55 = vmax.f32 %v3313_v13, 0.0  ;;  %v3401_v8 = vmax.f32 %v3362_v3, 0.0  ;;  %v2653_v37 = vpop.permute.xlu1 %2652  ;;  %v2643_v20 = vpop.permute.xlu2 %2642  ;;  %3988 = vmatpush.bf16.msrb.mxu1 %v5826_v10 }
 0x63b   : > { %v2710_v51 = vsel %vm2682_vm3, %v2653_v37, 0.0  ;;  %v2695_v4 = vsel %vm2682_vm3, %v2643_v20, 0.0 }
 0x63c   : > { %v8595_v32 = vpack.c.bf16 %v3400_v55, %v3398_v44  ;;  %v8597_v15 = vpack.c.bf16 %v3401_v8, %v3399_v36  ;;  %2711 = vadd.xlane.f32.xlu2 %v2710_v51 }
 0x63e   : > { %3849 = vmatmul.bf16.gmra.mxu2 %v8595_v32  ;;  %3898 = vmatmul.bf16.gmra.mxu3 %v8597_v15 }
 0x642   : > { %v2659_v49 = vpop.permute.xlu1 %2658  ;;  %v2649_v9 = vpop.permute.xlu2 %2648 }
 0x643   : > { %v2719_v59 = vsel %vm2682_vm3, %v2659_v49, 0.0  ;;  %v2704_v8 = vsel %vm2682_vm3, %v2649_v9, 0.0  ;;  %v6170_v9 = vld [vmem:[%s9672_s14 + $0x24] sm:$0xf] }
 0x644   : > { %2720 = vadd.xlane.f32.xlu2 %v2719_v59 }
 0x64a   : > { %v2665_v61 = vpop.permute.xlu1 %2664  ;;  %v2655_v37 = vpop.permute.xlu2 %2654 }
 0x64b   : > { %v2728_v31 = vsel %vm2682_vm3, %v2665_v61, 0.0  ;;  %v2713_v34 = vsel %vm2682_vm3, %v2655_v37, 0.0  ;;  %v6198_v37 = vld [vmem:[%s9672_s14 + $0x104] sm:$0xf] }
 0x64c   : > { %2729 = vadd.xlane.f32.xlu2 %v2728_v31  ;;  %v3160_v14 = vpop.f32.mrf.mxu3 }
 0x64d   : > { %2687 = vadd.xlane.f32.xlu0 %v2686_v47  ;;  %v3161_v7 = vadd.f32 %v8329_v29, %v3160_v14  ;;  %v6174_v47 = vld [vmem:[%s9672_s14 + $0x44] sm:$0xf] }
 0x64e   : > { %v5698_v19 = vor.u32 %v6174_v47, %v5695_v48 }
 0x64f   : > { %v3182_v3 = vmax.f32 %v3161_v7, 0.0  ;;  %v9707_v7 = vld [vmem:[#allocation9_spill] sm:$0xff] }
 0x650   : > { %3939 = vmatpush.bf16.msrb.mxu0 %v5698_v19 }
 0x652   : > { %v2661_v23 = vpop.permute.xlu2 %2660 }
 0x654   : > { %v3162_v33 = vpop.f32.mrf.mxu3 }
 0x655   : > { %v3163_v13 = vadd.f32 %v8329_v29, %v3162_v33  ;;  %2696 = vadd.xlane.f32.xlu0 %v2695_v4  ;;  %v2722_v33 = vsel %vm2682_vm3, %v2661_v23, 0.0 }
 0x657   : > { %v3183_v24 = vmax.f32 %v3163_v13, 0.0  ;;  %v5679_v13 = vld [vmem:[%s9672_s14 + $0x30] sm:$0xf0] }
 0x659   : > { %v3192_v44 = vpack.c.bf16 %v3183_v24, %v3182_v3  ;;  %v6202_v3 = vld [vmem:[%s9672_s14 + $0x124] sm:$0xf] }
 0x65a   : > { %v3315_v36 = vpop.f32.mrf.mxu0  ;;  %v3364_v55 = vpop.f32.mrf.mxu1 }
 0x65b   : > { %3334 = vmatmul.bf16.gmra.mxu0 %v3192_v44  ;;  %3383 = vmatmul.bf16.gmra.mxu1 %v3192_v44  ;;  %v3316_v51 = vadd.f32 %v3315_v36, %v8535_v25  ;;  %v3365_v57 = vadd.f32 %v3364_v55, %v8541_v12  ;;  %v5682_v44 = vor.u32 %v6170_v9, %v5679_v13  ;;  %v6166_v55 = vld [vmem:[%s9672_s14 + $0x4] sm:$0xf] }
 0x65d   : > { %2705 = vadd.xlane.f32.xlu0 %v2704_v8  ;;  %v3402_v50 = vmax.f32 %v3316_v51, 0.0  ;;  %v3403_v58 = vmax.f32 %v3365_v57, 0.0  ;;  %3940 = vmatpush.bf16.msrb.mxu0 %v5682_v44  ;;  %v5663_v8 = vld [vmem:[%s9672_s14 + $0x10] sm:$0xf0] }
 0x662   : > { %v3317_v49 = vpop.f32.mrf.mxu0  ;;  %v3366_v59 = vpop.f32.mrf.mxu1 }
 0x663   : > { %v3318_v28 = vadd.f32 %v3317_v49, %v8535_v25  ;;  %v3367_v2 = vadd.f32 %v3366_v59, %v8541_v12  ;;  %v5666_v49 = vor.u32 %v6166_v55, %v5663_v8  ;;  %v5791_v59 = vld [vmem:[%s9672_s14 + $0x110] sm:$0xf0] }
 0x664   : > { %4880 = vrot.lane.b32.xlu2 %v9706_v53, %s6543_s2 }
 0x665   : > { %v3404_v61 = vmax.f32 %v3318_v28, 0.0  ;;  %v3405_v20 = vmax.f32 %v3367_v2, 0.0  ;;  %2714 = vadd.xlane.f32.xlu0 %v2713_v34  ;;  %v5794_v28 = vor.u32 %v6198_v37, %v5791_v59  ;;  %3941 = vmatpush.bf16.msrb.mxu0 %v5666_v49  ;;  %v5781_v49 = vld [vmem:[%s9672_s14 + $0xe8] sm:$0xf] }
 0x666   : > { %v5909_v59 = vld [vmem:[%s9672_s14 + $0x1e8] sm:$0xf] }
 0x667   : > { %v8639_v31 = vpack.c.bf16 %v3404_v61, %v3402_v50  ;;  %v8641_v14 = vpack.c.bf16 %v3405_v20, %v3403_v58  ;;  %v9708_v61 = vld [vmem:[#allocation7_spill] sm:$0xff] }
 0x669   : > { %3854 = vmatmul.bf16.gmra.mxu2 %v8639_v31  ;;  %3903 = vmatmul.bf16.gmra.mxu3 %v8641_v14 }
 0x66c   : > { %4888 = vrot.lane.b32.xlu2 %v9707_v7, %s6543_s2 }
 0x66d   : > { %2723 = vadd.xlane.f32.xlu0 %v2722_v33 }
 0x674   : > { %4894 = vrot.lane.b32.xlu2 %v8072_v42, %s6543_s2  ;;  %v5807_v42 = vld [vmem:[%s9672_s14 + $0x130] sm:$0xf0] }
 0x675   : > { %v2639_v4 = vpop.permute.xlu0 %2638  ;;  %v5810_v36 = vor.u32 %v6202_v3, %v5807_v42 }
 0x676   : > { %v2689_v24 = vsel %vm2682_vm3, %v2639_v4, 0.0 }
 0x677   : > { %2690 = vadd.xlane.f32.xlu1 %v2689_v24  ;;  %3989 = vmatpush.bf16.msrb.mxu1 %v5810_v36  ;;  %v9709_v24 = vld [vmem:[#allocation10_spill] sm:$0xff] }
 0x67a   : > { %v3320_v51 = vpop.f32.mrf.mxu0  ;;  %v3369_v57 = vpop.f32.mrf.mxu1 }
 0x67b   : > { %3990 = vmatpush.bf16.msrb.mxu1 %v5794_v28  ;;  %v3321_v50 = vadd.f32 %v3320_v51, %v8535_v25  ;;  %v3370_v58 = vadd.f32 %v3369_v57, %v8541_v12  ;;  %v9710_v57 = vld [vmem:[#allocation5_spill] sm:$0xff] }
 0x67c   : > { %4900 = vrot.lane.b32.xlu2 %v8155_v45, %s6543_s2 }
 0x67d   : > { %v2645_v2 = vpop.permute.xlu0 %2644  ;;  %v3406_v1 = vmax.f32 %v3321_v50, 0.0  ;;  %v3407_v19 = vmax.f32 %v3370_v58, 0.0  ;;  %v6195_v50 = vld [vmem:[%s9672_s14 + $0xec] sm:$0xf]  ;;  %v5783_v58 = vld [vmem:[%s9672_s14 + $0xf8] sm:$0xf0] }
 0x67e   : > { %v2698_v53 = vsel %vm2682_vm3, %v2645_v2, 0.0 }
 0x67f   : > { %2699 = vadd.xlane.f32.xlu1 %v2698_v53  ;;  %v3165_v34 = vpop.f32.mrf.mxu3 }
 0x680   : > { %v3166_v7 = vadd.f32 %v8329_v29, %v3165_v34  ;;  %v6229_v34 = vld [vmem:[%s9672_s14 + $0x1f4] sm:$0xf0] }
 0x681   : > { %4876 = vrot.lane.b32.xlu0 %v9708_v61, %s6543_s2 }
 0x682   : > { %v3322_v20 = vpop.f32.mrf.mxu0  ;;  %v3371_v47 = vpop.f32.mrf.mxu1 }
 0x683   : > { %v3323_v48 = vadd.f32 %v3322_v20, %v8535_v25  ;;  %v3372_v45 = vadd.f32 %v3371_v47, %v8541_v12  ;;  %v5910_v47 = vor.u32 %v6229_v34, %v5909_v59  ;;  %v5767_v59 = vld [vmem:[%s9672_s14 + $0xd8] sm:$0xf0] }
 0x684   : > { %4906 = vrot.lane.b32.xlu2 %v8204_v21, %s6543_s2  ;;  %v3184_v21 = vmax.f32 %v3166_v7, 0.0 }
 0x685   : > { %v3408_v5 = vmax.f32 %v3323_v48, 0.0  ;;  %v3409_v23 = vmax.f32 %v3372_v45, 0.0  ;;  %v2651_v10 = vpop.permute.xlu0 %2650  ;;  %v5786_v48 = vor.u32 %v6195_v50, %v5783_v58  ;;  %v6227_v45 = vld [vmem:[%s9672_s14 + $0x1ec] sm:$0xf]  ;;  %4081 = vmatpush.bf16.msra.mxu3 %v5910_v47 }
 0x686   : > { %v2707_v33 = vsel %vm2682_vm3, %v2651_v10, 0.0 }
 0x687   : > { %v8700_v4 = vpack.c.bf16 %v3408_v5, %v3406_v1  ;;  %v8702_v9 = vpack.c.bf16 %v3409_v23, %v3407_v19  ;;  %2708 = vadd.xlane.f32.xlu1 %v2707_v33  ;;  %v3167_v13 = vpop.f32.mrf.mxu3  ;;  %v5911_v1 = vld [vmem:[%s9672_s14 + $0x1f8] sm:$0xf0]  ;;  %4130 = vmatpush.bf16.msra.mxu0 %v5786_v48  ;;  %v6189_v48 = vld [vmem:[%s9672_s14 + $0xb4] sm:$0xf0] }
 0x688   : > { %v3168_v3 = vadd.f32 %v8329_v29, %v3167_v13  ;;  %v5914_v19 = vor.u32 %v6227_v45, %v5911_v1 }
 0x689   : > { %4882 = vrot.lane.b32.xlu0 %v9709_v24, %s6543_s2  ;;  %3859 = vmatmul.bf16.gmra.mxu2 %v8700_v4 }
 0x68a   : > { %v3185_v44 = vmax.f32 %v3168_v3, 0.0  ;;  %3908 = vmatmul.bf16.gmra.mxu3 %v8702_v9  ;;  %v3325_v42 = vpop.f32.mrf.mxu0  ;;  %v3374_v36 = vpop.f32.mrf.mxu1  ;;  %4179 = vmatpush.bf16.msra.mxu1 %v5914_v19 }
 0x68b   : > { %v3326_v37 = vadd.f32 %v3325_v42, %v8535_v25  ;;  %v3375_v51 = vadd.f32 %v3374_v36, %v8541_v12 }
 0x68c   : > { %4961 = vrot.lane.b32.xlu2 %v7788_v26, %s6544_s28  ;;  %v3193_v55 = vpack.c.bf16 %v3185_v44, %v3184_v21  ;;  %v6197_v26 = vld [vmem:[%s9672_s14 + $0xf4] sm:$0xf0]  ;;  %v5893_v44 = vld [vmem:[%s9672_s14 + $0x1c8] sm:$0xf] }
 0x68d   : > { %v2657_v8 = vpop.permute.xlu0 %2656  ;;  %v5782_v53 = vor.u32 %v6197_v26, %v5781_v49  ;;  %v3410_v5 = vmax.f32 %v3326_v37, 0.0  ;;  %v3411_v23 = vmax.f32 %v3375_v51, 0.0  ;;  %v6193_v21 = vld [vmem:[%s9672_s14 + $0xd4] sm:$0xf0]  ;;  %v6191_v26 = vld [vmem:[%s9672_s14 + $0xcc] sm:$0xf] }
 0x68e   : > { %3339 = vmatmul.bf16.gmra.mxu0 %v3193_v55  ;;  %3388 = vmatmul.bf16.gmra.mxu1 %v3193_v55  ;;  %v2716_v29 = vsel %vm2682_vm3, %v2657_v8, 0.0  ;;  %v8770_v55 = vld [vmem:[%s9673_s15] sm:$0xf] }
 0x68f   : > { %2717 = vadd.xlane.f32.xlu1 %v2716_v29  ;;  %4032 = vmatpush.bf16.msra.mxu2 %v5782_v53  ;;  %v8775_v8 = vperm.slane %v8770_v55, 0 }
 0x691   : > { %4886 = vrot.lane.b32.xlu0 %v9710_v57, %s6543_s2 }
 0x692   : > { %v3327_v28 = vpop.f32.mrf.mxu0  ;;  %v3376_v2 = vpop.f32.mrf.mxu1 }
 0x693   : > { %v3328_v61 = vadd.f32 %v3327_v28, %v8535_v25  ;;  %v3377_v20 = vadd.f32 %v3376_v2, %v8541_v12  ;;  %v5770_v28 = vor.u32 %v6191_v26, %v5767_v59  ;;  %v6217_v59 = vld [vmem:[%s9672_s14 + $0x194] sm:$0xf0] }
 0x694   : > { %4967 = vrot.lane.b32.xlu2 %v7817_v40, %s6544_s28  ;;  %v5765_v40 = vld [vmem:[%s9672_s14 + $0xc8] sm:$0xf] }
 0x695   : > { %v3412_v10 = vmax.f32 %v3328_v61, 0.0  ;;  %v3413_v7 = vmax.f32 %v3377_v20, 0.0  ;;  %v2663_v33 = vpop.permute.xlu0 %2662  ;;  %v5766_v42 = vor.u32 %v6193_v21, %v5765_v40  ;;  %4131 = vmatpush.bf16.msra.mxu0 %v5770_v28  ;;  %v6187_v40 = vld [vmem:[%s9672_s14 + $0xac] sm:$0xf]  ;;  %v5751_v21 = vld [vmem:[%s9672_s14 + $0xb8] sm:$0xf0] }
 0x696   : > { %v2725_v13 = vsel %vm2682_vm3, %v2663_v33, 0.0 }
 0x697   : > { %v8745_v3 = vpack.c.bf16 %v3412_v10, %v3410_v5  ;;  %v8747_v24 = vpack.c.bf16 %v3413_v7, %v3411_v23  ;;  %2726 = vadd.xlane.f32.xlu1 %v2725_v13  ;;  %4033 = vmatpush.bf16.msra.mxu2 %v5766_v42  ;;  %v6221_v23 = vld [vmem:[%s9672_s14 + $0x1b4] sm:$0xf0]  ;;  %v9711_v10 = vld [vmem:[#allocation6_spill] sm:$0xff]  ;;  %v5754_v42 = vor.u32 %v6187_v40, %v5751_v21  ;;  %v5829_v21 = vld [vmem:[%s9672_s14 + $0x148] sm:$0xf] }
 0x698   : > { %v6177_v40 = vld [vmem:[%s9672_s14 + $0x54] sm:$0xf0] }
 0x699   : > { %4892 = vrot.lane.b32.xlu0 %v8075_v38, %s6543_s2  ;;  %3864 = vmatmul.bf16.gmra.mxu2 %v8745_v3  ;;  %v6225_v38 = vld [vmem:[%s9672_s14 + $0x1d4] sm:$0xf0] }
 0x69a   : > { %3913 = vmatmul.bf16.gmra.mxu3 %v8747_v24  ;;  %v5894_v36 = vor.u32 %v6225_v38, %v5893_v44  ;;  %v6219_v44 = vld [vmem:[%s9672_s14 + $0x1ac] sm:$0xf]  ;;  %v5879_v38 = vld [vmem:[%s9672_s14 + $0x1b8] sm:$0xf0]  ;;  %4132 = vmatpush.bf16.msra.mxu0 %v5754_v42 }
 0x69c   : > { %4973 = vrot.lane.b32.xlu2 %v7857_v41, %s6544_s28  ;;  %4082 = vmatpush.bf16.msra.mxu3 %v5894_v36  ;;  %v9712_v36 = vld [vmem:[#allocation4_spill] sm:$0xff] }
 0x69e   : > { %3942 = vmatmul.bf16.vlgmr.msrb.gmra.mxu0 %v8551_v54  ;;  %3991 = vmatmul.bf16.vlgmr.msrb.gmra.mxu1 %v8554_v35 }
 0x6a1   : > { %4898 = vrot.lane.b32.xlu0 %v8146_v6, %s6543_s2  ;;  %v6223_v6 = vld [vmem:[%s9672_s14 + $0x1cc] sm:$0xf] }
 0x6a2   : > { %v3845_v29 = vpop.f32.mrf.mxu2 }
 0x6a3   : > { %v3846_v41 = vadd.f32 %v3845_v29, %v8775_v8  ;;  %v3894_v37 = vpop.f32.mrf.mxu3 }
 0x6a4   : > { %4979 = vrot.lane.b32.xlu2 %v7854_v46, %s6544_s28  ;;  %v3330_v51 = vpop.f32.mrf.mxu0  ;;  %v3379_v57 = vpop.f32.mrf.mxu1  ;;  %v5895_v46 = vld [vmem:[%s9672_s14 + $0x1d8] sm:$0xf0] }
 0x6a5   : > { %v8782_v49 = vadd.f32 %v3894_v37, %v3846_v41  ;;  %v5898_v2 = vor.u32 %v6223_v6, %v5895_v46  ;;  %v3331_v53 = vadd.f32 %v3330_v51, %v8535_v25  ;;  %v3380_v34 = vadd.f32 %v3379_v57, %v8541_v12  ;;  %v5733_v37 = vld [vmem:[%s9672_s14 + $0x88] sm:$0xf]  ;;  %v6185_v51 = vld [vmem:[%s9672_s14 + $0x94] sm:$0xf0]  ;;  %v9713_v6 = vld [vmem:[#allocation8_spill] sm:$0xff] }
 0x6a6   : > { %v5861_v57 = vld [vmem:[%s9672_s14 + $0x188] sm:$0xf]  ;;  %v5734_v26 = vor.u32 %v6185_v51, %v5733_v37  ;;  %v6175_v37 = vld [vmem:[%s9672_s14 + $0x4c] sm:$0xf]  ;;  %v5703_v51 = vld [vmem:[%s9672_s14 + $0x58] sm:$0xf0] }
 0x6a7   : > { %4180 = vmatpush.bf16.msra.mxu1 %v5898_v2  ;;  %v3414_v61 = vmax.f32 %v3331_v53, 0.0  ;;  %v3415_v45 = vmax.f32 %v3380_v34, 0.0  ;;  %v6183_v34 = vld [vmem:[%s9672_s14 + $0x8c] sm:$0xf] }
 0x6a9   : > { %4904 = vrot.lane.b32.xlu0 %v8216_v0, %s6543_s2  ;;  %v5749_v0 = vld [vmem:[%s9672_s14 + $0xa8] sm:$0xf] }
 0x6aa   : > { %v5750_v5 = vor.u32 %v6189_v48, %v5749_v0  ;;  %v8842_v29 = vpop.f32.mrf.mxu2  ;;  %v6181_v0 = vld [vmem:[%s9672_s14 + $0x74] sm:$0xf0] }
 0x6ab   : > { %v8846_v41 = vpop.f32.mrf.mxu3 }
 0x6ac   : > { %4985 = vrot.lane.b32.xlu2 %v7924_v18, %s6544_s28  ;;  %v3332_v50 = vpop.f32.mrf.mxu0  ;;  %v3381_v58 = vpop.f32.mrf.mxu1  ;;  %v5877_v18 = vld [vmem:[%s9672_s14 + $0x1a8] sm:$0xf]  ;;  %4034 = vmatpush.bf16.msra.mxu2 %v5750_v5  ;;  %v6211_v5 = vld [vmem:[%s9672_s14 + $0x16c] sm:$0xf] }
 0x6ad   : > { %v3333_v20 = vadd.f32 %v3332_v50, %v8535_v25  ;;  %v3382_v47 = vadd.f32 %v3381_v58, %v8541_v12  ;;  %v5878_v7 = vor.u32 %v6221_v23, %v5877_v18  ;;  %v5735_v50 = vld [vmem:[%s9672_s14 + $0x98] sm:$0xf0] }
 0x6ae   : > { %3947 = vmatmul.bf16.gmra.mxu0 %v8595_v32  ;;  %3996 = vmatmul.bf16.gmra.mxu1 %v8597_v15  ;;  %v5738_v58 = vor.u32 %v6183_v34, %v5735_v50  ;;  %v5847_v23 = vld [vmem:[%s9672_s14 + $0x178] sm:$0xf0] }
 0x6af   : > { %v3416_v1 = vmax.f32 %v3333_v20, 0.0  ;;  %v3417_v19 = vmax.f32 %v3382_v47, 0.0  ;;  %4083 = vmatpush.bf16.msra.mxu3 %v5878_v7  ;;  %v5717_v47 = vld [vmem:[%s9672_s14 + $0x68] sm:$0xf] }
 0x6b0   : > { %4878 = vrot.lane.b32.xlu1 %v9711_v10, %s6543_s2  ;;  %4035 = vmatpush.bf16.msra.mxu2 %v5734_v26  ;;  %v5718_v48 = vor.u32 %v6181_v0, %v5717_v47  ;;  %v5850_v10 = vor.u32 %v6211_v5, %v5847_v23  ;;  %v5701_v7 = vld [vmem:[%s9672_s14 + $0x48] sm:$0xf]  ;;  %v6173_v0 = vld [vmem:[%s9672_s14 + $0x34] sm:$0xf0]  ;;  %v5815_v23 = vld [vmem:[%s9672_s14 + $0x138] sm:$0xf0] }
 0x6b1   : > { %v8820_v33 = vpack.c.bf16 %v3416_v1, %v3414_v61  ;;  %v8822_v13 = vpack.c.bf16 %v3417_v19, %v3415_v45  ;;  %4959 = vrot.lane.b32.xlu0 %v7778_v17, %s6544_s28  ;;  %v5882_v17 = vor.u32 %v6219_v44, %v5879_v38  ;;  %v6215_v61 = vld [vmem:[%s9672_s14 + $0x18c] sm:$0xf]  ;;  %4133 = vmatpush.bf16.msra.mxu0 %v5738_v58  ;;  %v6209_v44 = vld [vmem:[%s9672_s14 + $0x154] sm:$0xf0]  ;;  %v5685_v47 = vld [vmem:[%s9672_s14 + $0x28] sm:$0xf] }
 0x6b2   : > { %v6179_v45 = vld [vmem:[%s9672_s14 + $0x6c] sm:$0xf]  ;;  %v5830_v42 = vor.u32 %v6209_v44, %v5829_v21  ;;  %v6201_v21 = vld [vmem:[%s9672_s14 + $0x114] sm:$0xf0] }
 0x6b3   : > { %3869 = vmatmul.bf16.gmra.mxu2 %v8820_v33  ;;  %3918 = vmatmul.bf16.gmra.mxu3 %v8822_v13  ;;  %v6167_v44 = vld [vmem:[%s9672_s14 + $0xc] sm:$0xf] }
 0x6b4   : > { %4181 = vmatpush.bf16.msra.mxu1 %v5882_v17  ;;  %4036 = vmatpush.bf16.msra.mxu2 %v5718_v48  ;;  %v5686_v48 = vor.u32 %v6173_v0, %v5685_v47 }
 0x6b8   : > { %4884 = vrot.lane.b32.xlu1 %v9712_v36, %s6543_s2 }
 0x6b9   : > { %4965 = vrot.lane.b32.xlu0 %v7808_v43, %s6544_s28  ;;  %v5862_v43 = vor.u32 %v6217_v59, %v5861_v57  ;;  %v5706_v59 = vor.u32 %v6175_v37, %v5703_v51  ;;  %v6199_v37 = vld [vmem:[%s9672_s14 + $0x10c] sm:$0xf]  ;;  %v5799_v51 = vld [vmem:[%s9672_s14 + $0x118] sm:$0xf0] }
 0x6bb   : > { %4084 = vmatpush.bf16.msra.mxu3 %v5862_v43 }
 0x6be   : > { %3952 = vmatmul.bf16.gmra.mxu0 %v8639_v31  ;;  %4001 = vmatmul.bf16.gmra.mxu1 %v8641_v14 }
 0x6c0   : > { %4890 = vrot.lane.b32.xlu1 %v9713_v6, %s6543_s2 }
 0x6c1   : > { %v3850_v28 = vpop.f32.mrf.mxu2  ;;  %4971 = vrot.lane.b32.xlu0 %v7840_v60, %s6544_s28  ;;  %v3899_v2 = vpop.f32.mrf.mxu3  ;;  %v5863_v60 = vld [vmem:[%s9672_s14 + $0x198] sm:$0xf0] }
 0x6c2   : > { %v3851_v46 = vadd.f32 %v3850_v28, %v8775_v8  ;;  %v5866_v20 = vor.u32 %v6215_v61, %v5863_v60 }
 0x6c4   : > { %v8867_v53 = vadd.f32 %v3899_v2, %v3851_v46  ;;  %4182 = vmatpush.bf16.msra.mxu1 %v5866_v20  ;;  %v5831_v46 = vld [vmem:[%s9672_s14 + $0x158] sm:$0xf0] }
 0x6c8   : > { %4896 = vrot.lane.b32.xlu1 %v8150_v63, %s6543_s2  ;;  %v5845_v63 = vld [vmem:[%s9672_s14 + $0x168] sm:$0xf]  ;;  %4183 = vmatpush.bf16.msra.mxu1 %v5850_v10 }
 0x6c9   : > { %4977 = vrot.lane.b32.xlu0 %v7850_v62, %s6544_s28  ;;  %v6213_v62 = vld [vmem:[%s9672_s14 + $0x174] sm:$0xf0]  ;;  %v8949_v2 = vpop.f32.mrf.mxu2  ;;  %v8953_v60 = vpop.f32.mrf.mxu3 }
 0x6ca   : > { %v5846_v18 = vor.u32 %v6213_v62, %v5845_v63 }
 0x6cc   : > { %4085 = vmatpush.bf16.msra.mxu3 %v5846_v18 }
 0x6ce   : > { %3957 = vmatmul.bf16.gmra.mxu0 %v8700_v4  ;;  %4006 = vmatmul.bf16.gmra.mxu1 %v8702_v9 }
 0x6d0   : > { %4902 = vrot.lane.b32.xlu1 %v8159_v39, %s6543_s2  ;;  %v5719_v39 = vld [vmem:[%s9672_s14 + $0x78] sm:$0xf0]  ;;  %4086 = vmatpush.bf16.msra.mxu3 %v5830_v42 }
 0x6d1   : > { %4983 = vrot.lane.b32.xlu0 %v7912_v30, %s6544_s28  ;;  %v5722_v1 = vor.u32 %v6179_v45, %v5719_v39  ;;  %v5813_v39 = vld [vmem:[%s9672_s14 + $0x128] sm:$0xf] }
 0x6d3   : > { %4134 = vmatpush.bf16.msra.mxu0 %v5722_v1 }
 0x6d7   : > { %4135 = vmatpush.bf16.msra.mxu0 %v5706_v59 }
 0x6d8   : > { %4957 = vrot.lane.b32.xlu1 %v7772_v11, %s6544_s28  ;;  %v3335_v30 = vpop.f32.mrf.mxu0  ;;  %v3384_v19 = vpop.f32.mrf.mxu1  ;;  %v5702_v11 = vor.u32 %v6177_v40, %v5701_v7  ;;  %v5669_v7 = vld [vmem:[%s9672_s14 + $0x8] sm:$0xf]  ;;  %v6169_v40 = vld [vmem:[%s9672_s14 + $0x14] sm:$0xf0] }
 0x6d9   : > { %v3336_v38 = vadd.f32 %v3335_v30, %v8535_v25  ;;  %v3385_v17 = vadd.f32 %v3384_v19, %v8541_v12  ;;  %v6171_v30 = vld [vmem:[%s9672_s14 + $0x2c] sm:$0xf]  ;;  %v5687_v19 = vld [vmem:[%s9672_s14 + $0x38] sm:$0xf0] }
 0x6da   : > { %4037 = vmatpush.bf16.msra.mxu2 %v5702_v11  ;;  %v5690_v5 = vor.u32 %v6171_v30, %v5687_v19  ;;  %v5670_v11 = vor.u32 %v6169_v40, %v5669_v7  ;;  %v9040_v30 = vperm.slane %v8770_v55, 1 }
 0x6db   : > { %v3418_v6 = vmax.f32 %v3336_v38, 0.0  ;;  %v3419_v34 = vmax.f32 %v3385_v17, 0.0  ;;  %v5671_v38 = vld [vmem:[%s9672_s14 + $0x18] sm:$0xf0] }
 0x6dc   : > { %4136 = vmatpush.bf16.msra.mxu0 %v5690_v5  ;;  %v5674_v17 = vor.u32 %v6167_v44, %v5671_v38  ;;  %v6245_v5 = vld [vmem:[%s9674_s16 + $0x78] sm:$0xff] }
 0x6dd   : > { %v6253_v44 = vld [vmem:[%s9674_s16 + $0xb8] sm:$0xff] }
 0x6de   : > { %3962 = vmatmul.bf16.gmra.mxu0 %v8745_v3  ;;  %4011 = vmatmul.bf16.gmra.mxu1 %v8747_v24 }
 0x6df   : > { %4038 = vmatpush.bf16.msra.mxu2 %v5686_v48 }
 0x6e0   : > { %4963 = vrot.lane.b32.xlu1 %v7798_v16, %s6544_s28  ;;  %v3337_v36 = vpop.f32.mrf.mxu0  ;;  %v3386_v26 = vpop.f32.mrf.mxu1  ;;  %v6207_v16 = vld [vmem:[%s9672_s14 + $0x14c] sm:$0xf]  ;;  %4137 = vmatpush.bf16.msra.mxu0 %v5674_v17  ;;  %v6236_v17 = vld [vmem:[%s9674_s16 + $0x30] sm:$0xff] }
 0x6e1   : > { %v3338_v57 = vadd.f32 %v3337_v36, %v8535_v25  ;;  %v3387_v43 = vadd.f32 %v3386_v26, %v8541_v12  ;;  %v5834_v58 = vor.u32 %v6207_v16, %v5831_v46 }
 0x6e3   : > { %v3420_v28 = vmax.f32 %v3338_v57, 0.0  ;;  %v3421_v50 = vmax.f32 %v3387_v43, 0.0  ;;  %4184 = vmatpush.bf16.msra.mxu1 %v5834_v58  ;;  %4039 = vmatpush.bf16.msra.mxu2 %v5670_v11  ;;  %v5802_v57 = vor.u32 %v6199_v37, %v5799_v51  ;;  %v6244_v37 = vld [vmem:[%s9674_s16 + $0x70] sm:$0xff] }
 0x6e4   : > { %4682 = vmatpush.bf16.msrb.mxu0 %v6253_v44 }
 0x6e5   : > { %v8951_v61 = vpack.c.bf16 %v3420_v28, %v3418_v6  ;;  %v8955_v20 = vpack.c.bf16 %v3421_v50, %v3419_v34 }
 0x6e7   : > { %3874 = vmatmul.bf16.gmra.mxu2 %v8951_v61  ;;  %3923 = vmatmul.bf16.gmra.mxu3 %v8955_v20 }
 0x6e8   : > { %4969 = vrot.lane.b32.xlu1 %v7823_v52, %s6544_s28  ;;  %v6205_v52 = vld [vmem:[%s9672_s14 + $0x134] sm:$0xf0] }
 0x6e9   : > { %v5814_v1 = vor.u32 %v6205_v52, %v5813_v39 }
 0x6eb   : > { %4087 = vmatpush.bf16.msra.mxu3 %v5814_v1 }
 0x6ec   : > { %v3855_v63 = vpop.f32.mrf.mxu2  ;;  %v3904_v18 = vpop.f32.mrf.mxu3 }
 0x6ed   : > { %v3856_v62 = vadd.f32 %v3855_v63, %v8775_v8 }
 0x6ee   : > { %3967 = vmatmul.bf16.gmra.mxu0 %v8820_v33  ;;  %4016 = vmatmul.bf16.gmra.mxu1 %v8822_v13 }
 0x6ef   : > { %v8970_v45 = vadd.f32 %v3904_v18, %v3856_v62 }
 0x6f0   : > { %4975 = vrot.lane.b32.xlu1 %v7845_v27, %s6544_s28  ;;  %v6203_v27 = vld [vmem:[%s9672_s14 + $0x12c] sm:$0xf] }
 0x6f1   : > { %v5818_v10 = vor.u32 %v6203_v27, %v5815_v23 }
 0x6f3   : > { %4185 = vmatpush.bf16.msra.mxu1 %v5818_v10 }
 0x6f4   : > { %v9016_v36 = vpop.f32.mrf.mxu2 }
 0x6f7   : > { %4186 = vmatpush.bf16.msra.mxu1 %v5802_v57 }
 0x6f8   : > { %4981 = vrot.lane.b32.xlu1 %v7956_v56, %s6544_s28  ;;  %v5797_v56 = vld [vmem:[%s9672_s14 + $0x108] sm:$0xf] }
 0x6f9   : > { %v5798_v42 = vor.u32 %v6201_v21, %v5797_v56 }
 0x6fb   : > { %4088 = vmatpush.bf16.msra.mxu3 %v5798_v42  ;;  %v6261_v42 = vld [vmem:[%s9674_s16 + $0xf8] sm:$0xff] }
 0x6fc   : > { %4731 = vmatpush.bf16.msrb.mxu1 %v6261_v42  ;;  %v6250_v42 = vld [vmem:[%s9674_s16 + $0xa0] sm:$0xff] }
 0x6fe   : > { %3972 = vmatmul.bf16.gmra.mxu0 %v8951_v61  ;;  %4021 = vmatmul.bf16.gmra.mxu1 %v8955_v20 }
 0x6ff   : > { %4633 = vmatpush.bf16.msrb.mxu3 %v6245_v5 }
 0x700   : > { %4987 = vrot.lane.b32.xlu1 %v7893_v22, %s6544_s28  ;;  %v9018_v22 = vpop.f32.mrf.mxu3  ;;  %s9429_s28 = scalar_lea.vmem %s9676_s18, %s6706_s1 }
 0x703   : > { %4634 = vmatpush.bf16.msrb.mxu3 %v6244_v37  ;;  %v6233_v37 = vld [vmem:[%s9674_s16 + $0x18] sm:$0xff] }
 0x70b   : > { %v3340_v26 = vpop.f32.mrf.mxu0  ;;  %v3389_v59 = vpop.f32.mrf.mxu1 }
 0x70c   : > { %v3860_v43 = vpop.f32.mrf.mxu2  ;;  %v3341_v46 = vadd.f32 %v3340_v26, %v8535_v25  ;;  %v3390_v34 = vadd.f32 %v3389_v59, %v8541_v12 }
 0x70d   : > { %v3861_v6 = vadd.f32 %v3860_v43, %v8775_v8  ;;  %v3909_v28 = vpop.f32.mrf.mxu3 }
 0x70e   : > { %v3422_v62 = vmax.f32 %v3341_v46, 0.0  ;;  %v3423_v39 = vmax.f32 %v3390_v34, 0.0 }
 0x70f   : > { %v9027_v16 = vadd.f32 %v3909_v28, %v3861_v6 }
 0x713   : > { %v3342_v50 = vpop.f32.mrf.mxu0  ;;  %v3391_v47 = vpop.f32.mrf.mxu1 }
 0x714   : > { %v3343_v58 = vadd.f32 %v3342_v50, %v8535_v25  ;;  %v9032_v0 = vpop.f32.mrf.mxu2  ;;  %v3392_v48 = vadd.f32 %v3391_v47, %v8541_v12  ;;  %v6237_v25 = vld [vmem:[%s9674_s16 + $0x38] sm:$0xff]  ;;  %v6235_v47 = vld [vmem:[%s9674_s16 + $0x28] sm:$0xff] }
 0x715   : > { %v9035_v63 = vpop.f32.mrf.mxu3  ;;  %4584 = vmatpush.bf16.msrb.mxu2 %v6237_v25 }
 0x716   : > { %v3424_v18 = vmax.f32 %v3343_v58, 0.0  ;;  %v3425_v52 = vmax.f32 %v3392_v48, 0.0  ;;  %v6243_v48 = vld [vmem:[%s9674_s16 + $0x68] sm:$0xff] }
 0x717   : > { %4635 = vmatpush.bf16.msrb.mxu3 %v6243_v48  ;;  %v6232_v48 = vld [vmem:[%s9674_s16 + $0x10] sm:$0xff] }
 0x718   : > { %v9037_v1 = vpack.c.bf16 %v3424_v18, %v3422_v62  ;;  %v9045_v19 = vpack.c.bf16 %v3425_v52, %v3423_v39 }
 0x719   : > { %4585 = vmatpush.bf16.msrb.mxu2 %v6236_v17 }
 0x71a   : > { %3879 = vmatmul.bf16.gmra.mxu2 %v9037_v1  ;;  %3977 = vmatmul.bf16.gmra.mxu0 %v9037_v1 }
 0x71b   : > { %3928 = vmatmul.bf16.gmra.mxu3 %v9045_v19  ;;  %4026 = vmatmul.bf16.gmra.mxu1 %v9045_v19  ;;  %v3943_v12 = vpop.f32.mrf.mxu0  ;;  %v3992_v23 = vpop.f32.mrf.mxu1 }
 0x71c   : > { %v3944_v27 = vadd.f32 %v3943_v12, %v9040_v30  ;;  %v3865_v10 = vpop.f32.mrf.mxu2  ;;  %v6251_v12 = vld [vmem:[%s9674_s16 + $0xa8] sm:$0xff] }
 0x71d   : > { %v3866_v7 = vadd.f32 %v3865_v10, %v8775_v8  ;;  %v3914_v11 = vpop.f32.mrf.mxu3  ;;  %4586 = vmatpush.bf16.msrb.mxu2 %v6235_v47 }
 0x71e   : > { %v9056_v40 = vadd.f32 %v3992_v23, %v3944_v27  ;;  %v6234_v27 = vld [vmem:[%s9674_s16 + $0x20] sm:$0xff] }
 0x71f   : > { %v9058_v56 = vadd.f32 %v3914_v11, %v3866_v7  ;;  %v6242_v23 = vld [vmem:[%s9674_s16 + $0x60] sm:$0xff] }
 0x720   : > { %4636 = vmatpush.bf16.msrb.mxu3 %v6242_v23 }
 0x721   : > { %4587 = vmatpush.bf16.msrb.mxu2 %v6234_v27  ;;  %v6256_v27 = vld [vmem:[%s9674_s16 + $0xd0] sm:$0xff] }
 0x723   : > { %v9060_v21 = vpop.f32.mrf.mxu0  ;;  %v9068_v38 = vpop.f32.mrf.mxu1 }
 0x724   : > { %v9081_v59 = vpop.f32.mrf.mxu2 }
 0x725   : > { %v9085_v6 = vpop.f32.mrf.mxu3  ;;  %4588 = vmatpush.bf16.msrb.mxu2 %v6233_v37 }
 0x729   : > { %4589 = vmatpush.bf16.msrb.mxu2 %v6232_v48 }
 0x72a   : > { %4040 = vmatmul.bf16.vlgmr.msra.gmra.mxu2 %v8551_v54  ;;  %4138 = vmatmul.bf16.vlgmr.msra.gmra.mxu0 %v8551_v54  ;;  %v6252_v54 = vld [vmem:[%s9674_s16 + $0xb0] sm:$0xff] }
 0x72b   : > { %4089 = vmatmul.bf16.vlgmr.msra.gmra.mxu3 %v8554_v35  ;;  %4187 = vmatmul.bf16.vlgmr.msra.gmra.mxu1 %v8554_v35  ;;  %v3948_v51 = vpop.f32.mrf.mxu0  ;;  %v3997_v26 = vpop.f32.mrf.mxu1  ;;  %v6260_v35 = vld [vmem:[%s9674_s16 + $0xf0] sm:$0xff] }
 0x72c   : > { %v3949_v57 = vadd.f32 %v3948_v51, %v9040_v30  ;;  %4683 = vmatpush.bf16.msrb.mxu0 %v6252_v54  ;;  %4732 = vmatpush.bf16.msrb.mxu1 %v6260_v35  ;;  %v6241_v51 = vld [vmem:[%s9674_s16 + $0x58] sm:$0xff] }
 0x72d   : > { %4637 = vmatpush.bf16.msrb.mxu3 %v6241_v51 }
 0x72e   : > { %v9083_v43 = vadd.f32 %v3997_v26, %v3949_v57 }
 0x730   : > { %4684 = vmatpush.bf16.msrb.mxu0 %v6251_v12 }
 0x733   : > { %v9093_v28 = vpop.f32.mrf.mxu0  ;;  %v9095_v46 = vpop.f32.mrf.mxu1 }
 0x734   : > { %4685 = vmatpush.bf16.msrb.mxu0 %v6250_v42 }
 0x736   : > { %v3870_v34 = vpop.f32.mrf.mxu2  ;;  %v3919_v58 = vpop.f32.mrf.mxu3 }
 0x737   : > { %v3871_v50 = vadd.f32 %v3870_v34, %v8775_v8  ;;  %v6249_v34 = vld [vmem:[%s9674_s16 + $0x98] sm:$0xff] }
 0x738   : > { %4686 = vmatpush.bf16.msrb.mxu0 %v6249_v34  ;;  %v6247_v34 = vld [vmem:[%s9674_s16 + $0x88] sm:$0xff] }
 0x739   : > { %v9104_v62 = vadd.f32 %v3919_v58, %v3871_v50 }
 0x73a   : > { %4045 = vmatmul.bf16.gmra.mxu2 %v8595_v32  ;;  %4143 = vmatmul.bf16.gmra.mxu0 %v8595_v32  ;;  %v6259_v32 = vld [vmem:[%s9674_s16 + $0xe8] sm:$0xff] }
 0x73b   : > { %4094 = vmatmul.bf16.gmra.mxu3 %v8597_v15  ;;  %4192 = vmatmul.bf16.gmra.mxu1 %v8597_v15  ;;  %v3953_v18 = vpop.f32.mrf.mxu0  ;;  %v4002_v52 = vpop.f32.mrf.mxu1 }
 0x73c   : > { %v3954_v39 = vadd.f32 %v3953_v18, %v9040_v30  ;;  %4733 = vmatpush.bf16.msrb.mxu1 %v6259_v32  ;;  %v6240_v18 = vld [vmem:[%s9674_s16 + $0x50] sm:$0xff] }
 0x73d   : > { %v6248_v32 = vld [vmem:[%s9674_s16 + $0x90] sm:$0xff]  ;;  %4638 = vmatpush.bf16.msrb.mxu3 %v6240_v18 }
 0x73e   : > { %v9111_v25 = vadd.f32 %v4002_v52, %v3954_v39  ;;  %v9165_v50 = vpop.f32.mrf.mxu2  ;;  %v9169_v58 = vpop.f32.mrf.mxu3  ;;  %4687 = vmatpush.bf16.msrb.mxu0 %v6248_v32 }
 0x742   : > { %4688 = vmatpush.bf16.msrb.mxu0 %v6247_v34 }
 0x743   : > { %v9119_v5 = vpop.f32.mrf.mxu0  ;;  %v9121_v15 = vpop.f32.mrf.mxu1 }
 0x74a   : > { %4050 = vmatmul.bf16.gmra.mxu2 %v8639_v31  ;;  %4148 = vmatmul.bf16.gmra.mxu0 %v8639_v31  ;;  %v6258_v31 = vld [vmem:[%s9674_s16 + $0xe0] sm:$0xff] }
 0x74b   : > { %4099 = vmatmul.bf16.gmra.mxu3 %v8641_v14  ;;  %4197 = vmatmul.bf16.gmra.mxu1 %v8641_v14  ;;  %v3958_v10 = vpop.f32.mrf.mxu0  ;;  %v4007_v11 = vpop.f32.mrf.mxu1 }
 0x74c   : > { %v3959_v7 = vadd.f32 %v3958_v10, %v9040_v30  ;;  %4734 = vmatpush.bf16.msrb.mxu1 %v6258_v31 }
 0x74e   : > { %v9134_v44 = vadd.f32 %v4007_v11, %v3959_v7 }
 0x753   : > { %v9142_v17 = vpop.f32.mrf.mxu0  ;;  %v9144_v14 = vpop.f32.mrf.mxu1 }
 0x75a   : > { %4055 = vmatmul.bf16.gmra.mxu2 %v8700_v4  ;;  %4153 = vmatmul.bf16.gmra.mxu0 %v8700_v4  ;;  %v6257_v4 = vld [vmem:[%s9674_s16 + $0xd8] sm:$0xff] }
 0x75b   : > { %4104 = vmatmul.bf16.gmra.mxu3 %v8702_v9  ;;  %4202 = vmatmul.bf16.gmra.mxu1 %v8702_v9  ;;  %v3963_v57 = vpop.f32.mrf.mxu0  ;;  %v4012_v54 = vpop.f32.mrf.mxu1 }
 0x75c   : > { %v3964_v26 = vadd.f32 %v3963_v57, %v9040_v30  ;;  %4735 = vmatpush.bf16.msrb.mxu1 %v6257_v4  ;;  %v6255_v4 = vld [vmem:[%s9674_s16 + $0xc8] sm:$0xff] }
 0x75e   : > { %v9157_v35 = vadd.f32 %v4012_v54, %v3964_v26 }
 0x760   : > { %4736 = vmatpush.bf16.msrb.mxu1 %v6256_v27 }
 0x763   : > { %v9167_v9 = vpop.f32.mrf.mxu0  ;;  %v9171_v47 = vpop.f32.mrf.mxu1 }
 0x764   : > { %4737 = vmatpush.bf16.msrb.mxu1 %v6255_v4 }
 0x76a   : > { %v3875_v39 = vpop.f32.mrf.mxu2  ;;  %4060 = vmatmul.bf16.gmra.mxu2 %v8745_v3  ;;  %4158 = vmatmul.bf16.gmra.mxu0 %v8745_v3  ;;  %v3924_v23 = vpop.f32.mrf.mxu3  ;;  %v6231_v3 = vld [vmem:[%s9674_s16 + $0x8] sm:$0xff] }
 0x76b   : > { %v3876_v52 = vadd.f32 %v3875_v39, %v8775_v8  ;;  %4109 = vmatmul.bf16.gmra.mxu3 %v8747_v24  ;;  %4207 = vmatmul.bf16.gmra.mxu1 %v8747_v24  ;;  %v3968_v12 = vpop.f32.mrf.mxu0  ;;  %v4017_v7 = vpop.f32.mrf.mxu1  ;;  %v6239_v24 = vld [vmem:[%s9674_s16 + $0x48] sm:$0xff]  ;;  %v6246_v39 = vld [vmem:[%s9674_s16 + $0x80] sm:$0xff] }
 0x76c   : > { %v3969_v10 = vadd.f32 %v3968_v12, %v9040_v30  ;;  %4590 = vmatpush.bf16.msrb.mxu2 %v6231_v3  ;;  %4639 = vmatpush.bf16.msrb.mxu3 %v6239_v24 }
 0x76d   : > { %v9197_v11 = vadd.f32 %v3924_v23, %v3876_v52  ;;  %4689 = vmatpush.bf16.msrb.mxu0 %v6246_v39  ;;  %v6254_v52 = vld [vmem:[%s9674_s16 + $0xc0] sm:$0xff] }
 0x76e   : > { %v9199_v42 = vadd.f32 %v4017_v7, %v3969_v10  ;;  %4738 = vmatpush.bf16.msrb.mxu1 %v6254_v52  ;;  %v3848_v10 = vadd.f32 %v8842_v29, %v8775_v8  ;;  %v3946_v7 = vadd.f32 %v9060_v21, %v9040_v30  ;;  %v4228_v29 = vmax.f32 %v8782_v49, 0.0 }
 0x76f   : > { %v4229_v52 = vmax.f32 %v9056_v40, 0.0  ;;  %v3853_v49 = vadd.f32 %v8949_v2, %v8775_v8  ;;  %v3951_v40 = vadd.f32 %v9093_v28, %v9040_v30 }
 0x770   : > { %v3995_v4 = vadd.f32 %v9068_v38, %v3946_v7 }
 0x771   : > { %v4000_v2 = vadd.f32 %v9095_v46, %v3951_v40 }
 0x772   : > { %v9238_v12 = vpop.f32.mrf.mxu2 }
 0x773   : > { %v9201_v31 = vpop.f32.mrf.mxu0  ;;  %v9203_v37 = vpop.f32.mrf.mxu1 }
 0x77a   : > { %4065 = vmatmul.bf16.gmra.mxu2 %v8820_v33  ;;  %4163 = vmatmul.bf16.gmra.mxu0 %v8820_v33  ;;  %v6230_v33 = vld [vmem:[%s9674_s16] sm:$0xff] }
 0x77b   : > { %4114 = vmatmul.bf16.gmra.mxu3 %v8822_v13  ;;  %4212 = vmatmul.bf16.gmra.mxu1 %v8822_v13  ;;  %v3973_v51 = vpop.f32.mrf.mxu0  ;;  %v4022_v26 = vpop.f32.mrf.mxu1  ;;  %v6238_v13 = vld [vmem:[%s9674_s16 + $0x40] sm:$0xff] }
 0x77c   : > { %v3974_v57 = vadd.f32 %v3973_v51, %v9040_v30  ;;  %4591 = vmatpush.bf16.msrb.mxu2 %v6230_v33  ;;  %4640 = vmatpush.bf16.msrb.mxu3 %v6238_v13  ;;  %v4233_v33 = vmax.f32 %v3995_v4, 0.0  ;;  %v9274_v4 = vperm.slane %v8770_v55, 2 }
 0x77e   : > { %v9210_v54 = vadd.f32 %v4022_v26, %v3974_v57  ;;  %v3897_v26 = vadd.f32 %v8846_v41, %v3848_v10  ;;  %v9264_v41 = vperm.slane %v8770_v55, 3  ;;  %v4236_v55 = vmax.f32 %v8867_v53, 0.0 }
 0x77f   : > { %v3858_v53 = vadd.f32 %v9016_v36, %v8775_v8 }
 0x783   : > { %v9228_v48 = vpop.f32.mrf.mxu0  ;;  %v9230_v18 = vpop.f32.mrf.mxu1 }
 0x78a   : > { %4070 = vmatmul.bf16.gmra.mxu2 %v8951_v61  ;;  %4168 = vmatmul.bf16.gmra.mxu0 %v8951_v61  ;;  %v9240_v61 = vpop.f32.mrf.mxu3 }
 0x78b   : > { %4119 = vmatmul.bf16.gmra.mxu3 %v8955_v20  ;;  %4217 = vmatmul.bf16.gmra.mxu1 %v8955_v20 }
 0x797   : > { %v3978_v32 = vpop.f32.mrf.mxu0 }
 0x798   : > { %v3979_v20 = vadd.f32 %v3978_v32, %v9040_v30  ;;  %v4027_v27 = vpop.f32.mrf.mxu1 }
 0x79a   : > { %v9243_v23 = vadd.f32 %v4027_v27, %v3979_v20  ;;  %4075 = vmatmul.bf16.gmra.mxu2 %v9037_v1  ;;  %4173 = vmatmul.bf16.gmra.mxu0 %v9037_v1 }
 0x79b   : > { %4124 = vmatmul.bf16.gmra.mxu3 %v9045_v19  ;;  %4222 = vmatmul.bf16.gmra.mxu1 %v9045_v19  ;;  %v4232_v19 = vmax.f32 %v3897_v26, 0.0 }
 0x79d   : > { %v3880_v3 = vpop.f32.mrf.mxu2  ;;  %v4292_v20 = vpack.c.bf16 %v4232_v19, %v4228_v29 }
 0x79e   : > { %v3881_v24 = vadd.f32 %v3880_v3, %v8775_v8  ;;  %v3929_v51 = vpop.f32.mrf.mxu3  ;;  %v4293_v3 = vpack.c.bf16 %v4233_v33, %v4229_v52 }
 0x79f   : > { %v9254_v57 = vpop.f32.mrf.mxu0 }
 0x7a0   : > { %v3930_v34 = vadd.f32 %v3929_v51, %v3881_v24  ;;  %v9257_v1 = vpop.f32.mrf.mxu1 }
 0x7a2   : > { %v4284_v24 = vmax.f32 %v3930_v34, 0.0  ;;  %v3902_v34 = vadd.f32 %v8953_v60, %v3853_v49  ;;  %v4237_v49 = vmax.f32 %v9083_v43, 0.0 }
 0x7a5   : > { %v3882_v13 = vpop.f32.mrf.mxu2 }
 0x7a6   : > { %v3883_v21 = vadd.f32 %v3882_v13, %v8775_v8  ;;  %v3931_v39 = vpop.f32.mrf.mxu3 }
 0x7a7   : > { %v4139_v32 = vpop.f32.mrf.mxu0 }
 0x7a8   : > { %v3932_v27 = vadd.f32 %v3931_v39, %v3883_v21  ;;  %v4188_v10 = vpop.f32.mrf.mxu1  ;;  %v4140_v7 = vadd.f32 %v4139_v32, %v9264_v41  ;;  %v4240_v32 = vmax.f32 %v3902_v34, 0.0 }
 0x7aa   : > { %v4288_v38 = vmax.f32 %v3932_v27, 0.0  ;;  %4592 = vmatmul.bf16.vlgmr.msrb.gmra.mxu2 %v4292_v20  ;;  %v4189_v13 = vadd.f32 %v4188_v10, %v4140_v7  ;;  %v4241_v27 = vmax.f32 %v4000_v2, 0.0  ;;  %v4296_v40 = vpack.c.bf16 %v4240_v32, %v4236_v55 }
 0x7ab   : > { %4641 = vmatmul.bf16.vlgmr.msrb.gmra.mxu3 %v4293_v3 }
 0x7ac   : > { %v9269_v51 = vpack.c.bf16 %v4288_v38, %v4284_v24  ;;  %v4231_v20 = vmax.f32 %v4189_v13, 0.0 }
 0x7ad   : > { %v4041_v26 = vpop.f32.mrf.mxu2 }
 0x7ae   : > { %v4090_v19 = vpop.f32.mrf.mxu3  ;;  %v4042_v39 = vadd.f32 %v4041_v26, %v9274_v4  ;;  %v4297_v26 = vpack.c.bf16 %v4241_v27, %v4237_v49 }
 0x7af   : > { %v4141_v33 = vpop.f32.mrf.mxu0 }
 0x7b0   : > { %v4142_v29 = vadd.f32 %v4141_v33, %v9264_v41  ;;  %v4190_v21 = vpop.f32.mrf.mxu1  ;;  %v4091_v24 = vadd.f32 %v4090_v19, %v4042_v39 }
 0x7b2   : > { %v4191_v52 = vadd.f32 %v4190_v21, %v4142_v29  ;;  %v4230_v34 = vmax.f32 %v4091_v24, 0.0  ;;  %v3956_v21 = vadd.f32 %v9119_v5, %v9040_v30 }
 0x7b4   : > { %v4235_v28 = vmax.f32 %v4191_v52, 0.0  ;;  %v3907_v52 = vadd.f32 %v9018_v22, %v3858_v53  ;;  %v4005_v27 = vadd.f32 %v9121_v15, %v3956_v21 }
 0x7b5   : > { %v4043_v3 = vpop.f32.mrf.mxu2 }
 0x7b6   : > { %v4295_v38 = vpack.c.bf16 %v4235_v28, %v4231_v20  ;;  %v4044_v60 = vadd.f32 %v4043_v3, %v9274_v4  ;;  %v4092_v10 = vpop.f32.mrf.mxu3  ;;  %v4248_v55 = vmax.f32 %v3907_v52, 0.0 }
 0x7b7   : > { %v4144_v7 = vpop.f32.mrf.mxu0 }
 0x7b8   : > { %v4093_v33 = vadd.f32 %v4092_v10, %v4044_v60  ;;  %v4193_v46 = vpop.f32.mrf.mxu1  ;;  %4739 = vmatmul.bf16.vlgmr.msrb.gmra.mxu1 %v4295_v38  ;;  %v4145_v29 = vadd.f32 %v4144_v7, %v9264_v41  ;;  %v4249_v60 = vmax.f32 %v4005_v27, 0.0  ;;  %v4244_v10 = vmax.f32 %v8970_v45, 0.0 }
 0x7b9   : > { %v3863_v45 = vadd.f32 %v9032_v0, %v8775_v8 }
 0x7ba   : > { %v4234_v13 = vmax.f32 %v4093_v33, 0.0  ;;  %4597 = vmatmul.bf16.gmra.mxu2 %v4296_v40  ;;  %v4194_v32 = vadd.f32 %v4193_v46, %v4145_v29  ;;  %v4245_v46 = vmax.f32 %v9111_v25, 0.0 }
 0x7bb   : > { %4646 = vmatmul.bf16.gmra.mxu3 %v4297_v26  ;;  %v3912_v52 = vadd.f32 %v9035_v63, %v3863_v45 }
 0x7bc   : > { %v4294_v19 = vpack.c.bf16 %v4234_v13, %v4230_v34  ;;  %v4239_v24 = vmax.f32 %v4194_v32, 0.0  ;;  %v4300_v34 = vpack.c.bf16 %v4248_v55, %v4244_v10  ;;  %v4301_v13 = vpack.c.bf16 %v4249_v60, %v4245_v46 }
 0x7bd   : > { %v4046_v43 = vpop.f32.mrf.mxu2  ;;  %v4252_v60 = vmax.f32 %v9027_v16, 0.0  ;;  %v3868_v16 = vadd.f32 %v9081_v59, %v8775_v8 }
 0x7be   : > { %v4095_v2 = vpop.f32.mrf.mxu3  ;;  %4690 = vmatmul.bf16.vlgmr.msrb.gmra.mxu0 %v4294_v19  ;;  %v4047_v36 = vadd.f32 %v4046_v43, %v9274_v4  ;;  %v3961_v43 = vadd.f32 %v9142_v17, %v9040_v30 }
 0x7bf   : > { %v4146_v39 = vpop.f32.mrf.mxu0 }
 0x7c0   : > { %v4147_v20 = vadd.f32 %v4146_v39, %v9264_v41  ;;  %v4195_v28 = vpop.f32.mrf.mxu1  ;;  %v4096_v49 = vadd.f32 %v4095_v2, %v4047_v36  ;;  %v4010_v27 = vadd.f32 %v9144_v14, %v3961_v43 }
 0x7c2   : > { %v4196_v3 = vadd.f32 %v4195_v28, %v4147_v20  ;;  %v4238_v53 = vmax.f32 %v4096_v49, 0.0 }
 0x7c4   : > { %v4243_v38 = vmax.f32 %v4196_v3, 0.0  ;;  %v4256_v3 = vmax.f32 %v3912_v52, 0.0 }
 0x7c5   : > { %v4048_v5 = vpop.f32.mrf.mxu2 }
 0x7c6   : > { %v4049_v7 = vadd.f32 %v4048_v5, %v9274_v4  ;;  %v4097_v22 = vpop.f32.mrf.mxu3  ;;  %v4299_v33 = vpack.c.bf16 %v4243_v38, %v4239_v24  ;;  %v4257_v38 = vmax.f32 %v4010_v27, 0.0  ;;  %v4304_v46 = vpack.c.bf16 %v4256_v3, %v4252_v60 }
 0x7c7   : > { %v4149_v40 = vpop.f32.mrf.mxu0  ;;  %v4260_v27 = vmax.f32 %v9058_v56, 0.0  ;;  %v3873_v56 = vadd.f32 %v9165_v50, %v8775_v8 }
 0x7c8   : > { %v4098_v26 = vadd.f32 %v4097_v22, %v4049_v7  ;;  %v4198_v15 = vpop.f32.mrf.mxu1  ;;  %4744 = vmatmul.bf16.gmra.mxu1 %v4299_v33  ;;  %v4150_v29 = vadd.f32 %v4149_v40, %v9264_v41  ;;  %v4253_v7 = vmax.f32 %v9134_v44, 0.0 }
 0x7ca   : > { %v4242_v19 = vmax.f32 %v4098_v26, 0.0  ;;  %4602 = vmatmul.bf16.gmra.mxu2 %v4300_v34  ;;  %v4199_v32 = vadd.f32 %v4198_v15, %v4150_v29  ;;  %v4305_v40 = vpack.c.bf16 %v4257_v38, %v4253_v7  ;;  %v3917_v29 = vadd.f32 %v9085_v6, %v3868_v16  ;;  %v9329_v16 = vpop.xlane.xlu1 %2690 }
 0x7cb   : > { %4651 = vmatmul.bf16.gmra.mxu3 %v4301_v13  ;;  %v3971_v7 = vadd.f32 %v9201_v31, %v9040_v30 }
 0x7cc   : > { %v4298_v21 = vpack.c.bf16 %v4242_v19, %v4238_v53  ;;  %v4247_v55 = vmax.f32 %v4199_v32, 0.0  ;;  %v3966_v53 = vadd.f32 %v9167_v9, %v9040_v30  ;;  %v4264_v52 = vmax.f32 %v3917_v29, 0.0  ;;  %v9332_v29 = vpop.xlane.xlu2 %2684 }
 0x7cd   : > { %v4051_v25 = vpop.f32.mrf.mxu2  ;;  %v4020_v50 = vadd.f32 %v9203_v37, %v3971_v7  ;;  %v4269_v37 = vmax.f32 %v9199_v42, 0.0 }
 0x7ce   : > { %v4100_v2 = vpop.f32.mrf.mxu3  ;;  %4695 = vmatmul.bf16.gmra.mxu0 %v4298_v21  ;;  %v4052_v0 = vadd.f32 %v4051_v25, %v9274_v4 }
 0x7cf   : > { %v4151_v39 = vpop.f32.mrf.mxu0 }
 0x7d0   : > { %v4152_v20 = vadd.f32 %v4151_v39, %v9264_v41  ;;  %v4200_v28 = vpop.f32.mrf.mxu1  ;;  %v4101_v5 = vadd.f32 %v4100_v2, %v4052_v0  ;;  %v4015_v2 = vadd.f32 %v9171_v47, %v3966_v53 }
 0x7d2   : > { %v4201_v36 = vadd.f32 %v4200_v28, %v4152_v20  ;;  %v4246_v26 = vmax.f32 %v4101_v5, 0.0  ;;  %v4265_v28 = vmax.f32 %v4015_v2, 0.0 }
 0x7d4   : > { %v4251_v24 = vmax.f32 %v4201_v36, 0.0 }
 0x7d5   : > { %v4053_v17 = vpop.f32.mrf.mxu2 }
 0x7d6   : > { %v4054_v10 = vadd.f32 %v4053_v17, %v9274_v4  ;;  %v4102_v63 = vpop.f32.mrf.mxu3  ;;  %v4303_v49 = vpack.c.bf16 %v4251_v24, %v4247_v55  ;;  %v4261_v55 = vmax.f32 %v9157_v35, 0.0  ;;  %v4308_v17 = vpack.c.bf16 %v4264_v52, %v4260_v27 }
 0x7d7   : > { %v4154_v22 = vpop.f32.mrf.mxu0 }
 0x7d8   : > { %v4103_v33 = vadd.f32 %v4102_v63, %v4054_v10  ;;  %v4203_v14 = vpop.f32.mrf.mxu1  ;;  %4749 = vmatmul.bf16.gmra.mxu1 %v4303_v49  ;;  %v4155_v34 = vadd.f32 %v4154_v22, %v9264_v41  ;;  %v4309_v60 = vpack.c.bf16 %v4265_v28, %v4261_v55 }
 0x7da   : > { %v4250_v15 = vmax.f32 %v4103_v33, 0.0  ;;  %4607 = vmatmul.bf16.gmra.mxu2 %v4304_v46  ;;  %v4204_v21 = vadd.f32 %v4203_v14, %v4155_v34  ;;  %v9324_v14 = vpop.xlane.xlu0 %2687  ;;  %v3922_v46 = vadd.f32 %v9169_v58, %v3873_v56  ;;  %v4268_v58 = vmax.f32 %v9104_v62, 0.0  ;;  %v9339_v62 = vpop.xlane.xlu1 %2699 }
 0x7db   : > { %4656 = vmatmul.bf16.gmra.mxu3 %v4305_v40 }
 0x7dc   : > { %v4302_v13 = vpack.c.bf16 %v4250_v15, %v4246_v26  ;;  %v4255_v32 = vmax.f32 %v4204_v21, 0.0  ;;  %v4272_v31 = vmax.f32 %v3922_v46, 0.0 }
 0x7dd   : > { %v4056_v44 = vpop.f32.mrf.mxu2 }
 0x7de   : > { %v4105_v19 = vpop.f32.mrf.mxu3  ;;  %4700 = vmatmul.bf16.gmra.mxu0 %v4302_v13  ;;  %v4057_v59 = vadd.f32 %v4056_v44, %v9274_v4 }
 0x7df   : > { %v4156_v45 = vpop.f32.mrf.mxu0 }
 0x7e0   : > { %v4157_v43 = vadd.f32 %v4156_v45, %v9264_v41  ;;  %v4205_v25 = vpop.f32.mrf.mxu1  ;;  %v4106_v0 = vadd.f32 %v4105_v19, %v4057_v59  ;;  %v4273_v19 = vmax.f32 %v4020_v50, 0.0 }
 0x7e2   : > { %v4206_v39 = vadd.f32 %v4205_v25, %v4157_v43  ;;  %v4254_v5 = vmax.f32 %v4106_v0, 0.0  ;;  %v9337_v28 = vpop.xlane.xlu0 %2696  ;;  %v3878_v0 = vadd.f32 %v9238_v12, %v8775_v8 }
 0x7e4   : > { %v4259_v20 = vmax.f32 %v4206_v39, 0.0 }
 0x7e5   : > { %v4058_v9 = vpop.f32.mrf.mxu2 }
 0x7e6   : > { %v4059_v36 = vadd.f32 %v4058_v9, %v9274_v4  ;;  %v4107_v6 = vpop.f32.mrf.mxu3  ;;  %v4307_v3 = vpack.c.bf16 %v4259_v20, %v4255_v32  ;;  %v4312_v32 = vpack.c.bf16 %v4272_v31, %v4268_v58  ;;  %v4313_v20 = vpack.c.bf16 %v4273_v19, %v4269_v37 }
 0x7e7   : > { %v4159_v24 = vpop.f32.mrf.mxu0  ;;  %v3981_v58 = vadd.f32 %v9254_v57, %v9040_v30 }
 0x7e8   : > { %v4108_v38 = vadd.f32 %v4107_v6, %v4059_v36  ;;  %v4208_v47 = vpop.f32.mrf.mxu1  ;;  %4754 = vmatmul.bf16.gmra.mxu1 %v4307_v3  ;;  %v4160_v63 = vadd.f32 %v4159_v24, %v9264_v41  ;;  %v3976_v6 = vadd.f32 %v9228_v48, %v9040_v30 }
 0x7ea   : > { %v4258_v10 = vmax.f32 %v4108_v38, 0.0  ;;  %4612 = vmatmul.bf16.gmra.mxu2 %v4308_v17  ;;  %v4209_v40 = vadd.f32 %v4208_v47, %v4160_v63  ;;  %v9346_v38 = vpop.xlane.xlu2 %2693  ;;  %v3927_v47 = vadd.f32 %v9240_v61, %v3878_v0  ;;  %v4025_v8 = vadd.f32 %v9230_v18, %v3976_v6  ;;  %v9352_v56 = vpop.xlane.xlu0 %2705 }
 0x7eb   : > { %4661 = vmatmul.bf16.gmra.mxu3 %v4309_v60  ;;  %v4276_v61 = vmax.f32 %v9197_v11, 0.0  ;;  %v4277_v18 = vmax.f32 %v9210_v54, 0.0 }
 0x7ec   : > { %v4306_v49 = vpack.c.bf16 %v4258_v10, %v4254_v5  ;;  %v4263_v53 = vmax.f32 %v4209_v40, 0.0  ;;  %v4280_v48 = vmax.f32 %v3927_v47, 0.0  ;;  %v4281_v7 = vmax.f32 %v4025_v8, 0.0 }
 0x7ed   : > { %v4061_v35 = vpop.f32.mrf.mxu2 }
 0x7ee   : > { %v4110_v22 = vpop.f32.mrf.mxu3  ;;  %4705 = vmatmul.bf16.gmra.mxu0 %v4306_v49  ;;  %v4062_v34 = vadd.f32 %v4061_v35, %v9274_v4  ;;  %v4317_v31 = vpack.c.bf16 %v4281_v7, %v4277_v18 }
 0x7ef   : > { %v4161_v33 = vpop.f32.mrf.mxu0 }
 0x7f0   : > { %v4162_v26 = vadd.f32 %v4161_v33, %v9264_v41  ;;  %v4210_v15 = vpop.f32.mrf.mxu1  ;;  %v4111_v21 = vadd.f32 %v4110_v22, %v4062_v34  ;;  %v9354_v22 = vpop.xlane.xlu1 %2708 }
 0x7f2   : > { %v4211_v13 = vadd.f32 %v4210_v15, %v4162_v26  ;;  %v4262_v9 = vmax.f32 %v4111_v21, 0.0  ;;  %v9364_v54 = vpop.xlane.xlu0 %2714 }
 0x7f4   : > { %v4267_v44 = vmax.f32 %v4211_v13, 0.0  ;;  %v4316_v13 = vpack.c.bf16 %v4280_v48, %v4276_v61 }
 0x7f5   : > { %v4063_v45 = vpop.f32.mrf.mxu2 }
 0x7f6   : > { %v4311_v43 = vpack.c.bf16 %v4267_v44, %v4263_v53  ;;  %v4064_v25 = vadd.f32 %v4063_v45, %v9274_v4  ;;  %v4112_v2 = vpop.f32.mrf.mxu3  ;;  %v9359_v53 = vpop.xlane.xlu2 %2702 }
 0x7f7   : > { %v4164_v59 = vpop.f32.mrf.mxu0 }
 0x7f8   : > { %v4113_v39 = vadd.f32 %v4112_v2, %v4064_v25  ;;  %v4213_v52 = vpop.f32.mrf.mxu1  ;;  %4759 = vmatmul.bf16.gmra.mxu1 %v4311_v43  ;;  %v4165_v42 = vadd.f32 %v4164_v59, %v9264_v41  ;;  %v9366_v2 = vpop.xlane.xlu1 %2717 }
 0x7fa   : > { %v4266_v27 = vmax.f32 %v4113_v39, 0.0  ;;  %4617 = vmatmul.bf16.gmra.mxu2 %v4312_v32  ;;  %v4214_v17 = vadd.f32 %v4213_v52, %v4165_v42  ;;  %v4030_v52 = vadd.f32 %v9257_v1, %v3981_v58  ;;  %v9375_v47 = vpop.xlane.xlu0 %2723 }
 0x7fb   : > { %4666 = vmatmul.bf16.gmra.mxu3 %v4313_v20 }
 0x7fc   : > { %v4310_v36 = vpack.c.bf16 %v4266_v27, %v4262_v9  ;;  %v4271_v63 = vmax.f32 %v4214_v17, 0.0  ;;  %v4289_v27 = vmax.f32 %v4030_v52, 0.0 }
 0x7fd   : > { %v4066_v3 = vpop.f32.mrf.mxu2 }
 0x7fe   : > { %v4115_v55 = vpop.f32.mrf.mxu3  ;;  %4710 = vmatmul.bf16.gmra.mxu0 %v4310_v36  ;;  %v4067_v12 = vadd.f32 %v4066_v3, %v9274_v4  ;;  %v9371_v9 = vpop.xlane.xlu2 %2711 }
 0x7ff   : > { %v4166_v24 = vpop.f32.mrf.mxu0 }
 0x800   : > { %v4167_v60 = vadd.f32 %v4166_v24, %v9264_v41  ;;  %v4215_v5 = vpop.f32.mrf.mxu1  ;;  %v4116_v33 = vadd.f32 %v4115_v55, %v4067_v12  ;;  %v4285_v55 = vmax.f32 %v9243_v23, 0.0 }
 0x802   : > { %v4216_v10 = vadd.f32 %v4215_v5, %v4167_v60  ;;  %v4270_v44 = vmax.f32 %v4116_v33, 0.0  ;;  %v4321_v60 = vpack.c.bf16 %v4289_v27, %v4285_v55  ;;  %v9377_v5 = vpop.xlane.xlu1 %2726 }
 0x804   : > { %v4275_v49 = vmax.f32 %v4216_v10, 0.0 }
 0x805   : > { %v4068_v35 = vpop.f32.mrf.mxu2 }
 0x806   : > { %v4315_v46 = vpack.c.bf16 %v4275_v49, %v4271_v63  ;;  %v4069_v40 = vadd.f32 %v4068_v35, %v9274_v4  ;;  %v4117_v26 = vpop.f32.mrf.mxu3  ;;  %v9381_v49 = vpop.xlane.xlu2 %2720 }
 0x807   : > { %v4169_v15 = vpop.f32.mrf.mxu0  ;;  %v9383_v35 = vpop.permute.xlu0 %4876 }
 0x808   : > { %v4118_v50 = vadd.f32 %v4117_v26, %v4069_v40  ;;  %v4218_v34 = vpop.f32.mrf.mxu1  ;;  %4764 = vmatmul.bf16.gmra.mxu1 %v4315_v46  ;;  %v4170_v45 = vadd.f32 %v4169_v15, %v9264_v41 }
 0x80a   : > { %v4274_v19 = vmax.f32 %v4118_v50, 0.0  ;;  %4622 = vmatmul.bf16.gmra.mxu2 %v4316_v13  ;;  %v4219_v37 = vadd.f32 %v4218_v34, %v4170_v45  ;;  %v9386_v40 = vpop.permute.xlu1 %4878 }
 0x80b   : > { %4671 = vmatmul.bf16.gmra.mxu3 %v4317_v31 }
 0x80c   : > { %v4314_v11 = vpack.c.bf16 %v4274_v19, %v4270_v44  ;;  %v4279_v30 = vmax.f32 %v4219_v37, 0.0 }
 0x80d   : > { %v4071_v21 = vpop.f32.mrf.mxu2 }
 0x80e   : > { %v4120_v43 = vpop.f32.mrf.mxu3  ;;  %4715 = vmatmul.bf16.gmra.mxu0 %v4314_v11  ;;  %v4072_v32 = vadd.f32 %v4071_v21, %v9274_v4  ;;  %v9390_v19 = vpop.xlane.xlu2 %2729 }
 0x80f   : > { %v4171_v25 = vpop.f32.mrf.mxu0  ;;  %v9392_v45 = vpop.permute.xlu0 %4882 }
 0x810   : > { %v4172_v59 = vadd.f32 %v4171_v25, %v9264_v41  ;;  %v4220_v39 = vpop.f32.mrf.mxu1  ;;  %v4121_v36 = vadd.f32 %v4120_v43, %v4072_v32 }
 0x812   : > { %v4221_v20 = vadd.f32 %v4220_v39, %v4172_v59  ;;  %v4278_v8 = vmax.f32 %v4121_v36, 0.0  ;;  %v9394_v21 = vpop.permute.xlu1 %4884 }
 0x814   : > { %v4283_v57 = vmax.f32 %v4221_v20, 0.0 }
 0x815   : > { %v4073_v0 = vpop.f32.mrf.mxu2 }
 0x816   : > { %v4319_v42 = vpack.c.bf16 %v4283_v57, %v4279_v30  ;;  %v4074_v6 = vadd.f32 %v4073_v0, %v9274_v4  ;;  %v4122_v3 = vpop.f32.mrf.mxu3  ;;  %v9396_v59 = vpop.permute.xlu2 %4880 }
 0x817   : > { %v4174_v24 = vpop.f32.mrf.mxu0  ;;  %v9403_v39 = vpop.permute.xlu0 %4886 }
 0x818   : > { %v4123_v1 = vadd.f32 %v4122_v3, %v4074_v6  ;;  %v4223_v17 = vpop.f32.mrf.mxu1  ;;  %4769 = vmatmul.bf16.gmra.mxu1 %v4319_v42  ;;  %v4175_v48 = vadd.f32 %v4174_v24, %v9264_v41 }
 0x81a   : > { %v4282_v12 = vmax.f32 %v4123_v1, 0.0  ;;  %4627 = vmatmul.bf16.gmra.mxu2 %v9269_v51  ;;  %v4224_v61 = vadd.f32 %v4223_v17, %v4175_v48  ;;  %v9405_v20 = vpop.permute.xlu1 %4890 }
 0x81b   : > { %4676 = vmatmul.bf16.gmra.mxu3 %v4321_v60 }
 0x81c   : > { %v4318_v10 = vpack.c.bf16 %v4282_v12, %v4278_v8  ;;  %v4287_v18 = vmax.f32 %v4224_v61, 0.0 }
 0x81d   : > { %v4076_v63 = vpop.f32.mrf.mxu2 }
 0x81e   : > { %v4125_v23 = vpop.f32.mrf.mxu3  ;;  %4720 = vmatmul.bf16.gmra.mxu0 %v4318_v10  ;;  %v4077_v51 = vadd.f32 %v4076_v63, %v9274_v4  ;;  %v9408_v36 = vpop.permute.xlu2 %4888 }
 0x81f   : > { %v4176_v7 = vpop.f32.mrf.mxu0  ;;  %v9410_v55 = vpop.permute.xlu0 %4892 }
 0x820   : > { %v4177_v33 = vadd.f32 %v4176_v7, %v9264_v41  ;;  %v4225_v46 = vpop.f32.mrf.mxu1  ;;  %v4126_v34 = vadd.f32 %v4125_v23, %v4077_v51 }
 0x822   : > { %v4226_v26 = vadd.f32 %v4225_v46, %v4177_v33  ;;  %v4286_v41 = vmax.f32 %v4126_v34, 0.0  ;;  %v9413_v60 = vpop.permute.xlu1 %4896 }
 0x824   : > { %v4291_v15 = vmax.f32 %v4226_v26, 0.0 }
 0x825   : > { %v4078_v50 = vpop.f32.mrf.mxu2 }
 0x826   : > { %v4323_v13 = vpack.c.bf16 %v4291_v15, %v4287_v18  ;;  %v4079_v31 = vadd.f32 %v4078_v50, %v9274_v4  ;;  %v4127_v44 = vpop.f32.mrf.mxu3  ;;  %v9401_v4 = vld [vmem:[%s9675_s17] ss:$0 sm:$0xff]  ;;  %v9415_v61 = vpop.permute.xlu2 %4894 }
 0x827   : > { %v9418_v26 = vpop.permute.xlu0 %4898 }
 0x828   : > { %v4128_v11 = vadd.f32 %v4127_v44, %v4079_v31  ;;  %4774 = vmatmul.bf16.gmra.mxu1 %v4323_v13 }
 0x82a   : > { %v4290_v58 = vmax.f32 %v4128_v11, 0.0  ;;  %v9420_v50 = vpop.permute.xlu1 %4902 }
 0x82c   : > { %v4322_v43 = vpack.c.bf16 %v4290_v58, %v4286_v41 }
 0x82d   : > { %v4593_v25 = vpop.f32.mrf.mxu2 }
 0x82e   : > { %v4642_v37 = vpop.f32.mrf.mxu3  ;;  %4725 = vmatmul.bf16.gmra.mxu0 %v4322_v43  ;;  %v4594_v30 = vadd.f32 %v9401_v4, %v4593_v25 }
 0x830   : > { %v4643_v27 = vadd.f32 %v4642_v37, %v4594_v30 }
 0x835   : > { %v4595_v52 = vpop.f32.mrf.mxu2  ;;  %v4740_v32 = vpop.f32.mrf.mxu1 }
 0x836   : > { %v4644_v57 = vpop.f32.mrf.mxu3  ;;  %v4596_v24 = vadd.f32 %v9401_v4, %v4595_v52  ;;  %v9423_v52 = vpop.permute.xlu2 %4900 }
 0x838   : > { %v4645_v12 = vadd.f32 %v4644_v57, %v4596_v24  ;;  %v9431_v57 = vpop.permute.xlu0 %4904  ;;  %v4958_v24 = vpop.permute.xlu1 %4957 }
 0x83b   : > { %v4691_v0 = vpop.f32.mrf.mxu0 }
 0x83c   : > { %v4692_v42 = vadd.f32 %v4691_v0, %v4643_v27 }
 0x83d   : > { %v4598_v6 = vpop.f32.mrf.mxu2  ;;  %v4742_v3 = vpop.f32.mrf.mxu1 }
 0x83e   : > { %v4741_v1 = vadd.f32 %v4740_v32, %v4692_v42  ;;  %v4647_v17 = vpop.f32.mrf.mxu3  ;;  %v4599_v33 = vadd.f32 %v9401_v4, %v4598_v6 }
 0x840   : > { %v4780_v8 = vsub.f32 0.0, %v4741_v1  ;;  %v4648_v34 = vadd.f32 %v4647_v17, %v4599_v33  ;;  %v2731_v17 = vmul.f32 0.5, %v9332_v29 }
 0x842   : > { %v4796_v10 = vmul.f32 1.442695, %v4780_v8 }
 0x843   : > { %v4693_v48 = vpop.f32.mrf.mxu0 }
 0x844   : > { %6466 = vpow2.f32 %v4796_v10  ;;  %v4694_v63 = vadd.f32 %v4693_v48, %v4645_v12 }
 0x845   : > { %v4600_v23 = vpop.f32.mrf.mxu2  ;;  %v4745_v7 = vpop.f32.mrf.mxu1 }
 0x846   : > { %v4743_v46 = vadd.f32 %v4742_v3, %v4694_v63  ;;  %v4649_v51 = vpop.f32.mrf.mxu3  ;;  %v4601_v43 = vadd.f32 %v9401_v4, %v4600_v23  ;;  %v6545_v23 = vmov 0.0  }
 0x848   : > { %v4781_v18 = vsub.f32 0.0, %v4743_v46  ;;  %v4650_v27 = vadd.f32 %v4649_v51, %v4601_v43 }
 0x84a   : > { %v6467_v15 = vpop.eup %6466  ;;  %v4798_v13 = vmul.f32 1.442695, %v4781_v18 }
 0x84b   : > { %v4828_v31 = vadd.f32 1.0, %v6467_v15  ;;  %v4696_v44 = vpop.f32.mrf.mxu0 }
 0x84c   : > { %6468 = vpow2.f32 %v4798_v13  ;;  %v4697_v11 = vadd.f32 %v4696_v44, %v4648_v34  ;;  %v4960_v34 = vpop.permute.xlu0 %4959 }
 0x84d   : > { %6470 = vrcp.f32 %v4828_v31  ;;  %v4603_v41 = vpop.f32.mrf.mxu2  ;;  %v4747_v58 = vpop.f32.mrf.mxu1  ;;  %v2732_v31 = vmul.f32 0.5, %v9324_v14 }
 0x84e   : > { %v4746_v25 = vadd.f32 %v4745_v7, %v4697_v11  ;;  %v4652_v37 = vpop.f32.mrf.mxu3  ;;  %v4604_v10 = vadd.f32 %v9401_v4, %v4603_v41  ;;  %v9447_v7 = vpop.permute.xlu2 %4906 }
 0x850   : > { %v4782_v32 = vsub.f32 0.0, %v4746_v25  ;;  %v4653_v33 = vadd.f32 %v4652_v37, %v4604_v10 }
 0x852   : > { %v6469_v30 = vpop.eup %6468  ;;  %v4800_v0 = vmul.f32 1.442695, %v4782_v32 }
 0x853   : > { %v6471_v42 = vpop.eup %6470  ;;  %v4829_v6 = vadd.f32 1.0, %v6469_v30  ;;  %v4698_v3 = vpop.f32.mrf.mxu0 }
 0x854   : > { %4860 = vst.msk [vmem:[%s9429_s28] sm:$0xff] %vm732_vm0, %v6471_v42  ;;  %6472 = vpow2.f32 %v4800_v0  ;;  %v4699_v1 = vadd.f32 %v4698_v3, %v4650_v27 }
 0x855   : > { %4925 = vst.msk [vmem:[%s9429_s28] sm:$0xff] %vm4924_vm5, %v9383_v35  ;;  %6474 = vrcp.f32 %v4829_v6  ;;  %v4605_v8 = vpop.f32.mrf.mxu2  ;;  %v4750_v12 = vpop.f32.mrf.mxu1  ;;  %v2733_v6 = vmul.f32 0.5, %v9329_v16 }
 0x856   : > { %5006 = vst.msk [vmem:[%s9429_s28] sm:$0xff] %vm5005_vm6, %v4958_v24  ;;  %v4748_v48 = vadd.f32 %v4747_v58, %v4699_v1  ;;  %v4654_v63 = vpop.f32.mrf.mxu3  ;;  %v4606_v41 = vadd.f32 %v9401_v4, %v4605_v8  ;;  %v4962_v0 = vpop.permute.xlu2 %4961 }
 0x857   : > { %5023 = vst.msk [vmem:[%s9429_s28] sm:$0xff] %vm5022_vm7, %v2731_v17 }
 0x858   : > { %5040 = vst.msk [vmem:[%s9429_s28] sm:$0xff] %vm5039_vm8, %v6545_v23  ;;  %v4783_v29 = vsub.f32 0.0, %v4748_v48 }
 0x85a   : > { %v6473_v35 = vpop.eup %6472  ;;  %v4802_v46 = vmul.f32 1.442695, %v4783_v29 }
 0x85b   : > { %v6475_v51 = vpop.eup %6474  ;;  %v4830_v18 = vadd.f32 1.0, %v6473_v35  ;;  %v4701_v15 = vpop.f32.mrf.mxu0 }
 0x85c   : > { %4861 = vst.msk [vmem:[%s9429_s28 + $0x8] sm:$0xff] %vm732_vm0, %v6475_v51  ;;  %6476 = vpow2.f32 %v4802_v46  ;;  %v4702_v13 = vadd.f32 %v4701_v15, %v4653_v33  ;;  %v4964_v35 = vpop.permute.xlu1 %4963  ;;  %v2734_v46 = vmul.f32 0.5, %v9346_v38 }
 0x85d   : > { %4926 = vst.msk [vmem:[%s9429_s28 + $0x8] sm:$0xff] %vm4924_vm5, %v9386_v40  ;;  %6478 = vrcp.f32 %v4830_v18  ;;  %v4608_v44 = vpop.f32.mrf.mxu2  ;;  %v4752_v11 = vpop.f32.mrf.mxu1  ;;  %v4655_v40 = vadd.f32 %v4654_v63, %v4606_v41 }
 0x85e   : > { %5007 = vst.msk [vmem:[%s9429_s28 + $0x8] sm:$0xff] %vm5005_vm6, %v4960_v34  ;;  %v4751_v58 = vadd.f32 %v4750_v12, %v4702_v13  ;;  %v4657_v43 = vpop.f32.mrf.mxu3  ;;  %v4609_v1 = vadd.f32 %v9401_v4, %v4608_v44 }
 0x85f   : > { %5024 = vst.msk [vmem:[%s9429_s28 + $0x8] sm:$0xff] %vm5022_vm7, %v2732_v31 }
 0x860   : > { %5041 = vst.msk [vmem:[%s9429_s28 + $0x8] sm:$0xff] %vm5039_vm8, %v6545_v23  ;;  %v4784_v14 = vsub.f32 0.0, %v4751_v58 }
 0x862   : > { %v6477_v25 = vpop.eup %6476  ;;  %v4804_v37 = vmul.f32 1.442695, %v4784_v14 }
 0x863   : > { %v6479_v32 = vpop.eup %6478  ;;  %v4831_v30 = vadd.f32 1.0, %v6477_v25  ;;  %v4703_v27 = vpop.f32.mrf.mxu0  ;;  %v2735_v25 = vmul.f32 0.5, %v9337_v28 }
 0x864   : > { %4862 = vst.msk [vmem:[%s9429_s28 + $0x10] sm:$0xff] %vm732_vm0, %v6479_v32  ;;  %6480 = vpow2.f32 %v4804_v37  ;;  %v4704_v42 = vadd.f32 %v4703_v27, %v4655_v40 }
 0x865   : > { %4927 = vst.msk [vmem:[%s9429_s28 + $0x10] sm:$0xff] %vm4924_vm5, %v9396_v59  ;;  %6482 = vrcp.f32 %v4831_v30  ;;  %v4610_v3 = vpop.f32.mrf.mxu2  ;;  %v4755_v24 = vpop.f32.mrf.mxu1  ;;  %v4658_v59 = vadd.f32 %v4657_v43, %v4609_v1 }
 0x866   : > { %5008 = vst.msk [vmem:[%s9429_s28 + $0x10] sm:$0xff] %vm5005_vm6, %v4962_v0  ;;  %v4753_v17 = vadd.f32 %v4752_v11, %v4704_v42  ;;  %v4659_v8 = vpop.f32.mrf.mxu3  ;;  %v4611_v15 = vadd.f32 %v9401_v4, %v4610_v3  ;;  %v4966_v43 = vpop.permute.xlu0 %4965 }
 0x867   : > { %5025 = vst.msk [vmem:[%s9429_s28 + $0x10] sm:$0xff] %vm5022_vm7, %v2733_v6  ;;  %v4968_v1 = vpop.permute.xlu2 %4967 }
 0x868   : > { %5042 = vst.msk [vmem:[%s9429_s28 + $0x10] sm:$0xff] %vm5039_vm8, %v6545_v23  ;;  %v4785_v16 = vsub.f32 0.0, %v4753_v17 }
 0x86a   : > { %v6481_v12 = vpop.eup %6480  ;;  %v4806_v10 = vmul.f32 1.442695, %v4785_v16 }
 0x86b   : > { %v6483_v48 = vpop.eup %6482  ;;  %v4832_v63 = vadd.f32 1.0, %v6481_v12  ;;  %v4706_v29 = vpop.f32.mrf.mxu0 }
 0x86c   : > { %4863 = vst.msk [vmem:[%s9429_s28 + $0x18] sm:$0xff] %vm732_vm0, %v6483_v48  ;;  %6484 = vpow2.f32 %v4806_v10  ;;  %v4707_v33 = vadd.f32 %v4706_v29, %v4658_v59 }
 0x86d   : > { %4928 = vst.msk [vmem:[%s9429_s28 + $0x18] sm:$0xff] %vm4924_vm5, %v9392_v45  ;;  %6486 = vrcp.f32 %v4832_v63  ;;  %v4613_v51 = vpop.f32.mrf.mxu2  ;;  %v4757_v18 = vpop.f32.mrf.mxu1  ;;  %v4660_v45 = vadd.f32 %v4659_v8, %v4611_v15  ;;  %v2736_v8 = vmul.f32 0.5, %v9339_v62  ;;  %v2737_v15 = vmul.f32 0.5, %v9359_v53 }
 0x86e   : > { %5009 = vst.msk [vmem:[%s9429_s28 + $0x18] sm:$0xff] %vm5005_vm6, %v4964_v35  ;;  %v4756_v34 = vadd.f32 %v4755_v24, %v4707_v33  ;;  %v4662_v13 = vpop.f32.mrf.mxu3  ;;  %v4614_v32 = vadd.f32 %v9401_v4, %v4613_v51  ;;  %v4970_v51 = vpop.permute.xlu1 %4969 }
 0x86f   : > { %5026 = vst.msk [vmem:[%s9429_s28 + $0x18] sm:$0xff] %vm5022_vm7, %v2734_v46 }
 0x870   : > { %5043 = vst.msk [vmem:[%s9429_s28 + $0x18] sm:$0xff] %vm5039_vm8, %v6545_v23  ;;  %v4786_v38 = vsub.f32 0.0, %v4756_v34 }
 0x872   : > { %v6485_v31 = vpop.eup %6484  ;;  %v4808_v44 = vmul.f32 1.442695, %v4786_v38 }
 0x873   : > { %v6487_v11 = vpop.eup %6486  ;;  %v4833_v41 = vadd.f32 1.0, %v6485_v31  ;;  %v4708_v58 = vpop.f32.mrf.mxu0 }
 0x874   : > { %4864 = vst.msk [vmem:[%s9429_s28 + $0x20] sm:$0xff] %vm732_vm0, %v6487_v11  ;;  %6488 = vpow2.f32 %v4808_v44  ;;  %v4709_v14 = vadd.f32 %v4708_v58, %v4660_v45 }
 0x875   : > { %4929 = vst.msk [vmem:[%s9429_s28 + $0x20] sm:$0xff] %vm4924_vm5, %v9394_v21  ;;  %6490 = vrcp.f32 %v4833_v41  ;;  %v4615_v40 = vpop.f32.mrf.mxu2  ;;  %v4760_v37 = vpop.f32.mrf.mxu1  ;;  %v4663_v21 = vadd.f32 %v4662_v13, %v4614_v32 }
 0x876   : > { %5010 = vst.msk [vmem:[%s9429_s28 + $0x20] sm:$0xff] %vm5005_vm6, %v4966_v43  ;;  %v4758_v30 = vadd.f32 %v4757_v18, %v4709_v14  ;;  %v4664_v27 = vpop.f32.mrf.mxu3  ;;  %v4616_v59 = vadd.f32 %v9401_v4, %v4615_v40  ;;  %v4972_v14 = vpop.permute.xlu0 %4971  ;;  %v2738_v40 = vmul.f32 0.5, %v9352_v56 }
 0x877   : > { %5027 = vst.msk [vmem:[%s9429_s28 + $0x20] sm:$0xff] %vm5022_vm7, %v2735_v25 }
 0x878   : > { %5044 = vst.msk [vmem:[%s9429_s28 + $0x20] sm:$0xff] %vm5039_vm8, %v6545_v23  ;;  %v4787_v28 = vsub.f32 0.0, %v4758_v30 }
 0x87a   : > { %v6489_v0 = vpop.eup %6488  ;;  %v4810_v42 = vmul.f32 1.442695, %v4787_v28 }
 0x87b   : > { %v6491_v6 = vpop.eup %6490  ;;  %v4834_v3 = vadd.f32 1.0, %v6489_v0  ;;  %v4711_v24 = vpop.f32.mrf.mxu0 }
 0x87c   : > { %4865 = vst.msk [vmem:[%s9429_s28 + $0x28] sm:$0xff] %vm732_vm0, %v6491_v6  ;;  %6492 = vpow2.f32 %v4810_v42  ;;  %v4712_v17 = vadd.f32 %v4711_v24, %v4663_v21 }
 0x87d   : > { %4930 = vst.msk [vmem:[%s9429_s28 + $0x28] sm:$0xff] %vm4924_vm5, %v9403_v39  ;;  %6494 = vrcp.f32 %v4834_v3  ;;  %v4618_v16 = vpop.f32.mrf.mxu2  ;;  %v4762_v12 = vpop.f32.mrf.mxu1  ;;  %v4665_v39 = vadd.f32 %v4664_v27, %v4616_v59 }
 0x87e   : > { %5011 = vst.msk [vmem:[%s9429_s28 + $0x28] sm:$0xff] %vm5005_vm6, %v4968_v1  ;;  %v4761_v10 = vadd.f32 %v4760_v37, %v4712_v17  ;;  %v4667_v48 = vpop.f32.mrf.mxu3  ;;  %v4619_v38 = vadd.f32 %v9401_v4, %v4618_v16  ;;  %v2739_v1 = vmul.f32 0.5, %v9354_v22  ;;  %v4974_v17 = vpop.permute.xlu2 %4973 }
 0x87f   : > { %5028 = vst.msk [vmem:[%s9429_s28 + $0x28] sm:$0xff] %vm5022_vm7, %v2736_v8 }
 0x880   : > { %5045 = vst.msk [vmem:[%s9429_s28 + $0x28] sm:$0xff] %vm5039_vm8, %v6545_v23  ;;  %v4788_v62 = vsub.f32 0.0, %v4761_v10 }
 0x882   : > { %v6493_v63 = vpop.eup %6492  ;;  %v4812_v29 = vmul.f32 1.442695, %v4788_v62 }
 0x883   : > { %v6495_v35 = vpop.eup %6494  ;;  %v4835_v33 = vadd.f32 1.0, %v6493_v63  ;;  %v4713_v46 = vpop.f32.mrf.mxu0 }
 0x884   : > { %4866 = vst.msk [vmem:[%s9429_s28 + $0x30] sm:$0xff] %vm732_vm0, %v6495_v35  ;;  %6496 = vpow2.f32 %v4812_v29  ;;  %v4714_v18 = vadd.f32 %v4713_v46, %v4665_v39  ;;  %v2740_v35 = vmul.f32 0.5, %v9371_v9 }
 0x885   : > { %4931 = vst.msk [vmem:[%s9429_s28 + $0x30] sm:$0xff] %vm4924_vm5, %v9408_v36  ;;  %6498 = vrcp.f32 %v4835_v33  ;;  %v4620_v34 = vpop.f32.mrf.mxu2  ;;  %v4765_v13 = vpop.f32.mrf.mxu1  ;;  %v4668_v36 = vadd.f32 %v4667_v48, %v4619_v38 }
 0x886   : > { %5012 = vst.msk [vmem:[%s9429_s28 + $0x30] sm:$0xff] %vm5005_vm6, %v4970_v51  ;;  %v4763_v31 = vadd.f32 %v4762_v12, %v4714_v18  ;;  %v4669_v53 = vpop.f32.mrf.mxu3  ;;  %v4621_v30 = vadd.f32 %v9401_v4, %v4620_v34  ;;  %v4976_v33 = vpop.permute.xlu1 %4975 }
 0x887   : > { %5029 = vst.msk [vmem:[%s9429_s28 + $0x30] sm:$0xff] %vm5022_vm7, %v2737_v15 }
 0x888   : > { %5046 = vst.msk [vmem:[%s9429_s28 + $0x30] sm:$0xff] %vm5039_vm8, %v6545_v23  ;;  %v4789_v45 = vsub.f32 0.0, %v4763_v31  ;;  %v4670_v0 = vadd.f32 %v4669_v53, %v4621_v30 }
 0x88a   : > { %v6497_v44 = vpop.eup %6496  ;;  %v4814_v11 = vmul.f32 1.442695, %v4789_v45 }
 0x88b   : > { %v6499_v41 = vpop.eup %6498  ;;  %v4836_v58 = vadd.f32 1.0, %v6497_v44  ;;  %v4716_v43 = vpop.f32.mrf.mxu0 }
 0x88c   : > { %4867 = vst.msk [vmem:[%s9429_s28 + $0x38] sm:$0xff] %vm732_vm0, %v6499_v41  ;;  %6500 = vpow2.f32 %v4814_v11  ;;  %v4717_v25 = vadd.f32 %v4716_v43, %v4668_v36  ;;  %v2741_v36 = vmul.f32 0.5, %v9364_v54  ;;  %v4978_v11 = vpop.permute.xlu0 %4977 }
 0x88d   : > { %4932 = vst.msk [vmem:[%s9429_s28 + $0x38] sm:$0xff] %vm4924_vm5, %v9405_v20  ;;  %6502 = vrcp.f32 %v4836_v58  ;;  %v4623_v37 = vpop.f32.mrf.mxu2  ;;  %v4767_v32 = vpop.f32.mrf.mxu1 }
 0x88e   : > { %5013 = vst.msk [vmem:[%s9429_s28 + $0x38] sm:$0xff] %vm5005_vm6, %v4972_v14  ;;  %v4766_v27 = vadd.f32 %v4765_v13, %v4717_v25  ;;  %v4672_v6 = vpop.f32.mrf.mxu3  ;;  %v4624_v8 = vadd.f32 %v9401_v4, %v4623_v37 }
 0x88f   : > { %5030 = vst.msk [vmem:[%s9429_s28 + $0x38] sm:$0xff] %vm5022_vm7, %v2738_v40 }
 0x890   : > { %5047 = vst.msk [vmem:[%s9429_s28 + $0x38] sm:$0xff] %vm5039_vm8, %v6545_v23  ;;  %v4790_v56 = vsub.f32 0.0, %v4766_v27  ;;  %v4673_v48 = vadd.f32 %v4672_v6, %v4624_v8  ;;  %v2743_v8 = vmul.f32 0.5, %v9381_v49 }
 0x892   : > { %v6501_v28 = vpop.eup %6500  ;;  %v4816_v20 = vmul.f32 1.442695, %v4790_v56 }
 0x893   : > { %v6503_v21 = vpop.eup %6502  ;;  %v4837_v42 = vadd.f32 1.0, %v6501_v28  ;;  %v4718_v3 = vpop.f32.mrf.mxu0  ;;  %v2742_v28 = vmul.f32 0.5, %v9366_v2 }
 0x894   : > { %4868 = vst.msk [vmem:[%s9429_s28 + $0x40] sm:$0xff] %vm732_vm0, %v6503_v21  ;;  %6504 = vpow2.f32 %v4816_v20  ;;  %v4719_v24 = vadd.f32 %v4718_v3, %v4670_v0  ;;  %v4980_v0 = vpop.permute.xlu2 %4979 }
 0x895   : > { %4933 = vst.msk [vmem:[%s9429_s28 + $0x40] sm:$0xff] %vm4924_vm5, %v9410_v55  ;;  %6506 = vrcp.f32 %v4837_v42  ;;  %v4625_v12 = vpop.f32.mrf.mxu2  ;;  %v4770_v59 = vpop.f32.mrf.mxu1 }
 0x896   : > { %5014 = vst.msk [vmem:[%s9429_s28 + $0x40] sm:$0xff] %vm5005_vm6, %v4974_v17  ;;  %v4768_v16 = vadd.f32 %v4767_v32, %v4719_v24  ;;  %v4674_v46 = vpop.f32.mrf.mxu3  ;;  %v4626_v51 = vadd.f32 %v9401_v4, %v4625_v12 }
 0x897   : > { %5031 = vst.msk [vmem:[%s9429_s28 + $0x40] sm:$0xff] %vm5022_vm7, %v2739_v1 }
 0x898   : > { %5048 = vst.msk [vmem:[%s9429_s28 + $0x40] sm:$0xff] %vm5039_vm8, %v6545_v23  ;;  %v4791_v22 = vsub.f32 0.0, %v4768_v16  ;;  %v4982_v16 = vpop.permute.xlu1 %4981 }
 0x89a   : > { %v6505_v10 = vpop.eup %6504  ;;  %v4818_v55 = vmul.f32 1.442695, %v4791_v22 }
 0x89b   : > { %v6507_v62 = vpop.eup %6506  ;;  %v4838_v63 = vadd.f32 1.0, %v6505_v10  ;;  %v4721_v39 = vpop.f32.mrf.mxu0 }
 0x89c   : > { %4869 = vst.msk [vmem:[%s9429_s28 + $0x48] sm:$0xff] %vm732_vm0, %v6507_v62  ;;  %6508 = vpow2.f32 %v4818_v55  ;;  %v4722_v29 = vadd.f32 %v4721_v39, %v4673_v48  ;;  %v2744_v55 = vmul.f32 0.5, %v9375_v47  ;;  %v4984_v62 = vpop.permute.xlu0 %4983 }
 0x89d   : > { %4934 = vst.msk [vmem:[%s9429_s28 + $0x48] sm:$0xff] %vm4924_vm5, %v9415_v61  ;;  %6510 = vrcp.f32 %v4838_v63  ;;  %v4628_v9 = vpop.f32.mrf.mxu2  ;;  %v4772_v34 = vpop.f32.mrf.mxu1  ;;  %v4675_v61 = vadd.f32 %v4674_v46, %v4626_v51 }
 0x89e   : > { %5015 = vst.msk [vmem:[%s9429_s28 + $0x48] sm:$0xff] %vm5005_vm6, %v4976_v33  ;;  %v4771_v18 = vadd.f32 %v4770_v59, %v4722_v29  ;;  %v4629_v41 = vadd.f32 %v9401_v4, %v4628_v9  ;;  %v4677_v43 = vpop.f32.mrf.mxu3  ;;  %v4986_v29 = vpop.permute.xlu2 %4985  ;;  %v2746_v33 = vmul.f32 0.5, %v9390_v19 }
 0x89f   : > { %5032 = vst.msk [vmem:[%s9429_s28 + $0x48] sm:$0xff] %vm5022_vm7, %v2740_v35 }
 0x8a0   : > { %5049 = vst.msk [vmem:[%s9429_s28 + $0x48] sm:$0xff] %vm5039_vm8, %v6545_v23  ;;  %v4792_v15 = vsub.f32 0.0, %v4771_v18  ;;  %v4678_v25 = vadd.f32 %v4677_v43, %v4629_v41  ;;  %v4988_v46 = vpop.permute.xlu1 %4987 }
 0x8a2   : > { %v6509_v13 = vpop.eup %6508  ;;  %v4820_v38 = vmul.f32 1.442695, %v4792_v15 }
 0x8a3   : > { %v6511_v31 = vpop.eup %6510  ;;  %v4839_v45 = vadd.f32 1.0, %v6509_v13  ;;  %v4723_v53 = vpop.f32.mrf.mxu0 }
 0x8a4   : > { %4870 = vst.msk [vmem:[%s9429_s28 + $0x50] sm:$0xff] %vm732_vm0, %v6511_v31  ;;  %6512 = vpow2.f32 %v4820_v38  ;;  %v4724_v44 = vadd.f32 %v4723_v53, %v4675_v61 }
 0x8a5   : > { %4935 = vst.msk [vmem:[%s9429_s28 + $0x50] sm:$0xff] %vm4924_vm5, %v9413_v60  ;;  %6514 = vrcp.f32 %v4839_v45  ;;  %v4630_v60 = vpop.f32.mrf.mxu2  ;;  %v4775_v30 = vpop.f32.mrf.mxu1 }
 0x8a6   : > { %5016 = vst.msk [vmem:[%s9429_s28 + $0x50] sm:$0xff] %vm5005_vm6, %v4978_v11  ;;  %v4773_v58 = vadd.f32 %v4772_v34, %v4724_v44  ;;  %v4631_v20 = vadd.f32 %v9401_v4, %v4630_v60  ;;  %v4679_v2 = vpop.f32.mrf.mxu3 }
 0x8a7   : > { %5033 = vst.msk [vmem:[%s9429_s28 + $0x50] sm:$0xff] %vm5022_vm7, %v2741_v36 }
 0x8a8   : > { %5050 = vst.msk [vmem:[%s9429_s28 + $0x50] sm:$0xff] %vm5039_vm8, %v6545_v23  ;;  %v4793_v14 = vsub.f32 0.0, %v4773_v58  ;;  %v4680_v3 = vadd.f32 %v4679_v2, %v4631_v20 }
 0x8aa   : > { %v6513_v54 = vpop.eup %6512  ;;  %v4822_v40 = vmul.f32 1.442695, %v4793_v14 }
 0x8ab   : > { %v6515_v37 = vpop.eup %6514  ;;  %v4840_v32 = vadd.f32 1.0, %v6513_v54  ;;  %v4726_v27 = vpop.f32.mrf.mxu0 }
 0x8ac   : > { %4871 = vst.msk [vmem:[%s9429_s28 + $0x58] sm:$0xff] %vm732_vm0, %v6515_v37  ;;  %6516 = vpow2.f32 %v4822_v40  ;;  %v4727_v56 = vadd.f32 %v4726_v27, %v4678_v25 }
 0x8ad   : > { %4936 = vst.msk [vmem:[%s9429_s28 + $0x58] sm:$0xff] %vm4924_vm5, %v9418_v26  ;;  %6518 = vrcp.f32 %v4840_v32  ;;  %v4777_v12 = vpop.f32.mrf.mxu1 }
 0x8ae   : > { %5017 = vst.msk [vmem:[%s9429_s28 + $0x58] sm:$0xff] %vm5005_vm6, %v4980_v0  ;;  %v4776_v21 = vadd.f32 %v4775_v30, %v4727_v56 }
 0x8af   : > { %5034 = vst.msk [vmem:[%s9429_s28 + $0x58] sm:$0xff] %vm5022_vm7, %v2742_v28 }
 0x8b0   : > { %5051 = vst.msk [vmem:[%s9429_s28 + $0x58] sm:$0xff] %vm5039_vm8, %v6545_v23  ;;  %v4794_v42 = vsub.f32 0.0, %v4776_v21 }
 0x8b2   : > { %v6517_v6 = vpop.eup %6516  ;;  %v4824_v26 = vmul.f32 1.442695, %v4794_v42 }
 0x8b3   : > { %v6519_v24 = vpop.eup %6518  ;;  %v4841_v1 = vadd.f32 1.0, %v6517_v6  ;;  %v4728_v17 = vpop.f32.mrf.mxu0 }
 0x8b4   : > { %4872 = vst.msk [vmem:[%s9429_s28 + $0x60] sm:$0xff] %vm732_vm0, %v6519_v24  ;;  %6520 = vpow2.f32 %v4824_v26  ;;  %v4729_v4 = vadd.f32 %v4728_v17, %v4680_v3 }
 0x8b5   : > { %4937 = vst.msk [vmem:[%s9429_s28 + $0x60] sm:$0xff] %vm4924_vm5, %v9423_v52  ;;  %6522 = vrcp.f32 %v4841_v1 }
 0x8b6   : > { %5018 = vst.msk [vmem:[%s9429_s28 + $0x60] sm:$0xff] %vm5005_vm6, %v4982_v16  ;;  %v4778_v59 = vadd.f32 %v4777_v12, %v4729_v4 }
 0x8b7   : > { %5035 = vst.msk [vmem:[%s9429_s28 + $0x60] sm:$0xff] %vm5022_vm7, %v2743_v8 }
 0x8b8   : > { %5052 = vst.msk [vmem:[%s9429_s28 + $0x60] sm:$0xff] %vm5039_vm8, %v6545_v23  ;;  %v4795_v22 = vsub.f32 0.0, %v4778_v59 }
 0x8ba   : > { %v6521_v49 = vpop.eup %6520  ;;  %v4826_v10 = vmul.f32 1.442695, %v4795_v22 }
 0x8bb   : > { %v6523_v48 = vpop.eup %6522  ;;  %v4842_v52 = vadd.f32 1.0, %v6521_v49 }
 0x8bc   : > { %4873 = vst.msk [vmem:[%s9429_s28 + $0x68] sm:$0xff] %vm732_vm0, %v6523_v48  ;;  %6524 = vpow2.f32 %v4826_v10 }
 0x8bd   : > { %4938 = vst.msk [vmem:[%s9429_s28 + $0x68] sm:$0xff] %vm4924_vm5, %v9420_v50  ;;  %6526 = vrcp.f32 %v4842_v52  ;;  %v2745_v50 = vmul.f32 0.5, %v9377_v5 }
 0x8be   : > { %5019 = vst.msk [vmem:[%s9429_s28 + $0x68] sm:$0xff] %vm5005_vm6, %v4984_v62 }
 0x8bf   : > { %5036 = vst.msk [vmem:[%s9429_s28 + $0x68] sm:$0xff] %vm5022_vm7, %v2744_v55 }
 0x8c0   : > { %5053 = vst.msk [vmem:[%s9429_s28 + $0x68] sm:$0xff] %vm5039_vm8, %v6545_v23 }
 0x8c2   : > { %v6525_v63 = vpop.eup %6524 }
 0x8c3   : > { %v6527_v39 = vpop.eup %6526  ;;  %v4843_v47 = vadd.f32 1.0, %v6525_v63 }
 0x8c4   : > { %4874 = vst.msk [vmem:[%s9429_s28 + $0x70] sm:$0xff] %vm732_vm0, %v6527_v39 }
 0x8c5   : > { %4939 = vst.msk [vmem:[%s9429_s28 + $0x70] sm:$0xff] %vm4924_vm5, %v9431_v57  ;;  %6528 = vrcp.f32 %v4843_v47 }
 0x8c6   : > { %5020 = vst.msk [vmem:[%s9429_s28 + $0x70] sm:$0xff] %vm5005_vm6, %v4986_v29 }
 0x8c7   : > { %5037 = vst.msk [vmem:[%s9429_s28 + $0x70] sm:$0xff] %vm5022_vm7, %v2745_v50 }
 0x8c8   : > { %5054 = vst.msk [vmem:[%s9429_s28 + $0x70] sm:$0xff] %vm5039_vm8, %v6545_v23 }
 0x8cb   : > { %v6529_v35 = vpop.eup %6528 }
 0x8cc   : > { %4875 = vst.msk [vmem:[%s9429_s28 + $0x78] sm:$0xff] %vm732_vm0, %v6529_v35 }
 0x8cd   : > { %4940 = vst.msk [vmem:[%s9429_s28 + $0x78] sm:$0xff] %vm4924_vm5, %v9447_v7 }
 0x8ce   : > { %5021 = vst.msk [vmem:[%s9429_s28 + $0x78] sm:$0xff] %vm5005_vm6, %v4988_v46 }
 0x8cf   : > { %5038 = vst.msk [vmem:[%s9429_s28 + $0x78] sm:$0xff] %vm5022_vm7, %v2746_v33 }
 0x8d0   : > { %5055 = vst.msk [vmem:[%s9429_s28 + $0x78] sm:$0xff] %vm5039_vm8, %v6545_v23 }
 0x8d1 PF: > { %s28_s27 = sadd.s32 1, %s6536_s27  }
 0x8d2   : > { %p25_p4 = scmp.ge.s32.totalorder %s28_s27, 4  }
 0x8d4   :  { %27 = sbr.rel (!%p25_p4) target bundleno = 4 (0x4), region = 125 }

</bundles_post_ra>
